<compile_context>
chip_gen: v6e
topology: v6e:2x2x1
jax: 0.10.0
libtpu: 0.0.40
codegen_flags: <defaults>
</compile_context>

<pallas_src>
import functools
import math

import numpy as np
import jax
import jax.numpy as jnp
from jax.experimental import pallas as pl
from jax.experimental.pallas import tpu as pltpu

# ---- model hyperparameters implied by the PyTorch module ----
D_MODEL = 64        # TransformerEncoder d_model
N_HEADS = 4
HEAD_DIM = D_MODEL // N_HEADS
FF_DIM = 2048       # nn.TransformerEncoderLayer default dim_feedforward
FF_CHUNK = 512      # FFN column chunk (bounds the f32 intermediate)
N_LAYERS = 2
HIDDEN = 64         # LSTM hidden_dim
ANOM = 32           # anomaly_dim
LN_EPS = 1e-5

# fused tail-projection column layout (all slice starts are multiples of 128)
OFF_GX = 0                      # LSTM input projection -> columns [0, 256)
OFF_A1 = 4 * HIDDEN             # anomaly head Linear(64,64) -> [256, 320)
OFF_M = OFF_A1 + 128            # memory projection Linear(64,32) -> [384, 416)
TAIL_N = OFF_M + 128            # padded to 512 lanes


def _layernorm(y, w, b):
    mu = jnp.mean(y, axis=-1, keepdims=True)
    var = jnp.mean((y - mu) ** 2, axis=-1, keepdims=True)   # biased var (PyTorch)
    return (y - mu) * jax.lax.rsqrt(var + LN_EPS) * w + b


def _softmax_lastdim(s):
    s = s - jnp.max(s, axis=-1, keepdims=True)
    e = jnp.exp(s)
    return e / jnp.sum(e, axis=-1, keepdims=True)            # exact divide (parity)


# ---------------------------------------------------------------------------
# Single fused kernel.  grid = (batch_tiles, N_LAYERS); for each batch tile the
# layer axis iterates sequentially with the residual stream resident in VMEM
# scratch.  On the last layer the LSTM + anomaly head + decoder run on the
# still-resident encoder output for that tile.
# ---------------------------------------------------------------------------
def _fused_kernel(Bt, T,
                  x_ref,
                  inw_ref, inb_ref, ow_ref, ob_ref,
                  n1w_ref, n1b_ref, l1w_ref, l1b_ref,
                  l2w_ref, l2b_ref, n2w_ref, n2b_ref,
                  whh_ref, catw_ref, catb_ref,
                  a2w_ref, a2b_ref, dhw_ref, dmw_ref, db_ref,
                  o_ref,
                  h_scr, gx_scr):
    l = pl.program_id(1)
    rows = Bt * T

    @pl.when(l == 0)
    def _():
        h_scr[...] = x_ref[...]

    x = h_scr[...]                                  # (rows, D) f32 residual stream
    x_bf = x.astype(jnp.bfloat16)

    # ---- multi-head self attention (q = k = v = x), all heads batched ----
    qkv = (jnp.dot(x_bf, inw_ref[0], preferred_element_type=jnp.float32)
           + inb_ref[0])                            # (rows, 3D) f32
    scale = 1.0 / math.sqrt(HEAD_DIM)

    def split_heads(m):                             # (rows, D) -> (Bt*H, T, hd)
        m = m.reshape(Bt, T, N_HEADS, HEAD_DIM)
        m = jnp.transpose(m, (0, 2, 1, 3))
        return m.reshape(Bt * N_HEADS, T, HEAD_DIM)

    q = split_heads(qkv[:, :D_MODEL] * scale).astype(jnp.bfloat16)
    k = split_heads(qkv[:, D_MODEL:2 * D_MODEL]).astype(jnp.bfloat16)
    v = split_heads(qkv[:, 2 * D_MODEL:]).astype(jnp.bfloat16)

    sc = jnp.einsum('bqd,bkd->bqk', q, k,
                    preferred_element_type=jnp.float32)        # (Bt*H, T, T)
    p = _softmax_lastdim(sc)                                   # f32 softmax
    ctx = jnp.einsum('bqk,bkd->bqd', p.astype(jnp.bfloat16), v,
                     preferred_element_type=jnp.float32)       # (Bt*H, T, hd)
    ctx = jnp.transpose(ctx.reshape(Bt, N_HEADS, T, HEAD_DIM), (0, 2, 1, 3))
    attn = ctx.reshape(rows, D_MODEL)
    attn = (jnp.dot(attn.astype(jnp.bfloat16), ow_ref[0],
                    preferred_element_type=jnp.float32) + ob_ref[0])

    # residual + norm1 (post-norm, PyTorch default norm_first=False)
    y = _layernorm(x + attn, n1w_ref[0], n1b_ref[0])
    y_bf = y.astype(jnp.bfloat16)

    # feed-forward, chunked over FF_DIM so the (rows, 2048) f32 intermediate is
    # never materialized: each 512-column chunk -> ReLU -> bf16 -> accumulate.
    ff = jnp.zeros((rows, D_MODEL), jnp.float32)
    for c0 in range(0, FF_DIM, FF_CHUNK):
        w1c = l1w_ref[0, :, c0:c0 + FF_CHUNK]                  # (64, 512) bf16
        b1c = l1b_ref[0, :, c0:c0 + FF_CHUNK]                  # (1, 512) f32
        h1c = jnp.maximum(
            jnp.dot(y_bf, w1c, preferred_element_type=jnp.float32) + b1c, 0.0)
        w2c = l2w_ref[0, c0:c0 + FF_CHUNK, :]                  # (512, 64) bf16
        ff = ff + jnp.dot(h1c.astype(jnp.bfloat16), w2c,
                          preferred_element_type=jnp.float32)
    ff = ff + l2b_ref[0]

    h_new = _layernorm(y + ff, n2w_ref[0], n2b_ref[0])
    h_scr[...] = h_new

    # ---- after the last encoder layer: LSTM + anomaly head + decoder ----
    @pl.when(l == pl.num_programs(1) - 1)
    def _():
        enc = h_new                                  # (rows, D) f32, VMEM-resident
        enc_bf = enc.astype(jnp.bfloat16)

        # One fused, lane-dense tail projection: [LSTM w_ih | anomaly L1 | mem].
        tail = (jnp.dot(enc_bf, catw_ref[...], preferred_element_type=jnp.float32)
                + catb_ref[...])                     # (rows, 512) f32
        gx = tail[:, OFF_GX:OFF_GX + 4 * HIDDEN]                 # (rows, 256)
        h1a = jnp.maximum(tail[:, OFF_A1:OFF_A1 + 64], 0.0)      # (rows, 64)
        mp = tail[:, OFF_M:OFF_M + ANOM]                         # (rows, 32)

        # LSTM input projection was hoisted out of the serial time loop (gx).
        gx_scr[...] = jnp.transpose(gx.reshape(Bt, T, 4 * HIDDEN), (1, 0, 2))
        whh = whh_ref[...]                           # (H, 4H) bf16

        def step(t, carry):
            h, c = carry
            g = gx_scr[t] + jnp.dot(h.astype(jnp.bfloat16), whh,
                                    preferred_element_type=jnp.float32)  # (Bt, 4H)
            # Gate column order here is (i, f, o, g): one sigmoid over 3H lanes
            # plus one tanh.  NOTE: PyTorch nn.LSTM stores (i, f, g, o); loading
            # a real checkpoint requires permuting the 4H blocks accordingly.
            sig = jax.nn.sigmoid(g[:, :3 * HIDDEN])
            gg = jnp.tanh(g[:, 3 * HIDDEN:])
            i_g = sig[:, :HIDDEN]
            f_g = sig[:, HIDDEN:2 * HIDDEN]
            o_g = sig[:, 2 * HIDDEN:]
            c = f_g * c + i_g * gg
            h = o_g * jnp.tanh(c)
            return (h, c)

        h0 = jnp.zeros((Bt, HIDDEN), jnp.float32)
        c0 = jnp.zeros((Bt, HIDDEN), jnp.float32)
        unroll = True if T <= 32 else 4              # adaptive unroll (vreg budget)
        last_h, _ = jax.lax.fori_loop(0, T, step, (h0, c0), unroll=unroll)

        # anomaly-score head (second linear is a row-vector dot) + time softmax
        s = jax.nn.sigmoid(jnp.sum(h1a * a2w_ref[...], axis=-1, keepdims=True)
                           + a2b_ref[...])           # (rows, 1)
        s3 = s.reshape(Bt, T, 1)
        s3 = s3 - jnp.max(s3, axis=1, keepdims=True)
        e = jnp.exp(s3)
        w = e / jnp.sum(e, axis=1, keepdims=True)    # exact softmax over time

        mp3 = mp.reshape(Bt, T, ANOM)                # memory projection (+bias)
        memory = jnp.sum(w * mp3, axis=1)            # (Bt, 32)

        # decoder Linear(96, 1) on concat([last_hidden, memory]) via split weights
        out = (jnp.sum(last_h * dhw_ref[...], axis=-1, keepdims=True)
               + jnp.sum(memory * dmw_ref[...], axis=-1, keepdims=True)
               + db_ref[...])                        # (Bt, 1)
        o_ref[...] = out


def _const_spec(a):
    n = a.ndim
    return pl.BlockSpec(a.shape, lambda b, l, _n=n: (0,) * _n)


def _layer_spec(a):
    rest = a.shape[1:]
    n = len(rest)
    return pl.BlockSpec((1,) + rest, lambda b, l, _n=n: (l,) + (0,) * _n)


def _pick_batch_tile(B, T):
    """Batch-tile size: multiple of 8 (or all of B) bounding rows per tile."""
    if B <= 8 or B % 8 != 0:
        return B
    target_rows = 512                                # ~85% of HBM roofline region
    bt = 8
    while bt * 2 <= B and B % (bt * 2) == 0 and (bt * 2) * T <= target_rows:
        bt *= 2
    return bt


@jax.jit
def streamflow_forward(x, params):
    """x: (B, T, 1) float32  ->  (B, 1) float32."""
    B, T, _ = x.shape
    B_TILE = _pick_batch_tile(B, T)

    # glue: tiny input projection Linear(1, 64) + positional encoding; dropout
    # layers are identity in eval mode.
    h = jnp.matmul(x, params["proj_w"]) + params["proj_b"]           # (B, T, 64)
    h = h + params["pe"][:, :T, :]
    h2d = h.reshape(B * T, D_MODEL).astype(jnp.float32)

    lp = params["layers"]
    layer_ws = [lp["in_w"], lp["in_b"], lp["out_w"], lp["out_b"],
                lp["n1_w"], lp["n1_b"], lp["l1_w"], lp["l1_b"],
                lp["l2_w"], lp["l2_b"], lp["n2_w"], lp["n2_b"]]
    tp = params["tail"]
    tail_ws = [tp["w_hh"], tp["cat_w"], tp["cat_b"],
               tp["a2_w"], tp["a2_b"], tp["dw_h"], tp["dw_m"], tp["d_b"]]

    kernel = functools.partial(_fused_kernel, B_TILE, T)
    return pl.pallas_call(
        kernel,
        grid=(B // B_TILE, N_LAYERS),
        in_specs=([pl.BlockSpec((B_TILE * T, D_MODEL), lambda b, l: (b, 0))]
                  + [_layer_spec(w) for w in layer_ws]
                  + [_const_spec(w) for w in tail_ws]),
        out_specs=pl.BlockSpec((B_TILE, 1), lambda b, l: (b, 0)),
        out_shape=jax.ShapeDtypeStruct((B, 1), jnp.float32),
        scratch_shapes=[
            pltpu.VMEM((B_TILE * T, D_MODEL), jnp.float32),   # residual stream
            pltpu.VMEM((T, B_TILE, 4 * HIDDEN), jnp.float32), # LSTM gates_x
        ],
        compiler_params=pltpu.CompilerParams(
            # batch tiles are independent (megacore-parallel on v7x);
            # the layer axis is a sequential carry over the residual scratch.
            dimension_semantics=("parallel", "arbitrary"),
            vmem_limit_bytes=32 * 1024 * 1024),
    )(h2d, *layer_ws, *tail_ws)


# ---------------------------------------------------------------------------
# Parameters (deterministic synthetic init).  Matmul weights stored (in, out)
# and in bf16 (f32 accumulation in-kernel); biases / LayerNorm params in f32.
# ---------------------------------------------------------------------------
def make_positional_encoding(d_model=D_MODEL, max_len=500):
    pe = np.zeros((max_len, d_model), dtype=np.float32)
    position = np.arange(0, max_len, dtype=np.float32)[:, None]
    div_term = np.exp(np.arange(0, d_model, 2, dtype=np.float32)
                      * (-np.log(10000.0) / d_model))
    pe[:, 0::2] = np.sin(position * div_term)
    pe[:, 1::2] = np.cos(position * div_term)
    return jnp.asarray(pe[None])                                     # (1, max_len, d)


def init_params(key):
    scale = 0.1

    def nxt():
        nonlocal key
        key, sub = jax.random.split(key)
        return sub

    def rand(shape, dtype=jnp.float32):
        return (scale * jax.random.normal(nxt(), shape, dtype=jnp.float32)).astype(dtype)

    bf16 = jnp.bfloat16
    ln1 = jnp.ones((N_LAYERS, 1, D_MODEL), jnp.float32)

    # fused tail projection weight / bias: [LSTM w_ih | anomaly L1 (pad) | mem (pad)]
    w_ih = rand((D_MODEL, 4 * HIDDEN))               # gate col order (i, f, o, g)
    lstm_b = rand((1, 4 * HIDDEN))                   # bias_ih + bias_hh combined
    a1_w = rand((D_MODEL, 64))
    a1_b = rand((1, 64))
    m_w = rand((D_MODEL, ANOM))
    m_b = rand((1, ANOM))
    cat_w = jnp.zeros((D_MODEL, TAIL_N), jnp.float32)
    cat_w = cat_w.at[:, OFF_GX:OFF_GX + 4 * HIDDEN].set(w_ih)
    cat_w = cat_w.at[:, OFF_A1:OFF_A1 + 64].set(a1_w)
    cat_w = cat_w.at[:, OFF_M:OFF_M + ANOM].set(m_w)
    cat_b = jnp.zeros((1, TAIL_N), jnp.float32)
    cat_b = cat_b.at[:, OFF_GX:OFF_GX + 4 * HIDDEN].set(lstm_b)
    cat_b = cat_b.at[:, OFF_A1:OFF_A1 + 64].set(a1_b)
    cat_b = cat_b.at[:, OFF_M:OFF_M + ANOM].set(m_b)

    params = {
        "proj_w": rand((1, D_MODEL)),                # input projection Linear(1,64)
        "proj_b": rand((1, D_MODEL)),
        "pe": make_positional_encoding(),
        "layers": {                                  # stacked over N_LAYERS
            "in_w":  rand((N_LAYERS, D_MODEL, 3 * D_MODEL), bf16),  # MHA in_proj
            "in_b":  rand((N_LAYERS, 1, 3 * D_MODEL)),
            "out_w": rand((N_LAYERS, D_MODEL, D_MODEL), bf16),      # MHA out_proj
            "out_b": rand((N_LAYERS, 1, D_MODEL)),
            "n1_w":  ln1 + rand((N_LAYERS, 1, D_MODEL)),
            "n1_b":  rand((N_LAYERS, 1, D_MODEL)),
            "l1_w":  rand((N_LAYERS, D_MODEL, FF_DIM), bf16),
            "l1_b":  rand((N_LAYERS, 1, FF_DIM)),
            "l2_w":  rand((N_LAYERS, FF_DIM, D_MODEL), bf16),
            "l2_b":  rand((N_LAYERS, 1, D_MODEL)),
            "n2_w":  ln1 + rand((N_LAYERS, 1, D_MODEL)),
            "n2_b":  rand((N_LAYERS, 1, D_MODEL)),
        },
        "tail": {
            "w_hh":  rand((HIDDEN, 4 * HIDDEN), bf16),
            "cat_w": cat_w.astype(bf16),             # fused (64, 512) tail weight
            "cat_b": cat_b,                          # fused (1, 512) tail bias
            "a2_w":  rand((1, 64)),                  # Linear(64,1) weight as row vec
            "a2_b":  rand((1, 1)),
            "dw_h":  rand((1, HIDDEN)),              # decoder weight: hidden part
            "dw_m":  rand((1, ANOM)),                # decoder weight: memory part
            "d_b":   rand((1, 1)),
        },
    }
    return params


if __name__ == "__main__":
    B, T = 2, 8
    key = jax.random.PRNGKey(0)
    k_param, k_x = jax.random.split(key)

    params = init_params(k_param)
    x = jax.random.normal(k_x, (B, T, 1), dtype=jnp.float32)

    out = streamflow_forward(x, params)
    out = jax.block_until_ready(out)
    assert out.shape == (B, 1) and out.dtype == jnp.float32
    print("KERNEL_OK")
</pallas_src>

<mosaic_0001>
module attributes {stable_mosaic.version = 11 : i64} {
  func.func @_fused_kernel(%arg0: i32, %arg1: i32, %arg2: memref<16x64xf32, #tpu.memory_space<vmem>>, %arg3: memref<1x64x192xbf16, #tpu.memory_space<vmem>>, %arg4: memref<1x1x192xf32, #tpu.memory_space<vmem>>, %arg5: memref<1x64x64xbf16, #tpu.memory_space<vmem>>, %arg6: memref<1x1x64xf32, #tpu.memory_space<vmem>>, %arg7: memref<1x1x64xf32, #tpu.memory_space<vmem>>, %arg8: memref<1x1x64xf32, #tpu.memory_space<vmem>>, %arg9: memref<1x64x2048xbf16, #tpu.memory_space<vmem>>, %arg10: memref<1x1x2048xf32, #tpu.memory_space<vmem>>, %arg11: memref<1x2048x64xbf16, #tpu.memory_space<vmem>>, %arg12: memref<1x1x64xf32, #tpu.memory_space<vmem>>, %arg13: memref<1x1x64xf32, #tpu.memory_space<vmem>>, %arg14: memref<1x1x64xf32, #tpu.memory_space<vmem>>, %arg15: memref<64x256xbf16, #tpu.memory_space<vmem>>, %arg16: memref<64x512xbf16, #tpu.memory_space<vmem>>, %arg17: memref<1x512xf32, #tpu.memory_space<vmem>>, %arg18: memref<1x64xf32, #tpu.memory_space<vmem>>, %arg19: memref<1x1xf32, #tpu.memory_space<vmem>>, %arg20: memref<1x64xf32, #tpu.memory_space<vmem>>, %arg21: memref<1x32xf32, #tpu.memory_space<vmem>>, %arg22: memref<1x1xf32, #tpu.memory_space<vmem>>, %arg23: memref<2x1xf32, #tpu.memory_space<vmem>>, %arg24: memref<16x64xf32, #tpu.memory_space<vmem>>, %arg25: memref<8x2x256xf32, #tpu.memory_space<vmem>>) attributes {dimension_semantics = [#tpu.dimension_semantics<parallel>, #tpu.dimension_semantics<arbitrary>], iteration_bounds = array<i64: 1, 2>, scalar_prefetch = 0 : i64, scratch_operands = 2 : i64, tpu.core_type = #tpu.core_type<tc>, window_params = [{transform_indices = @transform_0, window_bounds = array<i64: 16, 64>}, {transform_indices = @transform_1, window_bounds = array<i64: 1, 64, 192>}, {transform_indices = @transform_2, window_bounds = array<i64: 1, 1, 192>}, {transform_indices = @transform_3, window_bounds = array<i64: 1, 64, 64>}, {transform_indices = @transform_4, window_bounds = array<i64: 1, 1, 64>}, {transform_indices = @transform_5, window_bounds = array<i64: 1, 1, 64>}, {transform_indices = @transform_6, window_bounds = array<i64: 1, 1, 64>}, {transform_indices = @transform_7, window_bounds = array<i64: 1, 64, 2048>}, {transform_indices = @transform_8, window_bounds = array<i64: 1, 1, 2048>}, {transform_indices = @transform_9, window_bounds = array<i64: 1, 2048, 64>}, {transform_indices = @transform_10, window_bounds = array<i64: 1, 1, 64>}, {transform_indices = @transform_11, window_bounds = array<i64: 1, 1, 64>}, {transform_indices = @transform_12, window_bounds = array<i64: 1, 1, 64>}, {pipeline_mode = #tpu.pipeline_mode<synchronous>, transform_indices = @transform_13, window_bounds = array<i64: 64, 256>}, {pipeline_mode = #tpu.pipeline_mode<synchronous>, transform_indices = @transform_14, window_bounds = array<i64: 64, 512>}, {pipeline_mode = #tpu.pipeline_mode<synchronous>, transform_indices = @transform_15, window_bounds = array<i64: 1, 512>}, {pipeline_mode = #tpu.pipeline_mode<synchronous>, transform_indices = @transform_16, window_bounds = array<i64: 1, 64>}, {pipeline_mode = #tpu.pipeline_mode<synchronous>, transform_indices = @transform_17, window_bounds = array<i64: 1, 1>}, {pipeline_mode = #tpu.pipeline_mode<synchronous>, transform_indices = @transform_18, window_bounds = array<i64: 1, 64>}, {pipeline_mode = #tpu.pipeline_mode<synchronous>, transform_indices = @transform_19, window_bounds = array<i64: 1, 32>}, {pipeline_mode = #tpu.pipeline_mode<synchronous>, transform_indices = @transform_20, window_bounds = array<i64: 1, 1>}, {transform_indices = @transform_21, window_bounds = array<i64: 2, 1>}]} {
    %c0_i32 = arith.constant 0 : i32
    %0 = arith.cmpi eq, %arg1, %c0_i32 : i32
    %1 = arith.extui %0 : i1 to i32
    %c0_i32_0 = arith.constant 0 : i32
    %2 = arith.cmpi ne, %1, %c0_i32_0 : i32
    scf.if %2 {
      %c0_94 = arith.constant 0 : index
      %c0_95 = arith.constant 0 : index
      %172 = vector.load %arg2[%c0_94, %c0_95] : memref<16x64xf32, #tpu.memory_space<vmem>>, vector<16x64xf32>
      %c0_96 = arith.constant 0 : index
      %c0_97 = arith.constant 0 : index
      %173 = vector.load %arg24[%c0_96, %c0_97] : memref<16x64xf32, #tpu.memory_space<vmem>>, vector<16x64xf32>
      tpu.vector_store %arg24[%c0_96, %c0_97], %172 {strides = array<i32>} : memref<16x64xf32, #tpu.memory_space<vmem>>, vector<16x64xf32>,
    } else {
    }
    %c0 = arith.constant 0 : index
    %c0_1 = arith.constant 0 : index
    %3 = vector.load %arg24[%c0, %c0_1] : memref<16x64xf32, #tpu.memory_space<vmem>>, vector<16x64xf32>
    %4 = arith.truncf %3 : vector<16x64xf32> to vector<16x64xbf16>
    %c0_2 = arith.constant 0 : index
    %c0_3 = arith.constant 0 : index
    %c0_4 = arith.constant 0 : index
    %5 = vector.load %arg3[%c0_2, %c0_3, %c0_4] : memref<1x64x192xbf16, #tpu.memory_space<vmem>>, vector<1x64x192xbf16>
    %6 = vector.shape_cast %5 : vector<1x64x192xbf16> to vector<64x192xbf16>
    %cst = arith.constant dense<0.000000e+00> : vector<16x192xf32>
    %7 = tpu.matmul %4, %6, %cst {dimension_numbers = #tpu.dot_dimension_numbers<[1], [0], [0], [1], [0, 0, 1, 1], [], []>} : vector<16x64xbf16>, vector<64x192xbf16>, vector<16x192xf32> -> vector<16x192xf32>
    %c0_5 = arith.constant 0 : index
    %c0_6 = arith.constant 0 : index
    %c0_7 = arith.constant 0 : index
    %8 = vector.load %arg4[%c0_5, %c0_6, %c0_7] : memref<1x1x192xf32, #tpu.memory_space<vmem>>, vector<1x1x192xf32>
    %9 = vector.shape_cast %8 : vector<1x1x192xf32> to vector<1x192xf32>
    %10 = vector.broadcast %9 : vector<1x192xf32> to vector<16x192xf32>
    %11 = arith.addf %7, %10 : vector<16x192xf32>
    %12 = vector.extract_strided_slice %11 {offsets = [0, 0], sizes = [16, 64], strides = [1, 1]} : vector<16x192xf32> to vector<16x64xf32>
    %cst_8 = arith.constant 2.500000e-01 : f32
    %13 = vector.broadcast %cst_8 : f32 to vector<16x64xf32>
    %14 = arith.mulf %12, %13 : vector<16x64xf32>
    %15 = vector.shape_cast %14 : vector<16x64xf32> to vector<2x8x4x16xf32>
    %16 = tpu.transpose %15, [0, 2, 1, 3] : vector<2x8x4x16xf32> -> vector<2x4x8x16xf32>
    %17 = vector.shape_cast %16 : vector<2x4x8x16xf32> to vector<8x8x16xf32>
    %18 = arith.truncf %17 : vector<8x8x16xf32> to vector<8x8x16xbf16>
    %19 = vector.extract_strided_slice %11 {offsets = [0, 64], sizes = [16, 64], strides = [1, 1]} : vector<16x192xf32> to vector<16x64xf32>
    %20 = vector.shape_cast %19 : vector<16x64xf32> to vector<2x8x4x16xf32>
    %21 = tpu.transpose %20, [0, 2, 1, 3] : vector<2x8x4x16xf32> -> vector<2x4x8x16xf32>
    %22 = vector.shape_cast %21 : vector<2x4x8x16xf32> to vector<8x8x16xf32>
    %23 = arith.truncf %22 : vector<8x8x16xf32> to vector<8x8x16xbf16>
    %24 = vector.extract_strided_slice %11 {offsets = [0, 128], sizes = [16, 64], strides = [1, 1]} : vector<16x192xf32> to vector<16x64xf32>
    %25 = vector.shape_cast %24 : vector<16x64xf32> to vector<2x8x4x16xf32>
    %26 = tpu.transpose %25, [0, 2, 1, 3] : vector<2x8x4x16xf32> -> vector<2x4x8x16xf32>
    %27 = vector.shape_cast %26 : vector<2x4x8x16xf32> to vector<8x8x16xf32>
    %28 = arith.truncf %27 : vector<8x8x16xf32> to vector<8x8x16xbf16>
    "tpu.trace_start"() <{level = 10 : i32, message = "bqd,bkd->bqk"}> : () -> ()
    %cst_9 = arith.constant dense<0.000000e+00> : vector<8x8x8xf32>
    %29 = tpu.matmul %18, %23, %cst_9 {dimension_numbers = #tpu.dot_dimension_numbers<[2], [2], [1], [1], [0, 0, 0, 1, 1, 1], [0], [0]>} : vector<8x8x16xbf16>, vector<8x8x16xbf16>, vector<8x8x8xf32> -> vector<8x8x8xf32>
    "tpu.trace_stop"() : () -> ()
    %cst_10 = arith.constant dense<0xFF800000> : vector<8x8xf32>
    %30 = vector.multi_reduction <maximumf>, %29, %cst_10 [2] : vector<8x8x8xf32> to vector<8x8xf32>
    %31 = vector.shape_cast %30 : vector<8x8xf32> to vector<8x8x1xf32>
    %32 = vector.broadcast %31 : vector<8x8x1xf32> to vector<8x8x8xf32>
    %33 = arith.subf %29, %32 : vector<8x8x8xf32>
    %34 = math.exp %33 : vector<8x8x8xf32>
    %cst_11 = arith.constant dense<0.000000e+00> : vector<8x8xf32>
    %35 = vector.multi_reduction <add>, %34, %cst_11 [2] : vector<8x8x8xf32> to vector<8x8xf32>
    %36 = vector.shape_cast %35 : vector<8x8xf32> to vector<8x8x1xf32>
    %37 = vector.broadcast %36 : vector<8x8x1xf32> to vector<8x8x8xf32>
    %38 = arith.divf %34, %37 : vector<8x8x8xf32>
    %39 = arith.truncf %38 : vector<8x8x8xf32> to vector<8x8x8xbf16>
    "tpu.trace_start"() <{level = 10 : i32, message = "bqk,bkd->bqd"}> : () -> ()
    %cst_12 = arith.constant dense<0.000000e+00> : vector<8x8x16xf32>
    %40 = tpu.matmul %39, %28, %cst_12 {dimension_numbers = #tpu.dot_dimension_numbers<[2], [1], [1], [2], [0, 0, 0, 1, 1, 2], [0], [0]>} : vector<8x8x8xbf16>, vector<8x8x16xbf16>, vector<8x8x16xf32> -> vector<8x8x16xf32>
    "tpu.trace_stop"() : () -> ()
    %41 = vector.shape_cast %40 : vector<8x8x16xf32> to vector<2x4x8x16xf32>
    %42 = tpu.transpose %41, [0, 2, 1, 3] : vector<2x4x8x16xf32> -> vector<2x8x4x16xf32>
    %43 = vector.shape_cast %42 : vector<2x8x4x16xf32> to vector<16x64xf32>
    %44 = arith.truncf %43 : vector<16x64xf32> to vector<16x64xbf16>
    %c0_13 = arith.constant 0 : index
    %c0_14 = arith.constant 0 : index
    %c0_15 = arith.constant 0 : index
    %45 = vector.load %arg5[%c0_13, %c0_14, %c0_15] : memref<1x64x64xbf16, #tpu.memory_space<vmem>>, vector<1x64x64xbf16>
    %46 = vector.shape_cast %45 : vector<1x64x64xbf16> to vector<64x64xbf16>
    %cst_16 = arith.constant dense<0.000000e+00> : vector<16x64xf32>
    %47 = tpu.matmul %44, %46, %cst_16 {dimension_numbers = #tpu.dot_dimension_numbers<[1], [0], [0], [1], [0, 0, 1, 1], [], []>} : vector<16x64xbf16>, vector<64x64xbf16>, vector<16x64xf32> -> vector<16x64xf32>
    %c0_17 = arith.constant 0 : index
    %c0_18 = arith.constant 0 : index
    %c0_19 = arith.constant 0 : index
    %48 = vector.load %arg6[%c0_17, %c0_18, %c0_19] : memref<1x1x64xf32, #tpu.memory_space<vmem>>, vector<1x1x64xf32>
    %49 = vector.shape_cast %48 : vector<1x1x64xf32> to vector<1x64xf32>
    %50 = vector.broadcast %49 : vector<1x64xf32> to vector<16x64xf32>
    %51 = arith.addf %47, %50 : vector<16x64xf32>
    %52 = arith.addf %3, %51 : vector<16x64xf32>
    %c0_20 = arith.constant 0 : index
    %c0_21 = arith.constant 0 : index
    %c0_22 = arith.constant 0 : index
    %53 = vector.load %arg7[%c0_20, %c0_21, %c0_22] : memref<1x1x64xf32, #tpu.memory_space<vmem>>, vector<1x1x64xf32>
    %54 = vector.shape_cast %53 : vector<1x1x64xf32> to vector<1x64xf32>
    %c0_23 = arith.constant 0 : index
    %c0_24 = arith.constant 0 : index
    %c0_25 = arith.constant 0 : index
    %55 = vector.load %arg8[%c0_23, %c0_24, %c0_25] : memref<1x1x64xf32, #tpu.memory_space<vmem>>, vector<1x1x64xf32>
    %56 = vector.shape_cast %55 : vector<1x1x64xf32> to vector<1x64xf32>
    %cst_26 = arith.constant dense<0.000000e+00> : vector<16xf32>
    %57 = vector.multi_reduction <add>, %52, %cst_26 [1] : vector<16x64xf32> to vector<16xf32>
    %58 = vector.shape_cast %57 : vector<16xf32> to vector<16x1xf32>
    %cst_27 = arith.constant 6.400000e+01 : f32
    %59 = vector.broadcast %cst_27 : f32 to vector<16x1xf32>
    %60 = arith.divf %58, %59 : vector<16x1xf32>
    %61 = vector.broadcast %60 : vector<16x1xf32> to vector<16x64xf32>
    %62 = arith.subf %52, %61 : vector<16x64xf32>
    %63 = arith.mulf %62, %62 : vector<16x64xf32>
    %cst_28 = arith.constant dense<0.000000e+00> : vector<16xf32>
    %64 = vector.multi_reduction <add>, %63, %cst_28 [1] : vector<16x64xf32> to vector<16xf32>
    %65 = vector.shape_cast %64 : vector<16xf32> to vector<16x1xf32>
    %cst_29 = arith.constant 6.400000e+01 : f32
    %66 = vector.broadcast %cst_29 : f32 to vector<16x1xf32>
    %67 = arith.divf %65, %66 : vector<16x1xf32>
    %68 = vector.broadcast %60 : vector<16x1xf32> to vector<16x64xf32>
    %69 = arith.subf %52, %68 : vector<16x64xf32>
    %cst_30 = arith.constant 9.99999974E-6 : f32
    %70 = vector.broadcast %cst_30 : f32 to vector<16x1xf32>
    %71 = arith.addf %67, %70 : vector<16x1xf32>
    %72 = math.rsqrt %71 : vector<16x1xf32>
    %73 = vector.broadcast %72 : vector<16x1xf32> to vector<16x64xf32>
    %74 = arith.mulf %69, %73 : vector<16x64xf32>
    %75 = vector.broadcast %54 : vector<1x64xf32> to vector<16x64xf32>
    %76 = arith.mulf %74, %75 : vector<16x64xf32>
    %77 = vector.broadcast %56 : vector<1x64xf32> to vector<16x64xf32>
    %78 = arith.addf %76, %77 : vector<16x64xf32>
    %79 = arith.truncf %78 : vector<16x64xf32> to vector<16x64xbf16>
    %cst_31 = arith.constant 0.000000e+00 : f32
    %80 = vector.broadcast %cst_31 : f32 to vector<16x64xf32>
    %c0_32 = arith.constant 0 : index
    %c0_33 = arith.constant 0 : index
    %c0_34 = arith.constant 0 : index
    %81 = vector.load %arg9[%c0_32, %c0_33, %c0_34] : memref<1x64x2048xbf16, #tpu.memory_space<vmem>>, vector<1x64x512xbf16>
    %82 = vector.shape_cast %81 : vector<1x64x512xbf16> to vector<64x512xbf16>
    %c0_35 = arith.constant 0 : index
    %c0_36 = arith.constant 0 : index
    %c0_37 = arith.constant 0 : index
    %83 = vector.load %arg10[%c0_35, %c0_36, %c0_37] : memref<1x1x2048xf32, #tpu.memory_space<vmem>>, vector<1x1x512xf32>
    %84 = vector.shape_cast %83 : vector<1x1x512xf32> to vector<1x512xf32>
    %cst_38 = arith.constant dense<0.000000e+00> : vector<16x512xf32>
    %85 = tpu.matmul %79, %82, %cst_38 {dimension_numbers = #tpu.dot_dimension_numbers<[1], [0], [0], [1], [0, 0, 1, 1], [], []>} : vector<16x64xbf16>, vector<64x512xbf16>, vector<16x512xf32> -> vector<16x512xf32>
    %86 = vector.broadcast %84 : vector<1x512xf32> to vector<16x512xf32>
    %87 = arith.addf %85, %86 : vector<16x512xf32>
    %cst_39 = arith.constant 0.000000e+00 : f32
    %88 = vector.broadcast %cst_39 : f32 to vector<16x512xf32>
    %89 = arith.maximumf %87, %88 : vector<16x512xf32>
    %c0_40 = arith.constant 0 : index
    %c0_41 = arith.constant 0 : index
    %c0_42 = arith.constant 0 : index
    %90 = vector.load %arg11[%c0_40, %c0_41, %c0_42] : memref<1x2048x64xbf16, #tpu.memory_space<vmem>>, vector<1x512x64xbf16>
    %91 = vector.shape_cast %90 : vector<1x512x64xbf16> to vector<512x64xbf16>
    %92 = arith.truncf %89 : vector<16x512xf32> to vector<16x512xbf16>
    %cst_43 = arith.constant dense<0.000000e+00> : vector<16x64xf32>
    %93 = tpu.matmul %92, %91, %cst_43 {dimension_numbers = #tpu.dot_dimension_numbers<[1], [0], [0], [1], [0, 0, 1, 1], [], []>} : vector<16x512xbf16>, vector<512x64xbf16>, vector<16x64xf32> -> vector<16x64xf32>
    %94 = arith.addf %80, %93 : vector<16x64xf32>
    %c0_44 = arith.constant 0 : index
    %c0_45 = arith.constant 0 : index
    %c512 = arith.constant 512 : index
    %95 = vector.load %arg9[%c0_44, %c0_45, %c512] : memref<1x64x2048xbf16, #tpu.memory_space<vmem>>, vector<1x64x512xbf16>
    %96 = vector.shape_cast %95 : vector<1x64x512xbf16> to vector<64x512xbf16>
    %c0_46 = arith.constant 0 : index
    %c0_47 = arith.constant 0 : index
    %c512_48 = arith.constant 512 : index
    %97 = vector.load %arg10[%c0_46, %c0_47, %c512_48] : memref<1x1x2048xf32, #tpu.memory_space<vmem>>, vector<1x1x512xf32>
    %98 = vector.shape_cast %97 : vector<1x1x512xf32> to vector<1x512xf32>
    %cst_49 = arith.constant dense<0.000000e+00> : vector<16x512xf32>
    %99 = tpu.matmul %79, %96, %cst_49 {dimension_numbers = #tpu.dot_dimension_numbers<[1], [0], [0], [1], [0, 0, 1, 1], [], []>} : vector<16x64xbf16>, vector<64x512xbf16>, vector<16x512xf32> -> vector<16x512xf32>
    %100 = vector.broadcast %98 : vector<1x512xf32> to vector<16x512xf32>
    %101 = arith.addf %99, %100 : vector<16x512xf32>
    %cst_50 = arith.constant 0.000000e+00 : f32
    %102 = vector.broadcast %cst_50 : f32 to vector<16x512xf32>
    %103 = arith.maximumf %101, %102 : vector<16x512xf32>
    %c0_51 = arith.constant 0 : index
    %c512_52 = arith.constant 512 : index
    %c0_53 = arith.constant 0 : index
    %104 = vector.load %arg11[%c0_51, %c512_52, %c0_53] : memref<1x2048x64xbf16, #tpu.memory_space<vmem>>, vector<1x512x64xbf16>
    %105 = vector.shape_cast %104 : vector<1x512x64xbf16> to vector<512x64xbf16>
    %106 = arith.truncf %103 : vector<16x512xf32> to vector<16x512xbf16>
    %cst_54 = arith.constant dense<0.000000e+00> : vector<16x64xf32>
    %107 = tpu.matmul %106, %105, %cst_54 {dimension_numbers = #tpu.dot_dimension_numbers<[1], [0], [0], [1], [0, 0, 1, 1], [], []>} : vector<16x512xbf16>, vector<512x64xbf16>, vector<16x64xf32> -> vector<16x64xf32>
    %108 = arith.addf %94, %107 : vector<16x64xf32>
    %c0_55 = arith.constant 0 : index
    %c0_56 = arith.constant 0 : index
    %c1024 = arith.constant 1024 : index
    %109 = vector.load %arg9[%c0_55, %c0_56, %c1024] : memref<1x64x2048xbf16, #tpu.memory_space<vmem>>, vector<1x64x512xbf16>
    %110 = vector.shape_cast %109 : vector<1x64x512xbf16> to vector<64x512xbf16>
    %c0_57 = arith.constant 0 : index
    %c0_58 = arith.constant 0 : index
    %c1024_59 = arith.constant 1024 : index
    %111 = vector.load %arg10[%c0_57, %c0_58, %c1024_59] : memref<1x1x2048xf32, #tpu.memory_space<vmem>>, vector<1x1x512xf32>
    %112 = vector.shape_cast %111 : vector<1x1x512xf32> to vector<1x512xf32>
    %cst_60 = arith.constant dense<0.000000e+00> : vector<16x512xf32>
    %113 = tpu.matmul %79, %110, %cst_60 {dimension_numbers = #tpu.dot_dimension_numbers<[1], [0], [0], [1], [0, 0, 1, 1], [], []>} : vector<16x64xbf16>, vector<64x512xbf16>, vector<16x512xf32> -> vector<16x512xf32>
    %114 = vector.broadcast %112 : vector<1x512xf32> to vector<16x512xf32>
    %115 = arith.addf %113, %114 : vector<16x512xf32>
    %cst_61 = arith.constant 0.000000e+00 : f32
    %116 = vector.broadcast %cst_61 : f32 to vector<16x512xf32>
    %117 = arith.maximumf %115, %116 : vector<16x512xf32>
    %c0_62 = arith.constant 0 : index
    %c1024_63 = arith.constant 1024 : index
    %c0_64 = arith.constant 0 : index
    %118 = vector.load %arg11[%c0_62, %c1024_63, %c0_64] : memref<1x2048x64xbf16, #tpu.memory_space<vmem>>, vector<1x512x64xbf16>
    %119 = vector.shape_cast %118 : vector<1x512x64xbf16> to vector<512x64xbf16>
    %120 = arith.truncf %117 : vector<16x512xf32> to vector<16x512xbf16>
    %cst_65 = arith.constant dense<0.000000e+00> : vector<16x64xf32>
    %121 = tpu.matmul %120, %119, %cst_65 {dimension_numbers = #tpu.dot_dimension_numbers<[1], [0], [0], [1], [0, 0, 1, 1], [], []>} : vector<16x512xbf16>, vector<512x64xbf16>, vector<16x64xf32> -> vector<16x64xf32>
    %122 = arith.addf %108, %121 : vector<16x64xf32>
    %c0_66 = arith.constant 0 : index
    %c0_67 = arith.constant 0 : index
    %c1536 = arith.constant 1536 : index
    %123 = vector.load %arg9[%c0_66, %c0_67, %c1536] : memref<1x64x2048xbf16, #tpu.memory_space<vmem>>, vector<1x64x512xbf16>
    %124 = vector.shape_cast %123 : vector<1x64x512xbf16> to vector<64x512xbf16>
    %c0_68 = arith.constant 0 : index
    %c0_69 = arith.constant 0 : index
    %c1536_70 = arith.constant 1536 : index
    %125 = vector.load %arg10[%c0_68, %c0_69, %c1536_70] : memref<1x1x2048xf32, #tpu.memory_space<vmem>>, vector<1x1x512xf32>
    %126 = vector.shape_cast %125 : vector<1x1x512xf32> to vector<1x512xf32>
    %cst_71 = arith.constant dense<0.000000e+00> : vector<16x512xf32>
    %127 = tpu.matmul %79, %124, %cst_71 {dimension_numbers = #tpu.dot_dimension_numbers<[1], [0], [0], [1], [0, 0, 1, 1], [], []>} : vector<16x64xbf16>, vector<64x512xbf16>, vector<16x512xf32> -> vector<16x512xf32>
    %128 = vector.broadcast %126 : vector<1x512xf32> to vector<16x512xf32>
    %129 = arith.addf %127, %128 : vector<16x512xf32>
    %cst_72 = arith.constant 0.000000e+00 : f32
    %130 = vector.broadcast %cst_72 : f32 to vector<16x512xf32>
    %131 = arith.maximumf %129, %130 : vector<16x512xf32>
    %c0_73 = arith.constant 0 : index
    %c1536_74 = arith.constant 1536 : index
    %c0_75 = arith.constant 0 : index
    %132 = vector.load %arg11[%c0_73, %c1536_74, %c0_75] : memref<1x2048x64xbf16, #tpu.memory_space<vmem>>, vector<1x512x64xbf16>
    %133 = vector.shape_cast %132 : vector<1x512x64xbf16> to vector<512x64xbf16>
    %134 = arith.truncf %131 : vector<16x512xf32> to vector<16x512xbf16>
    %cst_76 = arith.constant dense<0.000000e+00> : vector<16x64xf32>
    %135 = tpu.matmul %134, %133, %cst_76 {dimension_numbers = #tpu.dot_dimension_numbers<[1], [0], [0], [1], [0, 0, 1, 1], [], []>} : vector<16x512xbf16>, vector<512x64xbf16>, vector<16x64xf32> -> vector<16x64xf32>
    %136 = arith.addf %122, %135 : vector<16x64xf32>
    %c0_77 = arith.constant 0 : index
    %c0_78 = arith.constant 0 : index
    %c0_79 = arith.constant 0 : index
    %137 = vector.load %arg12[%c0_77, %c0_78, %c0_79] : memref<1x1x64xf32, #tpu.memory_space<vmem>>, vector<1x1x64xf32>
    %138 = vector.shape_cast %137 : vector<1x1x64xf32> to vector<1x64xf32>
    %139 = vector.broadcast %138 : vector<1x64xf32> to vector<16x64xf32>
    %140 = arith.addf %136, %139 : vector<16x64xf32>
    %141 = arith.addf %78, %140 : vector<16x64xf32>
    %c0_80 = arith.constant 0 : index
    %c0_81 = arith.constant 0 : index
    %c0_82 = arith.constant 0 : index
    %142 = vector.load %arg13[%c0_80, %c0_81, %c0_82] : memref<1x1x64xf32, #tpu.memory_space<vmem>>, vector<1x1x64xf32>
    %143 = vector.shape_cast %142 : vector<1x1x64xf32> to vector<1x64xf32>
    %c0_83 = arith.constant 0 : index
    %c0_84 = arith.constant 0 : index
    %c0_85 = arith.constant 0 : index
    %144 = vector.load %arg14[%c0_83, %c0_84, %c0_85] : memref<1x1x64xf32, #tpu.memory_space<vmem>>, vector<1x1x64xf32>
    %145 = vector.shape_cast %144 : vector<1x1x64xf32> to vector<1x64xf32>
    %cst_86 = arith.constant dense<0.000000e+00> : vector<16xf32>
    %146 = vector.multi_reduction <add>, %141, %cst_86 [1] : vector<16x64xf32> to vector<16xf32>
    %147 = vector.shape_cast %146 : vector<16xf32> to vector<16x1xf32>
    %cst_87 = arith.constant 6.400000e+01 : f32
    %148 = vector.broadcast %cst_87 : f32 to vector<16x1xf32>
    %149 = arith.divf %147, %148 : vector<16x1xf32>
    %150 = vector.broadcast %149 : vector<16x1xf32> to vector<16x64xf32>
    %151 = arith.subf %141, %150 : vector<16x64xf32>
    %152 = arith.mulf %151, %151 : vector<16x64xf32>
    %cst_88 = arith.constant dense<0.000000e+00> : vector<16xf32>
    %153 = vector.multi_reduction <add>, %152, %cst_88 [1] : vector<16x64xf32> to vector<16xf32>
    %154 = vector.shape_cast %153 : vector<16xf32> to vector<16x1xf32>
    %cst_89 = arith.constant 6.400000e+01 : f32
    %155 = vector.broadcast %cst_89 : f32 to vector<16x1xf32>
    %156 = arith.divf %154, %155 : vector<16x1xf32>
    %157 = vector.broadcast %149 : vector<16x1xf32> to vector<16x64xf32>
    %158 = arith.subf %141, %157 : vector<16x64xf32>
    %cst_90 = arith.constant 9.99999974E-6 : f32
    %159 = vector.broadcast %cst_90 : f32 to vector<16x1xf32>
    %160 = arith.addf %156, %159 : vector<16x1xf32>
    %161 = math.rsqrt %160 : vector<16x1xf32>
    %162 = vector.broadcast %161 : vector<16x1xf32> to vector<16x64xf32>
    %163 = arith.mulf %158, %162 : vector<16x64xf32>
    %164 = vector.broadcast %143 : vector<1x64xf32> to vector<16x64xf32>
    %165 = arith.mulf %163, %164 : vector<16x64xf32>
    %166 = vector.broadcast %145 : vector<1x64xf32> to vector<16x64xf32>
    %167 = arith.addf %165, %166 : vector<16x64xf32>
    %c0_91 = arith.constant 0 : index
    %c0_92 = arith.constant 0 : index
    %168 = vector.load %arg24[%c0_91, %c0_92] : memref<16x64xf32, #tpu.memory_space<vmem>>, vector<16x64xf32>
    tpu.vector_store %arg24[%c0_91, %c0_92], %167 {strides = array<i32>} : memref<16x64xf32, #tpu.memory_space<vmem>>, vector<16x64xf32>,
    %c1_i32 = arith.constant 1 : i32
    %169 = arith.cmpi eq, %arg1, %c1_i32 : i32
    %170 = arith.extui %169 : i1 to i32
    %c0_i32_93 = arith.constant 0 : i32
    %171 = arith.cmpi ne, %170, %c0_i32_93 : i32
    scf.if %171 {
      %172 = arith.truncf %167 : vector<16x64xf32> to vector<16x64xbf16>
      %c0_94 = arith.constant 0 : index
      %c0_95 = arith.constant 0 : index
      %173 = vector.load %arg16[%c0_94, %c0_95] : memref<64x512xbf16, #tpu.memory_space<vmem>>, vector<64x512xbf16>
      %cst_96 = arith.constant dense<0.000000e+00> : vector<16x512xf32>
      %174 = tpu.matmul %172, %173, %cst_96 {dimension_numbers = #tpu.dot_dimension_numbers<[1], [0], [0], [1], [0, 0, 1, 1], [], []>} : vector<16x64xbf16>, vector<64x512xbf16>, vector<16x512xf32> -> vector<16x512xf32>
      %c0_97 = arith.constant 0 : index
      %c0_98 = arith.constant 0 : index
      %175 = vector.load %arg17[%c0_97, %c0_98] : memref<1x512xf32, #tpu.memory_space<vmem>>, vector<1x512xf32>
      %176 = vector.broadcast %175 : vector<1x512xf32> to vector<16x512xf32>
      %177 = arith.addf %174, %176 : vector<16x512xf32>
      %178 = vector.extract_strided_slice %177 {offsets = [0, 0], sizes = [16, 256], strides = [1, 1]} : vector<16x512xf32> to vector<16x256xf32>
      %179 = vector.extract_strided_slice %177 {offsets = [0, 256], sizes = [16, 64], strides = [1, 1]} : vector<16x512xf32> to vector<16x64xf32>
      %cst_99 = arith.constant 0.000000e+00 : f32
      %180 = vector.broadcast %cst_99 : f32 to vector<16x64xf32>
      %181 = arith.maximumf %179, %180 : vector<16x64xf32>
      %182 = vector.extract_strided_slice %177 {offsets = [0, 384], sizes = [16, 32], strides = [1, 1]} : vector<16x512xf32> to vector<16x32xf32>
      %183 = vector.shape_cast %178 : vector<16x256xf32> to vector<2x8x256xf32>
      %184 = tpu.transpose %183, [1, 0, 2] : vector<2x8x256xf32> -> vector<8x2x256xf32>
      %c0_100 = arith.constant 0 : index
      %c0_101 = arith.constant 0 : index
      %c0_102 = arith.constant 0 : index
      %185 = vector.load %arg25[%c0_100, %c0_101, %c0_102] : memref<8x2x256xf32, #tpu.memory_space<vmem>>, vector<8x2x256xf32>
      tpu.vector_store %arg25[%c0_100, %c0_101, %c0_102], %184 {strides = array<i32>} : memref<8x2x256xf32, #tpu.memory_space<vmem>>, vector<8x2x256xf32>,
      %c0_103 = arith.constant 0 : index
      %c0_104 = arith.constant 0 : index
      %186 = vector.load %arg15[%c0_103, %c0_104] : memref<64x256xbf16, #tpu.memory_space<vmem>>, vector<64x256xbf16>
      %cst_105 = arith.constant 0.000000e+00 : f32
      %187 = vector.broadcast %cst_105 : f32 to vector<2x64xf32>
      %cst_106 = arith.constant 0.000000e+00 : f32
      %188 = vector.broadcast %cst_106 : f32 to vector<2x64xf32>
      %c0_i32_107 = arith.constant 0 : i32
      %189 = arith.index_cast %c0_i32_107 : i32 to index
      %c0_108 = arith.constant 0 : index
      %c0_109 = arith.constant 0 : index
      %190 = vector.load %arg25[%189, %c0_108, %c0_109] : memref<8x2x256xf32, #tpu.memory_space<vmem>>, vector<1x2x256xf32>
      %191 = vector.shape_cast %190 : vector<1x2x256xf32> to vector<2x256xf32>
      %192 = arith.truncf %187 : vector<2x64xf32> to vector<2x64xbf16>
      %cst_110 = arith.constant dense<0.000000e+00> : vector<2x256xf32>
      %193 = tpu.matmul %192, %186, %cst_110 {dimension_numbers = #tpu.dot_dimension_numbers<[1], [0], [0], [1], [0, 0, 1, 1], [], []>} : vector<2x64xbf16>, vector<64x256xbf16>, vector<2x256xf32> -> vector<2x256xf32>
      %194 = arith.addf %191, %193 : vector<2x256xf32>
      %195 = vector.extract_strided_slice %194 {offsets = [0, 0], sizes = [2, 192], strides = [1, 1]} : vector<2x256xf32> to vector<2x192xf32>
      %196 = arith.negf %195 : vector<2x192xf32>
      %197 = math.exp %196 : vector<2x192xf32>
      %cst_111 = arith.constant 1.000000e+00 : f32
      %198 = vector.broadcast %cst_111 : f32 to vector<2x192xf32>
      %199 = arith.addf %198, %197 : vector<2x192xf32>
      %200 = arith.divf %198, %199 : vector<2x192xf32>
      %201 = vector.extract_strided_slice %194 {offsets = [0, 192], sizes = [2, 64], strides = [1, 1]} : vector<2x256xf32> to vector<2x64xf32>
      %202 = math.tanh %201 : vector<2x64xf32>
      %203 = vector.extract_strided_slice %200 {offsets = [0, 0], sizes = [2, 64], strides = [1, 1]} : vector<2x192xf32> to vector<2x64xf32>
      %204 = vector.extract_strided_slice %200 {offsets = [0, 64], sizes = [2, 64], strides = [1, 1]} : vector<2x192xf32> to vector<2x64xf32>
      %205 = vector.extract_strided_slice %200 {offsets = [0, 128], sizes = [2, 64], strides = [1, 1]} : vector<2x192xf32> to vector<2x64xf32>
      %206 = arith.mulf %204, %188 : vector<2x64xf32>
      %207 = arith.mulf %203, %202 : vector<2x64xf32>
      %208 = arith.addf %206, %207 : vector<2x64xf32>
      %209 = math.tanh %208 : vector<2x64xf32>
      %210 = arith.mulf %205, %209 : vector<2x64xf32>
      %c1_i32_112 = arith.constant 1 : i32
      %211 = arith.index_cast %c1_i32_112 : i32 to index
      %c0_113 = arith.constant 0 : index
      %c0_114 = arith.constant 0 : index
      %212 = vector.load %arg25[%211, %c0_113, %c0_114] : memref<8x2x256xf32, #tpu.memory_space<vmem>>, vector<1x2x256xf32>
      %213 = vector.shape_cast %212 : vector<1x2x256xf32> to vector<2x256xf32>
      %214 = arith.truncf %210 : vector<2x64xf32> to vector<2x64xbf16>
      %cst_115 = arith.constant dense<0.000000e+00> : vector<2x256xf32>
      %215 = tpu.matmul %214, %186, %cst_115 {dimension_numbers = #tpu.dot_dimension_numbers<[1], [0], [0], [1], [0, 0, 1, 1], [], []>} : vector<2x64xbf16>, vector<64x256xbf16>, vector<2x256xf32> -> vector<2x256xf32>
      %216 = arith.addf %213, %215 : vector<2x256xf32>
      %217 = vector.extract_strided_slice %216 {offsets = [0, 0], sizes = [2, 192], strides = [1, 1]} : vector<2x256xf32> to vector<2x192xf32>
      %218 = arith.negf %217 : vector<2x192xf32>
      %219 = math.exp %218 : vector<2x192xf32>
      %cst_116 = arith.constant 1.000000e+00 : f32
      %220 = vector.broadcast %cst_116 : f32 to vector<2x192xf32>
      %221 = arith.addf %220, %219 : vector<2x192xf32>
      %222 = arith.divf %220, %221 : vector<2x192xf32>
      %223 = vector.extract_strided_slice %216 {offsets = [0, 192], sizes = [2, 64], strides = [1, 1]} : vector<2x256xf32> to vector<2x64xf32>
      %224 = math.tanh %223 : vector<2x64xf32>
      %225 = vector.extract_strided_slice %222 {offsets = [0, 0], sizes = [2, 64], strides = [1, 1]} : vector<2x192xf32> to vector<2x64xf32>
      %226 = vector.extract_strided_slice %222 {offsets = [0, 64], sizes = [2, 64], strides = [1, 1]} : vector<2x192xf32> to vector<2x64xf32>
      %227 = vector.extract_strided_slice %222 {offsets = [0, 128], sizes = [2, 64], strides = [1, 1]} : vector<2x192xf32> to vector<2x64xf32>
      %228 = arith.mulf %226, %208 : vector<2x64xf32>
      %229 = arith.mulf %225, %224 : vector<2x64xf32>
      %230 = arith.addf %228, %229 : vector<2x64xf32>
      %231 = math.tanh %230 : vector<2x64xf32>
      %232 = arith.mulf %227, %231 : vector<2x64xf32>
      %c2_i32 = arith.constant 2 : i32
      %233 = arith.index_cast %c2_i32 : i32 to index
      %c0_117 = arith.constant 0 : index
      %c0_118 = arith.constant 0 : index
      %234 = vector.load %arg25[%233, %c0_117, %c0_118] : memref<8x2x256xf32, #tpu.memory_space<vmem>>, vector<1x2x256xf32>
      %235 = vector.shape_cast %234 : vector<1x2x256xf32> to vector<2x256xf32>
      %236 = arith.truncf %232 : vector<2x64xf32> to vector<2x64xbf16>
      %cst_119 = arith.constant dense<0.000000e+00> : vector<2x256xf32>
      %237 = tpu.matmul %236, %186, %cst_119 {dimension_numbers = #tpu.dot_dimension_numbers<[1], [0], [0], [1], [0, 0, 1, 1], [], []>} : vector<2x64xbf16>, vector<64x256xbf16>, vector<2x256xf32> -> vector<2x256xf32>
      %238 = arith.addf %235, %237 : vector<2x256xf32>
      %239 = vector.extract_strided_slice %238 {offsets = [0, 0], sizes = [2, 192], strides = [1, 1]} : vector<2x256xf32> to vector<2x192xf32>
      %240 = arith.negf %239 : vector<2x192xf32>
      %241 = math.exp %240 : vector<2x192xf32>
      %cst_120 = arith.constant 1.000000e+00 : f32
      %242 = vector.broadcast %cst_120 : f32 to vector<2x192xf32>
      %243 = arith.addf %242, %241 : vector<2x192xf32>
      %244 = arith.divf %242, %243 : vector<2x192xf32>
      %245 = vector.extract_strided_slice %238 {offsets = [0, 192], sizes = [2, 64], strides = [1, 1]} : vector<2x256xf32> to vector<2x64xf32>
      %246 = math.tanh %245 : vector<2x64xf32>
      %247 = vector.extract_strided_slice %244 {offsets = [0, 0], sizes = [2, 64], strides = [1, 1]} : vector<2x192xf32> to vector<2x64xf32>
      %248 = vector.extract_strided_slice %244 {offsets = [0, 64], sizes = [2, 64], strides = [1, 1]} : vector<2x192xf32> to vector<2x64xf32>
      %249 = vector.extract_strided_slice %244 {offsets = [0, 128], sizes = [2, 64], strides = [1, 1]} : vector<2x192xf32> to vector<2x64xf32>
      %250 = arith.mulf %248, %230 : vector<2x64xf32>
      %251 = arith.mulf %247, %246 : vector<2x64xf32>
      %252 = arith.addf %250, %251 : vector<2x64xf32>
      %253 = math.tanh %252 : vector<2x64xf32>
      %254 = arith.mulf %249, %253 : vector<2x64xf32>
      %c3_i32 = arith.constant 3 : i32
      %255 = arith.index_cast %c3_i32 : i32 to index
      %c0_121 = arith.constant 0 : index
      %c0_122 = arith.constant 0 : index
      %256 = vector.load %arg25[%255, %c0_121, %c0_122] : memref<8x2x256xf32, #tpu.memory_space<vmem>>, vector<1x2x256xf32>
      %257 = vector.shape_cast %256 : vector<1x2x256xf32> to vector<2x256xf32>
      %258 = arith.truncf %254 : vector<2x64xf32> to vector<2x64xbf16>
      %cst_123 = arith.constant dense<0.000000e+00> : vector<2x256xf32>
      %259 = tpu.matmul %258, %186, %cst_123 {dimension_numbers = #tpu.dot_dimension_numbers<[1], [0], [0], [1], [0, 0, 1, 1], [], []>} : vector<2x64xbf16>, vector<64x256xbf16>, vector<2x256xf32> -> vector<2x256xf32>
      %260 = arith.addf %257, %259 : vector<2x256xf32>
      %261 = vector.extract_strided_slice %260 {offsets = [0, 0], sizes = [2, 192], strides = [1, 1]} : vector<2x256xf32> to vector<2x192xf32>
      %262 = arith.negf %261 : vector<2x192xf32>
      %263 = math.exp %262 : vector<2x192xf32>
      %cst_124 = arith.constant 1.000000e+00 : f32
      %264 = vector.broadcast %cst_124 : f32 to vector<2x192xf32>
      %265 = arith.addf %264, %263 : vector<2x192xf32>
      %266 = arith.divf %264, %265 : vector<2x192xf32>
      %267 = vector.extract_strided_slice %260 {offsets = [0, 192], sizes = [2, 64], strides = [1, 1]} : vector<2x256xf32> to vector<2x64xf32>
      %268 = math.tanh %267 : vector<2x64xf32>
      %269 = vector.extract_strided_slice %266 {offsets = [0, 0], sizes = [2, 64], strides = [1, 1]} : vector<2x192xf32> to vector<2x64xf32>
      %270 = vector.extract_strided_slice %266 {offsets = [0, 64], sizes = [2, 64], strides = [1, 1]} : vector<2x192xf32> to vector<2x64xf32>
      %271 = vector.extract_strided_slice %266 {offsets = [0, 128], sizes = [2, 64], strides = [1, 1]} : vector<2x192xf32> to vector<2x64xf32>
      %272 = arith.mulf %270, %252 : vector<2x64xf32>
      %273 = arith.mulf %269, %268 : vector<2x64xf32>
      %274 = arith.addf %272, %273 : vector<2x64xf32>
      %275 = math.tanh %274 : vector<2x64xf32>
      %276 = arith.mulf %271, %275 : vector<2x64xf32>
      %c4_i32 = arith.constant 4 : i32
      %277 = arith.index_cast %c4_i32 : i32 to index
      %c0_125 = arith.constant 0 : index
      %c0_126 = arith.constant 0 : index
      %278 = vector.load %arg25[%277, %c0_125, %c0_126] : memref<8x2x256xf32, #tpu.memory_space<vmem>>, vector<1x2x256xf32>
      %279 = vector.shape_cast %278 : vector<1x2x256xf32> to vector<2x256xf32>
      %280 = arith.truncf %276 : vector<2x64xf32> to vector<2x64xbf16>
      %cst_127 = arith.constant dense<0.000000e+00> : vector<2x256xf32>
      %281 = tpu.matmul %280, %186, %cst_127 {dimension_numbers = #tpu.dot_dimension_numbers<[1], [0], [0], [1], [0, 0, 1, 1], [], []>} : vector<2x64xbf16>, vector<64x256xbf16>, vector<2x256xf32> -> vector<2x256xf32>
      %282 = arith.addf %279, %281 : vector<2x256xf32>
      %283 = vector.extract_strided_slice %282 {offsets = [0, 0], sizes = [2, 192], strides = [1, 1]} : vector<2x256xf32> to vector<2x192xf32>
      %284 = arith.negf %283 : vector<2x192xf32>
      %285 = math.exp %284 : vector<2x192xf32>
      %cst_128 = arith.constant 1.000000e+00 : f32
      %286 = vector.broadcast %cst_128 : f32 to vector<2x192xf32>
      %287 = arith.addf %286, %285 : vector<2x192xf32>
      %288 = arith.divf %286, %287 : vector<2x192xf32>
      %289 = vector.extract_strided_slice %282 {offsets = [0, 192], sizes = [2, 64], strides = [1, 1]} : vector<2x256xf32> to vector<2x64xf32>
      %290 = math.tanh %289 : vector<2x64xf32>
      %291 = vector.extract_strided_slice %288 {offsets = [0, 0], sizes = [2, 64], strides = [1, 1]} : vector<2x192xf32> to vector<2x64xf32>
      %292 = vector.extract_strided_slice %288 {offsets = [0, 64], sizes = [2, 64], strides = [1, 1]} : vector<2x192xf32> to vector<2x64xf32>
      %293 = vector.extract_strided_slice %288 {offsets = [0, 128], sizes = [2, 64], strides = [1, 1]} : vector<2x192xf32> to vector<2x64xf32>
      %294 = arith.mulf %292, %274 : vector<2x64xf32>
      %295 = arith.mulf %291, %290 : vector<2x64xf32>
      %296 = arith.addf %294, %295 : vector<2x64xf32>
      %297 = math.tanh %296 : vector<2x64xf32>
      %298 = arith.mulf %293, %297 : vector<2x64xf32>
      %c5_i32 = arith.constant 5 : i32
      %299 = arith.index_cast %c5_i32 : i32 to index
      %c0_129 = arith.constant 0 : index
      %c0_130 = arith.constant 0 : index
      %300 = vector.load %arg25[%299, %c0_129, %c0_130] : memref<8x2x256xf32, #tpu.memory_space<vmem>>, vector<1x2x256xf32>
      %301 = vector.shape_cast %300 : vector<1x2x256xf32> to vector<2x256xf32>
      %302 = arith.truncf %298 : vector<2x64xf32> to vector<2x64xbf16>
      %cst_131 = arith.constant dense<0.000000e+00> : vector<2x256xf32>
      %303 = tpu.matmul %302, %186, %cst_131 {dimension_numbers = #tpu.dot_dimension_numbers<[1], [0], [0], [1], [0, 0, 1, 1], [], []>} : vector<2x64xbf16>, vector<64x256xbf16>, vector<2x256xf32> -> vector<2x256xf32>
      %304 = arith.addf %301, %303 : vector<2x256xf32>
      %305 = vector.extract_strided_slice %304 {offsets = [0, 0], sizes = [2, 192], strides = [1, 1]} : vector<2x256xf32> to vector<2x192xf32>
      %306 = arith.negf %305 : vector<2x192xf32>
      %307 = math.exp %306 : vector<2x192xf32>
      %cst_132 = arith.constant 1.000000e+00 : f32
      %308 = vector.broadcast %cst_132 : f32 to vector<2x192xf32>
      %309 = arith.addf %308, %307 : vector<2x192xf32>
      %310 = arith.divf %308, %309 : vector<2x192xf32>
      %311 = vector.extract_strided_slice %304 {offsets = [0, 192], sizes = [2, 64], strides = [1, 1]} : vector<2x256xf32> to vector<2x64xf32>
      %312 = math.tanh %311 : vector<2x64xf32>
      %313 = vector.extract_strided_slice %310 {offsets = [0, 0], sizes = [2, 64], strides = [1, 1]} : vector<2x192xf32> to vector<2x64xf32>
      %314 = vector.extract_strided_slice %310 {offsets = [0, 64], sizes = [2, 64], strides = [1, 1]} : vector<2x192xf32> to vector<2x64xf32>
      %315 = vector.extract_strided_slice %310 {offsets = [0, 128], sizes = [2, 64], strides = [1, 1]} : vector<2x192xf32> to vector<2x64xf32>
      %316 = arith.mulf %314, %296 : vector<2x64xf32>
      %317 = arith.mulf %313, %312 : vector<2x64xf32>
      %318 = arith.addf %316, %317 : vector<2x64xf32>
      %319 = math.tanh %318 : vector<2x64xf32>
      %320 = arith.mulf %315, %319 : vector<2x64xf32>
      %c6_i32 = arith.constant 6 : i32
      %321 = arith.index_cast %c6_i32 : i32 to index
      %c0_133 = arith.constant 0 : index
      %c0_134 = arith.constant 0 : index
      %322 = vector.load %arg25[%321, %c0_133, %c0_134] : memref<8x2x256xf32, #tpu.memory_space<vmem>>, vector<1x2x256xf32>
      %323 = vector.shape_cast %322 : vector<1x2x256xf32> to vector<2x256xf32>
      %324 = arith.truncf %320 : vector<2x64xf32> to vector<2x64xbf16>
      %cst_135 = arith.constant dense<0.000000e+00> : vector<2x256xf32>
      %325 = tpu.matmul %324, %186, %cst_135 {dimension_numbers = #tpu.dot_dimension_numbers<[1], [0], [0], [1], [0, 0, 1, 1], [], []>} : vector<2x64xbf16>, vector<64x256xbf16>, vector<2x256xf32> -> vector<2x256xf32>
      %326 = arith.addf %323, %325 : vector<2x256xf32>
      %327 = vector.extract_strided_slice %326 {offsets = [0, 0], sizes = [2, 192], strides = [1, 1]} : vector<2x256xf32> to vector<2x192xf32>
      %328 = arith.negf %327 : vector<2x192xf32>
      %329 = math.exp %328 : vector<2x192xf32>
      %cst_136 = arith.constant 1.000000e+00 : f32
      %330 = vector.broadcast %cst_136 : f32 to vector<2x192xf32>
      %331 = arith.addf %330, %329 : vector<2x192xf32>
      %332 = arith.divf %330, %331 : vector<2x192xf32>
      %333 = vector.extract_strided_slice %326 {offsets = [0, 192], sizes = [2, 64], strides = [1, 1]} : vector<2x256xf32> to vector<2x64xf32>
      %334 = math.tanh %333 : vector<2x64xf32>
      %335 = vector.extract_strided_slice %332 {offsets = [0, 0], sizes = [2, 64], strides = [1, 1]} : vector<2x192xf32> to vector<2x64xf32>
      %336 = vector.extract_strided_slice %332 {offsets = [0, 64], sizes = [2, 64], strides = [1, 1]} : vector<2x192xf32> to vector<2x64xf32>
      %337 = vector.extract_strided_slice %332 {offsets = [0, 128], sizes = [2, 64], strides = [1, 1]} : vector<2x192xf32> to vector<2x64xf32>
      %338 = arith.mulf %336, %318 : vector<2x64xf32>
      %339 = arith.mulf %335, %334 : vector<2x64xf32>
      %340 = arith.addf %338, %339 : vector<2x64xf32>
      %341 = math.tanh %340 : vector<2x64xf32>
      %342 = arith.mulf %337, %341 : vector<2x64xf32>
      %c7_i32 = arith.constant 7 : i32
      %343 = arith.index_cast %c7_i32 : i32 to index
      %c0_137 = arith.constant 0 : index
      %c0_138 = arith.constant 0 : index
      %344 = vector.load %arg25[%343, %c0_137, %c0_138] : memref<8x2x256xf32, #tpu.memory_space<vmem>>, vector<1x2x256xf32>
      %345 = vector.shape_cast %344 : vector<1x2x256xf32> to vector<2x256xf32>
      %346 = arith.truncf %342 : vector<2x64xf32> to vector<2x64xbf16>
      %cst_139 = arith.constant dense<0.000000e+00> : vector<2x256xf32>
      %347 = tpu.matmul %346, %186, %cst_139 {dimension_numbers = #tpu.dot_dimension_numbers<[1], [0], [0], [1], [0, 0, 1, 1], [], []>} : vector<2x64xbf16>, vector<64x256xbf16>, vector<2x256xf32> -> vector<2x256xf32>
      %348 = arith.addf %345, %347 : vector<2x256xf32>
      %349 = vector.extract_strided_slice %348 {offsets = [0, 0], sizes = [2, 192], strides = [1, 1]} : vector<2x256xf32> to vector<2x192xf32>
      %350 = arith.negf %349 : vector<2x192xf32>
      %351 = math.exp %350 : vector<2x192xf32>
      %cst_140 = arith.constant 1.000000e+00 : f32
      %352 = vector.broadcast %cst_140 : f32 to vector<2x192xf32>
      %353 = arith.addf %352, %351 : vector<2x192xf32>
      %354 = arith.divf %352, %353 : vector<2x192xf32>
      %355 = vector.extract_strided_slice %348 {offsets = [0, 192], sizes = [2, 64], strides = [1, 1]} : vector<2x256xf32> to vector<2x64xf32>
      %356 = math.tanh %355 : vector<2x64xf32>
      %357 = vector.extract_strided_slice %354 {offsets = [0, 0], sizes = [2, 64], strides = [1, 1]} : vector<2x192xf32> to vector<2x64xf32>
      %358 = vector.extract_strided_slice %354 {offsets = [0, 64], sizes = [2, 64], strides = [1, 1]} : vector<2x192xf32> to vector<2x64xf32>
      %359 = vector.extract_strided_slice %354 {offsets = [0, 128], sizes = [2, 64], strides = [1, 1]} : vector<2x192xf32> to vector<2x64xf32>
      %360 = arith.mulf %358, %340 : vector<2x64xf32>
      %361 = arith.mulf %357, %356 : vector<2x64xf32>
      %362 = arith.addf %360, %361 : vector<2x64xf32>
      %363 = math.tanh %362 : vector<2x64xf32>
      %364 = arith.mulf %359, %363 : vector<2x64xf32>
      %c8_i32 = arith.constant 8 : i32
      %c0_141 = arith.constant 0 : index
      %c0_142 = arith.constant 0 : index
      %365 = vector.load %arg18[%c0_141, %c0_142] : memref<1x64xf32, #tpu.memory_space<vmem>>, vector<1x64xf32>
      %366 = vector.broadcast %365 : vector<1x64xf32> to vector<16x64xf32>
      %367 = arith.mulf %181, %366 : vector<16x64xf32>
      %cst_143 = arith.constant dense<0.000000e+00> : vector<16xf32>
      %368 = vector.multi_reduction <add>, %367, %cst_143 [1] : vector<16x64xf32> to vector<16xf32>
      %369 = vector.shape_cast %368 : vector<16xf32> to vector<16x1xf32>
      %c0_144 = arith.constant 0 : index
      %c0_145 = arith.constant 0 : index
      %370 = vector.load %arg19[%c0_144, %c0_145] : memref<1x1xf32, #tpu.memory_space<vmem>>, vector<1x1xf32>
      %371 = vector.broadcast %370 : vector<1x1xf32> to vector<16x1xf32>
      %372 = arith.addf %369, %371 : vector<16x1xf32>
      %373 = arith.negf %372 : vector<16x1xf32>
      %374 = math.exp %373 : vector<16x1xf32>
      %cst_146 = arith.constant 1.000000e+00 : f32
      %375 = vector.broadcast %cst_146 : f32 to vector<16x1xf32>
      %376 = arith.addf %375, %374 : vector<16x1xf32>
      %377 = arith.divf %375, %376 : vector<16x1xf32>
      %378 = vector.shape_cast %377 : vector<16x1xf32> to vector<2x8x1xf32>
      %cst_147 = arith.constant dense<0xFF800000> : vector<2x1xf32>
      %379 = vector.multi_reduction <maximumf>, %378, %cst_147 [1] : vector<2x8x1xf32> to vector<2x1xf32>
      %380 = vector.shape_cast %379 : vector<2x1xf32> to vector<2x1x1xf32>
      %381 = vector.broadcast %380 : vector<2x1x1xf32> to vector<2x8x1xf32>
      %382 = arith.subf %378, %381 : vector<2x8x1xf32>
      %383 = math.exp %382 : vector<2x8x1xf32>
      %cst_148 = arith.constant dense<0.000000e+00> : vector<2x1xf32>
      %384 = vector.multi_reduction <add>, %383, %cst_148 [1] : vector<2x8x1xf32> to vector<2x1xf32>
      %385 = vector.shape_cast %384 : vector<2x1xf32> to vector<2x1x1xf32>
      %386 = vector.broadcast %385 : vector<2x1x1xf32> to vector<2x8x1xf32>
      %387 = arith.divf %383, %386 : vector<2x8x1xf32>
      %388 = vector.shape_cast %182 : vector<16x32xf32> to vector<2x8x32xf32>
      %389 = vector.broadcast %387 : vector<2x8x1xf32> to vector<2x8x32xf32>
      %390 = arith.mulf %389, %388 : vector<2x8x32xf32>
      %cst_149 = arith.constant dense<0.000000e+00> : vector<2x32xf32>
      %391 = vector.multi_reduction <add>, %390, %cst_149 [1] : vector<2x8x32xf32> to vector<2x32xf32>
      %c0_150 = arith.constant 0 : index
      %c0_151 = arith.constant 0 : index
      %392 = vector.load %arg20[%c0_150, %c0_151] : memref<1x64xf32, #tpu.memory_space<vmem>>, vector<1x64xf32>
      %393 = vector.broadcast %392 : vector<1x64xf32> to vector<2x64xf32>
      %394 = arith.mulf %364, %393 : vector<2x64xf32>
      %cst_152 = arith.constant dense<0.000000e+00> : vector<2xf32>
      %395 = vector.multi_reduction <add>, %394, %cst_152 [1] : vector<2x64xf32> to vector<2xf32>
      %396 = vector.shape_cast %395 : vector<2xf32> to vector<2x1xf32>
      %c0_153 = arith.constant 0 : index
      %c0_154 = arith.constant 0 : index
      %397 = vector.load %arg21[%c0_153, %c0_154] : memref<1x32xf32, #tpu.memory_space<vmem>>, vector<1x32xf32>
      %398 = vector.broadcast %397 : vector<1x32xf32> to vector<2x32xf32>
      %399 = arith.mulf %391, %398 : vector<2x32xf32>
      %cst_155 = arith.constant dense<0.000000e+00> : vector<2xf32>
      %400 = vector.multi_reduction <add>, %399, %cst_155 [1] : vector<2x32xf32> to vector<2xf32>
      %401 = vector.shape_cast %400 : vector<2xf32> to vector<2x1xf32>
      %402 = arith.addf %396, %401 : vector<2x1xf32>
      %c0_156 = arith.constant 0 : index
      %c0_157 = arith.constant 0 : index
      %403 = vector.load %arg22[%c0_156, %c0_157] : memref<1x1xf32, #tpu.memory_space<vmem>>, vector<1x1xf32>
      %404 = vector.broadcast %403 : vector<1x1xf32> to vector<2x1xf32>
      %405 = arith.addf %402, %404 : vector<2x1xf32>
      %c0_158 = arith.constant 0 : index
      %c0_159 = arith.constant 0 : index
      %406 = vector.load %arg23[%c0_158, %c0_159] : memref<2x1xf32, #tpu.memory_space<vmem>>, vector<2x1xf32>
      tpu.vector_store %arg23[%c0_158, %c0_159], %405 {strides = array<i32>} : memref<2x1xf32, #tpu.memory_space<vmem>>, vector<2x1xf32>,
    } else {
    }
    return
  }
  func.func @transform_0(%arg0: i32, %arg1: i32) -> (i32, i32) {
    %c0_i32 = arith.constant 0 : i32
    %c0_i32_0 = arith.constant 0 : i32
    return %arg0, %c0_i32 : i32, i32
  }
  func.func @transform_1(%arg0: i32, %arg1: i32) -> (i32, i32, i32) {
    %c0_i32 = arith.constant 0 : i32
    %c0_i32_0 = arith.constant 0 : i32
    %c0_i32_1 = arith.constant 0 : i32
    return %arg1, %c0_i32, %c0_i32_0 : i32, i32, i32
  }
  func.func @transform_2(%arg0: i32, %arg1: i32) -> (i32, i32, i32) {
    %c0_i32 = arith.constant 0 : i32
    %c0_i32_0 = arith.constant 0 : i32
    %c0_i32_1 = arith.constant 0 : i32
    return %arg1, %c0_i32, %c0_i32_0 : i32, i32, i32
  }
  func.func @transform_3(%arg0: i32, %arg1: i32) -> (i32, i32, i32) {
    %c0_i32 = arith.constant 0 : i32
    %c0_i32_0 = arith.constant 0 : i32
    %c0_i32_1 = arith.constant 0 : i32
    return %arg1, %c0_i32, %c0_i32_0 : i32, i32, i32
  }
  func.func @transform_4(%arg0: i32, %arg1: i32) -> (i32, i32, i32) {
    %c0_i32 = arith.constant 0 : i32
    %c0_i32_0 = arith.constant 0 : i32
    %c0_i32_1 = arith.constant 0 : i32
    return %arg1, %c0_i32, %c0_i32_0 : i32, i32, i32
  }
  func.func @transform_5(%arg0: i32, %arg1: i32) -> (i32, i32, i32) {
    %c0_i32 = arith.constant 0 : i32
    %c0_i32_0 = arith.constant 0 : i32
    %c0_i32_1 = arith.constant 0 : i32
    return %arg1, %c0_i32, %c0_i32_0 : i32, i32, i32
  }
  func.func @transform_6(%arg0: i32, %arg1: i32) -> (i32, i32, i32) {
    %c0_i32 = arith.constant 0 : i32
    %c0_i32_0 = arith.constant 0 : i32
    %c0_i32_1 = arith.constant 0 : i32
    return %arg1, %c0_i32, %c0_i32_0 : i32, i32, i32
  }
  func.func @transform_7(%arg0: i32, %arg1: i32) -> (i32, i32, i32) {
    %c0_i32 = arith.constant 0 : i32
    %c0_i32_0 = arith.constant 0 : i32
    %c0_i32_1 = arith.constant 0 : i32
    return %arg1, %c0_i32, %c0_i32_0 : i32, i32, i32
  }
  func.func @transform_8(%arg0: i32, %arg1: i32) -> (i32, i32, i32) {
    %c0_i32 = arith.constant 0 : i32
    %c0_i32_0 = arith.constant 0 : i32
    %c0_i32_1 = arith.constant 0 : i32
    return %arg1, %c0_i32, %c0_i32_0 : i32, i32, i32
  }
  func.func @transform_9(%arg0: i32, %arg1: i32) -> (i32, i32, i32) {
    %c0_i32 = arith.constant 0 : i32
    %c0_i32_0 = arith.constant 0 : i32
    %c0_i32_1 = arith.constant 0 : i32
    return %arg1, %c0_i32, %c0_i32_0 : i32, i32, i32
  }
  func.func @transform_10(%arg0: i32, %arg1: i32) -> (i32, i32, i32) {
    %c0_i32 = arith.constant 0 : i32
    %c0_i32_0 = arith.constant 0 : i32
    %c0_i32_1 = arith.constant 0 : i32
    return %arg1, %c0_i32, %c0_i32_0 : i32, i32, i32
  }
  func.func @transform_11(%arg0: i32, %arg1: i32) -> (i32, i32, i32) {
    %c0_i32 = arith.constant 0 : i32
    %c0_i32_0 = arith.constant 0 : i32
    %c0_i32_1 = arith.constant 0 : i32
    return %arg1, %c0_i32, %c0_i32_0 : i32, i32, i32
  }
  func.func @transform_12(%arg0: i32, %arg1: i32) -> (i32, i32, i32) {
    %c0_i32 = arith.constant 0 : i32
    %c0_i32_0 = arith.constant 0 : i32
    %c0_i32_1 = arith.constant 0 : i32
    return %arg1, %c0_i32, %c0_i32_0 : i32, i32, i32
  }
  func.func @transform_13(%arg0: i32, %arg1: i32) -> (i32, i32) {
    %c0_i32 = arith.constant 0 : i32
    %c0_i32_0 = arith.constant 0 : i32
    %c0_i32_1 = arith.constant 0 : i32
    return %c0_i32, %c0_i32_0 : i32, i32
  }
  func.func @transform_14(%arg0: i32, %arg1: i32) -> (i32, i32) {
    %c0_i32 = arith.constant 0 : i32
    %c0_i32_0 = arith.constant 0 : i32
    %c0_i32_1 = arith.constant 0 : i32
    return %c0_i32, %c0_i32_0 : i32, i32
  }
  func.func @transform_15(%arg0: i32, %arg1: i32) -> (i32, i32) {
    %c0_i32 = arith.constant 0 : i32
    %c0_i32_0 = arith.constant 0 : i32
    %c0_i32_1 = arith.constant 0 : i32
    return %c0_i32, %c0_i32_0 : i32, i32
  }
  func.func @transform_16(%arg0: i32, %arg1: i32) -> (i32, i32) {
    %c0_i32 = arith.constant 0 : i32
    %c0_i32_0 = arith.constant 0 : i32
    %c0_i32_1 = arith.constant 0 : i32
    return %c0_i32, %c0_i32_0 : i32, i32
  }
  func.func @transform_17(%arg0: i32, %arg1: i32) -> (i32, i32) {
    %c0_i32 = arith.constant 0 : i32
    %c0_i32_0 = arith.constant 0 : i32
    %c0_i32_1 = arith.constant 0 : i32
    return %c0_i32, %c0_i32_0 : i32, i32
  }
  func.func @transform_18(%arg0: i32, %arg1: i32) -> (i32, i32) {
    %c0_i32 = arith.constant 0 : i32
    %c0_i32_0 = arith.constant 0 : i32
    %c0_i32_1 = arith.constant 0 : i32
    return %c0_i32, %c0_i32_0 : i32, i32
  }
  func.func @transform_19(%arg0: i32, %arg1: i32) -> (i32, i32) {
    %c0_i32 = arith.constant 0 : i32
    %c0_i32_0 = arith.constant 0 : i32
    %c0_i32_1 = arith.constant 0 : i32
    return %c0_i32, %c0_i32_0 : i32, i32
  }
  func.func @transform_20(%arg0: i32, %arg1: i32) -> (i32, i32) {
    %c0_i32 = arith.constant 0 : i32
    %c0_i32_0 = arith.constant 0 : i32
    %c0_i32_1 = arith.constant 0 : i32
    return %c0_i32, %c0_i32_0 : i32, i32
  }
  func.func @transform_21(%arg0: i32, %arg1: i32) -> (i32, i32) {
    %c0_i32 = arith.constant 0 : i32
    %c0_i32_0 = arith.constant 0 : i32
    return %arg0, %c0_i32 : i32, i32
  }
}

</mosaic_0001>

<bundles_post_ra>
// kernel: streamflow_forward.1
= control target key start
LH: loop header
LB: loop body
LE: loop exit
PB: predicated region body
PF: predicated region fallthrough
CT: control target
= control target key end

     0   :  { %s8149_s28 = smov 0   ;;  %s8151_s29 = smov 0   ;;  %s9306_s0 = inlined_call_operand.vmem [shape: f32[16,64], index: 0, kind: input, shape index: {}]   ;;  %s9307_s1 = inlined_call_operand.vmem [shape: bf16[2,64,192], index: 1, kind: input, shape index: {}]   ;;  %s9308_s2 = inlined_call_operand.vmem [shape: f32[2,1,192], index: 2, kind: input, shape index: {}]   ;;  %s9309_s3 = inlined_call_operand.vmem [shape: bf16[2,64,64], index: 3, kind: input, shape index: {}]   ;;  %s9310_s4 = inlined_call_operand.vmem [shape: f32[2,1,64], index: 4, kind: input, shape index: {}]   ;;  %s9311_s5 = inlined_call_operand.vmem [shape: f32[2,1,64], index: 5, kind: input, shape index: {}]   ;;  %s9312_s6 = inlined_call_operand.vmem [shape: f32[2,1,64], index: 6, kind: input, shape index: {}]   ;;  %s9313_s7 = inlined_call_operand.vmem [shape: bf16[2,64,2048], index: 7, kind: input, shape index: {}]   ;;  %s9314_s8 = inlined_call_operand.vmem [shape: f32[2,1,2048], index: 8, kind: input, shape index: {}]   ;;  %s9315_s9 = inlined_call_operand.vmem [shape: bf16[2,2048,64], index: 9, kind: input, shape index: {}]   ;;  %s9316_s10 = inlined_call_operand.vmem [shape: f32[2,1,64], index: 10, kind: input, shape index: {}]   ;;  %s9317_s11 = inlined_call_operand.vmem [shape: f32[2,1,64], index: 11, kind: input, shape index: {}]   ;;  %s9318_s12 = inlined_call_operand.vmem [shape: f32[2,1,64], index: 12, kind: input, shape index: {}]   ;;  %s9319_s13 = inlined_call_operand.vmem [shape: bf16[64,256], index: 13, kind: input, shape index: {}]   ;;  %s9320_s14 = inlined_call_operand.vmem [shape: bf16[64,512], index: 14, kind: input, shape index: {}]   ;;  %s9321_s15 = inlined_call_operand.vmem [shape: f32[1,512], index: 15, kind: input, shape index: {}]   ;;  %s9322_s16 = inlined_call_operand.vmem [shape: f32[1,64], index: 16, kind: input, shape index: {}]   ;;  %s9323_s17 = inlined_call_operand.<no memory space> [shape: f32[1,1], index: 17, kind: input, shape index: {}]   ;;  %s9324_s18 = inlined_call_operand.vmem [shape: f32[1,64], index: 18, kind: input, shape index: {}]   ;;  %s9325_s19 = inlined_call_operand.vmem [shape: f32[1,32], index: 19, kind: input, shape index: {}]   ;;  %s9326_s21 = inlined_call_operand.vmem [shape: f32[2,1], index: 21, kind: output, shape index: {}]   ;;  %s9327_s20 = inlined_call_operand.<no memory space> [shape: f32[1,1], index: 20, kind: input, shape index: {}]  }
   0x1   :  { %9333 = sst [smem:[#allocation9_spill]] %s9306_s0  ;;  %v26_v0 = vstv %s9323_s17  ;;  %v28_v1 = vstv %s9327_s20 }
   0x2   :  { %9334 = sst [smem:[#allocation10_spill]] %s9307_s1  ;;  %27 = vst [vmem:[#allocation4] sm:$0x1] %v26_v0  ;;  %29 = vst [vmem:[#allocation5] sm:$0x1] %v28_v1 }
   0x3   :  { %9335 = sst [smem:[#allocation11_spill]] %s9308_s2 }
   0x4   :  { %9336 = sst [smem:[#allocation12_spill]] %s9309_s3  ;;  %s8147_s3 = smov 0  }
   0x5   :  { %9337 = sst [smem:[#allocation13_spill]] %s9310_s4 }
   0x6   :  { %9338 = sst [smem:[#allocation14_spill]] %s9311_s5 }
   0x7   :  { %9339 = sst [smem:[#allocation15_spill]] %s9319_s13 }
   0x8   :  { %9340 = sst [smem:[#allocation16_spill]] %s9320_s14 }
   0x9   :  { %9341 = sst [smem:[#allocation17_spill]] %s9321_s15 }
   0xa   :  { %9342 = sst [smem:[#allocation18_spill]] %s9322_s16 }
   0xb   :  { %9343 = sst [smem:[#allocation19_spill]] %s9324_s18 }
   0xc   :  { %9344 = sst [smem:[#allocation20_spill]] %s9325_s19 }
   0xd   :  { %9345 = sst [smem:[#allocation21_spill]] %s9326_s21 }
   0xe LB: > { %9346 = sst [smem:[#allocation6_spill]] %s8010_s28  ;;  %s44_s17 = sadd.s32 1, %s8010_s28  ;;  %s8014_s29 = sphi %s8151_s29, %s35_s29   ;;  %s8010_s28 = sphi %s8149_s28, %s9367_s28   ;;  %s8006_s3 = sphi %s8147_s3, %s9366_s3  }
   0xf   : > { %9347 = sst [smem:[#allocation7_spill]] %s8014_s29  ;;  %p6981_p0 = scmp.ge.s32.totalorder %s8014_s29, 1 }
  0x10   : > { %p45_p1 = scmp.ge.s32.totalorder %s44_s17, 2  ;;  %p710_p2 = scmp.lt.s32.totalorder %s8014_s29, 3 }
  0x12   : > { %s9369_s17 = smov (%p45_p1, %s44_s17), 0  ;;  %p711_p3 = pnand %p6981_p0, %p710_p2 }
  0x13   : > { %9348 = sst [smem:[#allocation8_spill]] %s9369_s17  ;;  %p821_p4 = scmp.lt.s32.totalorder (!%p711_p3), %s8006_s3, 1 }
  0x14   : > { %714 = sbr.rel (%p711_p3) target bundleno = 8069 (0x1f85), region = 104  ;;  %s9349_s22 = sld [smem:[#allocation10_spill]] (!%p711_p3) }
  0x15   : > { %s9350_s2 = sld [smem:[#allocation11_spill]] (!%p711_p3)  ;;  %p6992_p5 = scmp.ne.s32.totalorder (!%p711_p3), %s8006_s3, 0 }
  0x16   : > { %s9351_s28 = sld [smem:[#allocation13_spill]] (!%p711_p3) }
  0x17   : > { %s9352_s19 = sld [smem:[#allocation12_spill]] (!%p711_p3) }
  0x18   : > { %s9353_s5 = sld [smem:[#allocation14_spill]] (!%p711_p3) }
  0x19   : > { %s8169_s20 = scalar_select %p821_p4, %s8006_s3, 1 }
  0x1a   : > { %s9354_s21 = sld [smem:[#allocation9_spill]] (!%p6992_p5) }
  0x1b   : > { %s7309_s0 = sshll.u32 %s8169_s20, 6  ;;  %s6984_s4 = sshll.u32 %s8169_s20, 1 }
  0x1c   : > { %s8176_s23 = scalar_lea.vmem %s9349_s22, %s7309_s0  ;;  %s8181_s25 = scalar_lea.vmem %s9350_s2, %s6984_s4 }
  0x1d   : > { %s7310_s26 = sshll.u32 %s8169_s20, 5  ;;  %s837_s29 = scalar_lea.vmem %s9351_s28, %s8169_s20 }
  0x1e   : > { %s8191_s16 = scalar_lea.vmem %s9352_s19, %s7310_s26  ;;  %s840_s0 = scalar_lea.vmem %s9353_s5, %s8169_s20 }
  0x1f   : > { %s7311_s4 = sshll.u32 %s8169_s20, 9  ;;  %s6989_s28 = sshll.u32 %s8169_s20, 4 }
  0x20   : > { %s8205_s14 = scalar_lea.vmem %s9313_s7, %s7311_s4  ;;  %s8211_s18 = scalar_lea.vmem %s9314_s8, %s6989_s28 }
  0x21   : > { %s7312_s19 = sshll.u32 %s8169_s20, 10  ;;  %s860_s5 = scalar_lea.vmem %s9316_s10, %s8169_s20 }
  0x22   : > { %s8217_s26 = scalar_lea.vmem %s9315_s9, %s7312_s19  ;;  %s863_s4 = scalar_lea.vmem %s9317_s11, %s8169_s20 }
  0x23   : > { %s866_s17 = scalar_lea.vmem %s9318_s12, %s8169_s20  ;;  %875 = sbr.rel (%p6992_p5) target bundleno = 42 (0x2a), region = 108 }
  0x28   : > { %v876_v2 = vld [vmem:[%s9354_s21] sm:$0xff]  ;;  %vm878_vm0 = vcmask 523264   ;;  %v877_v3 = vld [vmem:[%s9354_s21 + $0x8] sm:$0xff] }
  0x29   : > { %879 = vst.msk [vmem:[#allocation2] sm:$0xff] %vm878_vm0, %v876_v2  ;;  %880 = vst.msk [vmem:[#allocation2 + $0x8] sm:$0xff] %vm878_vm0, %v877_v3 }
  0x2a PF: > { %v7688_v4 = vld [vmem:[%s8176_s23 + $0x34] ss:$8 sps:$4 sm:$0xff]   ;;  %v7690_v5 = vld [vmem:[%s8176_s23 + $0x30] ss:$8 sps:$4 sm:$0xff]   ;;  %v8016_v6 = vmov 0   ;;  %vm944_vm1 = vcmask 523264   ;;  %v894_v16 = vlaneseq }
  0x2b   : > { %980 = vmatprep.mubr.bf16.mxu0 %v8016_v6  ;;  %956 = vmatprep.subr.bf16.mxu0 %v7688_v4  ;;  %v7691_v7 = vld [vmem:[%s8176_s23 + $0x24] ss:$8 sps:$4 sm:$0xff]   ;;  %v7693_v8 = vld [vmem:[%s8176_s23 + $0x20] ss:$8 sps:$4 sm:$0xff]   ;;  %v7694_v9 = vld [vmem:[%s8176_s23 + $0x14] ss:$8 sps:$4 sm:$0xff]  }
  0x2c   : > { %957 = vmatpush1.bf16.msra.mxu0 %v7690_v5  ;;  %v7696_v10 = vld [vmem:[%s8176_s23 + $0x10] ss:$8 sps:$4 sm:$0xff]   ;;  %v7697_v11 = vld [vmem:[%s8176_s23 + $0x4] ss:$8 sps:$4 sm:$0xff]   ;;  %v7699_v12 = vld [vmem:[%s8176_s23] ss:$8 sps:$4 sm:$0xff]  }
  0x2d   : > { %958 = vmatprep.subr.bf16.mxu0 %v7691_v7  ;;  %v8248_v17 = vshrl.u32 %v894_v16, 7  ;;  %v892_v19 = vld [vmem:[%s8181_s25] sm:$0x3]  ;;  %s8017_s23 = smov 80   ;;  %s8018_s1 = smov 112   ;;  %v8021_v31 = vmov 0.0  }
  0x2e   : > { %s8019_s13 = smov 96   ;;  %s8020_s25 = smov 64   ;;  %7526 = vmatprep.subr.bf16.mxu1 %v8021_v31  ;;  %vm8022_vm2 = vmmov 0   ;;  %v8023_v38 = vmov 1983009808   ;;  %vm1911_vm3 = vcmask 130048  }
  0x2f   : > { %v8251_v18 = vsub.s32 0, %v8248_v17  ;;  %v8272_v33 = vsub.s32 1, %v8248_v17  ;;  %7528 = vmatprep.mubr.msk.bf16.mxu1 %vm8022_vm2, %v8021_v31  ;;  %v1016_v39 = vunpack.c.l.s4 %v8023_v38  ;;  %v8024_v40 = vmov 1934713408   ;;  %s8025_s30 = smov 32   ;;  %s8026_s22 = smov 16  }
  0x30   : > { %959 = vmatpush1.bf16.msra.mxu0 %v7693_v8  ;;  %v881_v13 = vld [vmem:[#allocation2] sm:$0xff]  ;;  %v882_v14 = vld [vmem:[#allocation2 + $0x8] sm:$0xff]  ;;  %v1048_v41 = vunpack.c.l.s4 %v8024_v40  ;;  %vm2280_vm4 = vcmask 64512   ;;  %vm2380_vm5 = vcmask 1043456   ;;  %s8027_s24 = smov 48   ;;  %vm3044_vm6 = vcmask 261120  }
  0x31   : > { %960 = vmatprep.subr.bf16.mxu0 %v7694_v9  ;;  %v883_v15 = vpack.c.bf16 %v882_v14, %v881_v13  ;;  %v897_v20 = vrot.slane %v892_v19, %v8251_v18  ;;  %v8279_v36 = vrot.slane %v892_v19, %v8272_v33  ;;  %v1017_v42 = vunpack.c.0.s8 %v1016_v39  ;;  %p7245_p6 = scmp.ne.s32.totalorder %s8006_s3, 1 }
  0x32   : > { %v1049_v45 = vunpack.c.0.s8 %v1048_v41  ;;  %vm3047_vm7 = vcmask 392192   ;;  %s9360_s15 = sld [smem:[#allocation17_spill]] (!%p7245_p6) }
  0x33   : > { %v8295_v46 = vsub.s32 %v1017_v42, %v8248_v17  ;;  %s9361_s19 = sld [smem:[#allocation18_spill]] (!%p7245_p6) }
  0x34   : > { %961 = vmatpush1.bf16.msra.mxu0 %v7696_v10  ;;  %v8298_v53 = vsub.s32 %v1049_v45, %v8248_v17 }
  0x35   : > { %962 = vmatprep.subr.bf16.mxu0 %v7697_v11 }
  0x38   : > { %963 = vmatpush1.bf16.msra.mxu0 %v7699_v12 }
  0x39   : > { %7550 = vmatprep.subr.bf16.mxu0 %v8021_v31 }
  0x3b   : > { %7001 = vmatmul.mubr.msk.bf16.vlgmr.msra.gmra.mxu0 %vm944_vm1, %v883_v15 }
  0x3c   : > { %7552 = vmatprep.mubr.msk.bf16.mxu0 %vm8022_vm2, %v8021_v31 }
  0xfb   : > { %v982_v21 = vpop.f32.mrf.mxu0 }
  0xfc   : > { %v983_v22 = vadd.f32 %v982_v21, %v897_v20 }
  0xfd   : > { %v984_v23 = vpop.f32.mrf.mxu0 }
  0xfe   : > { %1303 = vrot.lane.b32.xlu1 %v983_v22, %s8017_s23  ;;  %1295 = vrot.lane.b32.xlu0 %v983_v22, %s8018_s1  ;;  %v8261_v29 = vmul.f32 0.25, %v983_v22  ;;  %v8290_v37 = vadd.f32 %v984_v23, %v8279_v36 }
  0xff   : > { %v986_v24 = vpop.f32.mrf.mxu0 }
 0x100   : > { %v987_v25 = vadd.f32 %v986_v24, %v897_v20 }
 0x102   : > { %1297 = vrot.lane.b32.xlu1 %v987_v25, %s8018_s1  ;;  %1299 = vrot.lane.b32.xlu0 %v983_v22, %s8019_s13  ;;  %v8274_v34 = vmul.f32 0.25, %v987_v25 }
 0x106   : > { %1305 = vrot.lane.b32.xlu1 %v987_v25, %s8017_s23  ;;  %1301 = vrot.lane.b32.xlu0 %v987_v25, %s8019_s13 }
 0x10a   : > { %1307 = vrot.lane.b32.xlu0 %v983_v22, %s8020_s25 }
 0x170   : > { %v1296_v26 = vpop.permute.xlu0 %1295  ;;  %v1304_v27 = vpop.permute.xlu1 %1303 }
 0x171   : > { %1311 = vrot.lane.b32.xlu1 %v1296_v26, %s8020_s25 }
 0x174   : > { %v1300_v28 = vpop.permute.xlu0 %1299  ;;  %v1298_v30 = vpop.permute.xlu1 %1297 }
 0x175   : > { %1319 = vrot.lane.b32.xlu1 %v1304_v27, %s8020_s25  ;;  %1315 = vrot.lane.b32.xlu0 %v1300_v28, %s8020_s25 }
 0x178   : > { %v1302_v32 = vpop.permute.xlu0 %1301  ;;  %v1306_v35 = vpop.permute.xlu1 %1305 }
 0x179   : > { %1001 = vrot.lane.b32.xlu1 %v8261_v29, %s8019_s13  ;;  %995 = vrot.lane.b32.xlu0 %v8261_v29, %s8018_s1 }
 0x17c   : > { %v1308_v43 = vpop.permute.xlu0 %1307 }
 0x17d   : > { %1309 = vrot.lane.b32.xlu1 %v987_v25, %s8020_s25  ;;  %1007 = vrot.lane.b32.xlu0 %v8261_v29, %s8017_s23 }
 0x181   : > { %1317 = vrot.lane.b32.xlu1 %v1302_v32, %s8020_s25  ;;  %1313 = vrot.lane.b32.xlu0 %v1298_v30, %s8020_s25 }
 0x185   : > { %997 = vrot.lane.b32.xlu1 %v8274_v34, %s8018_s1  ;;  %1321 = vrot.lane.b32.xlu0 %v1306_v35, %s8020_s25 }
 0x189   : > { %1009 = vrot.lane.b32.xlu1 %v8274_v34, %s8017_s23  ;;  %1003 = vrot.lane.b32.xlu0 %v8274_v34, %s8019_s13 }
 0x18d   : > { %1613 = vrot.lane.b32.xlu1 %v8290_v37, %s8018_s1 }
 0x1e3   : > { %v1312_v44 = vpop.permute.xlu1 %1311 }
 0x1e7   : > { %v1320_v47 = vpop.permute.xlu1 %1319  ;;  %v1316_v48 = vpop.permute.xlu0 %1315 }
 0x1e8   : > { %v1347_v49 = vcombine.low %v1312_v44, %v1320_v47  ;;  %v1348_v50 = vcombine.high %v1312_v44, %v1320_v47  ;;  %v1331_v51 = vcombine.low %v1308_v43, %v1316_v48  ;;  %v1332_v52 = vcombine.high %v1308_v43, %v1316_v48 }
 0x1ea   : > { %v1355_v54 = vrot.slane %v1347_v49, %v8295_v46  ;;  %v1362_v55 = vrot.slane %v1348_v50, %v8295_v46  ;;  %v1339_v56 = vrot.slane %v1331_v51, %v8295_v46  ;;  %v1346_v57 = vrot.slane %v1332_v52, %v8295_v46 }
 0x1eb   : > { %v1002_v58 = vpop.permute.xlu1 %1001  ;;  %v996_v59 = vpop.permute.xlu0 %995 }
 0x1ec   : > { %v1363_v60 = vcombine.low %v1339_v56, %v1355_v54  ;;  %v1364_v61 = vcombine.high %v1339_v56, %v1355_v54  ;;  %v1379_v62 = vcombine.low %v1346_v57, %v1362_v55  ;;  %v1380_v63 = vcombine.high %v1346_v57, %v1362_v55 }
 0x1ed   : > { %v1013_v4 = vcombine.low %v8261_v29, %v1002_v58  ;;  %v1014_v5 = vcombine.high %v8261_v29, %v1002_v58 }
 0x1ee   : > { %v1371_v0 = vrot.slane %v1363_v60, %v8298_v53  ;;  %v1378_v1 = vrot.slane %v1364_v61, %v8298_v53  ;;  %v1387_v2 = vrot.slane %v1379_v62, %v8298_v53  ;;  %v1394_v3 = vrot.slane %v1380_v63, %v8298_v53 }
 0x1ef   : > { %v1310_v7 = vpop.permute.xlu1 %1309  ;;  %v1008_v8 = vpop.permute.xlu0 %1007  ;;  %v1021_v21 = vrot.slane %v1013_v4, %v8295_v46  ;;  %v1028_v22 = vrot.slane %v1014_v5, %v8295_v46 }
 0x1f0   : > { %v1467_v9 = vcombine.low %v1371_v0, %v1378_v1  ;;  %v7006_v10 = vcombine.high %v1371_v0, %v1378_v1  ;;  %v1483_v11 = vcombine.low %v1387_v2, %v1394_v3  ;;  %v7007_v12 = vcombine.high %v1387_v2, %v1394_v3 }
 0x1f1   : > { %v1029_v13 = vcombine.low %v996_v59, %v1008_v8  ;;  %v1030_v14 = vcombine.high %v996_v59, %v1008_v8 }
 0x1f2   : > { %v8311_v15 = vrot.slane %v1467_v9, %v8295_v46  ;;  %v8314_v16 = vrot.slane %v7006_v10, %v8295_v46  ;;  %v8317_v19 = vrot.slane %v1483_v11, %v8295_v46  ;;  %v8320_v20 = vrot.slane %v7007_v12, %v8295_v46 }
 0x1f3   : > { %v1037_v23 = vrot.slane %v1029_v13, %v8295_v46  ;;  %v1044_v24 = vrot.slane %v1030_v14, %v8295_v46  ;;  %v1318_v25 = vpop.permute.xlu1 %1317  ;;  %v1314_v26 = vpop.permute.xlu0 %1313 }
 0x1f4   : > { %v1499_v27 = vcombine.low %v8311_v15, %v8314_v16  ;;  %v1515_v28 = vcombine.low %v8317_v19, %v8320_v20  ;;  %v1399_v38 = vcombine.low %v1310_v7, %v1318_v25  ;;  %v1400_v39 = vcombine.high %v1310_v7, %v1318_v25 }
 0x1f5   : > { %v1045_v29 = vcombine.low %v1021_v21, %v1037_v23  ;;  %v1046_v30 = vcombine.high %v1021_v21, %v1037_v23  ;;  %v1061_v32 = vcombine.low %v1028_v22, %v1044_v24  ;;  %v1062_v35 = vcombine.high %v1028_v22, %v1044_v24 }
 0x1f6   : > { %v1507_v40 = vrot.slane %v1499_v27, %v8298_v53  ;;  %v1523_v41 = vrot.slane %v1515_v28, %v8298_v53  ;;  %v1407_v57 = vrot.slane %v1399_v38, %v8295_v46  ;;  %v1414_v58 = vrot.slane %v1400_v39, %v8295_v46 }
 0x1f7   : > { %v1053_v42 = vrot.slane %v1045_v29, %v8298_v53  ;;  %v1060_v43 = vrot.slane %v1046_v30, %v8298_v53  ;;  %v1069_v44 = vrot.slane %v1061_v32, %v8298_v53  ;;  %v1076_v45 = vrot.slane %v1062_v35, %v8298_v53  ;;  %v998_v47 = vpop.permute.xlu1 %997  ;;  %v1322_v48 = vpop.permute.xlu0 %1321 }
 0x1f8   : > { %v1415_v49 = vcombine.low %v1314_v26, %v1322_v48  ;;  %v1416_v50 = vcombine.high %v1314_v26, %v1322_v48  ;;  %v1531_v51 = vcombine.low %v1507_v40, %v1523_v41 }
 0x1f9   : > { %v1149_v52 = vcombine.low %v1053_v42, %v1060_v43  ;;  %v7002_v54 = vcombine.high %v1053_v42, %v1060_v43  ;;  %v1165_v55 = vcombine.low %v1069_v44, %v1076_v45  ;;  %v7003_v56 = vcombine.high %v1069_v44, %v1076_v45 }
 0x1fa   : > { %v1423_v59 = vrot.slane %v1415_v49, %v8295_v46  ;;  %v1430_v60 = vrot.slane %v1416_v50, %v8295_v46  ;;  %v1603_v0 = vpack.c.bf16 %v1531_v51, %v1531_v51  ;;  %v1500_v51 = vcombine.high %v8311_v15, %v8314_v16 }
 0x1fb   : > { %v8341_v61 = vrot.slane %v1149_v52, %v8295_v46  ;;  %v8344_v62 = vrot.slane %v7002_v54, %v8295_v46  ;;  %v1010_v63 = vpop.permute.xlu1 %1009  ;;  %v1004_v5 = vpop.permute.xlu0 %1003  ;;  %v8347_v7 = vrot.slane %v1165_v55, %v8295_v46  ;;  %v8350_v8 = vrot.slane %v7003_v56, %v8295_v46 }
 0x1fc   : > { %v1431_v1 = vcombine.low %v1407_v57, %v1423_v59  ;;  %v1432_v2 = vcombine.high %v1407_v57, %v1423_v59  ;;  %v1447_v3 = vcombine.low %v1414_v58, %v1430_v60  ;;  %v1448_v4 = vcombine.high %v1414_v58, %v1430_v60 }
 0x1fd   : > { %v1097_v9 = vcombine.low %v998_v47, %v1010_v63  ;;  %v1098_v10 = vcombine.high %v998_v47, %v1010_v63  ;;  %v1081_v23 = vcombine.low %v8274_v34, %v1004_v5  ;;  %v1082_v24 = vcombine.high %v8274_v34, %v1004_v5 }
 0x1fe   : > { %v1439_v11 = vrot.slane %v1431_v1, %v8298_v53  ;;  %v1446_v12 = vrot.slane %v1432_v2, %v8298_v53  ;;  %v1455_v13 = vrot.slane %v1447_v3, %v8298_v53  ;;  %v1462_v14 = vrot.slane %v1448_v4, %v8298_v53 }
 0x1ff   : > { %v1105_v21 = vrot.slane %v1097_v9, %v8295_v46  ;;  %v1112_v22 = vrot.slane %v1098_v10, %v8295_v46  ;;  %v1089_v29 = vrot.slane %v1081_v23, %v8295_v46  ;;  %v1096_v30 = vrot.slane %v1082_v24, %v8295_v46 }
 0x200   : > { %v1535_v25 = vcombine.low %v1439_v11, %v1446_v12  ;;  %v7008_v26 = vcombine.high %v1439_v11, %v1446_v12  ;;  %v1551_v27 = vcombine.low %v1455_v13, %v1462_v14  ;;  %v7009_v28 = vcombine.high %v1455_v13, %v1462_v14 }
 0x201   : > { %v1916_v32 = vsel %vm1911_vm3, %v1603_v0, 0  ;;  %v1181_v35 = vcombine.low %v8341_v61, %v8344_v62  ;;  %v1532_v34 = vcombine.high %v1507_v40, %v1523_v41  ;;  %v1113_v43 = vcombine.low %v1089_v29, %v1105_v21 }
 0x202   : > { %v1542_v38 = vrot.slane %v1535_v25, %v8295_v46  ;;  %v1550_v39 = vrot.slane %v7008_v26, %v8295_v46  ;;  %v1558_v42 = vrot.slane %v1551_v27, %v8295_v46  ;;  %7527 = vmatpush3.bf16.xpose.msra.mxu1 %v1916_v32  ;;  %v1114_v44 = vcombine.high %v1089_v29, %v1105_v21 }
 0x203   : > { %v1129_v45 = vcombine.low %v1096_v30, %v1112_v22  ;;  %v1130_v47 = vcombine.high %v1096_v30, %v1112_v22  ;;  %7532 = vmatprep.subr.bf16.mxu1 %v8021_v31  ;;  %v1566_v48 = vrot.slane %v7009_v28, %v8295_v46  ;;  %v1189_v49 = vrot.slane %v1181_v35, %v8298_v53 }
 0x204   : > { %v1197_v50 = vcombine.low %v8347_v7, %v8350_v8  ;;  %v1121_v52 = vrot.slane %v1113_v43, %v8298_v53  ;;  %v1128_v40 = vrot.slane %v1114_v44, %v8298_v53  ;;  %v1514_v56 = vrot.slane %v1500_v51, %v8298_v53 }
 0x205   : > { %v1137_v41 = vrot.slane %v1129_v45, %v8298_v53  ;;  %v1144_v54 = vrot.slane %v1130_v47, %v8298_v53  ;;  %v1516_v57 = vcombine.high %v8317_v19, %v8320_v20  ;;  %v1567_v58 = vcombine.low %v1542_v38, %v1550_v39 }
 0x206   : > { %v1205_v55 = vrot.slane %v1197_v50, %v8298_v53  ;;  %v1217_v59 = vcombine.low %v1121_v52, %v1128_v40  ;;  %v7004_v60 = vcombine.high %v1121_v52, %v1128_v40  ;;  %v1604_v0 = vpack.c.bf16 %v1532_v34, %v1532_v34 }
 0x207   : > { %v1233_v63 = vcombine.low %v1137_v41, %v1144_v54  ;;  %v7005_v15 = vcombine.high %v1137_v41, %v1144_v54  ;;  %v1530_v1 = vrot.slane %v1516_v57, %v8298_v53  ;;  %v1575_v19 = vrot.slane %v1567_v58, %v8298_v53 }
 0x208   : > { %v1213_v16 = vcombine.low %v1189_v49, %v1205_v55  ;;  %v1224_v2 = vrot.slane %v1217_v59, %v8295_v46  ;;  %v1232_v3 = vrot.slane %v7004_v60, %v8295_v46  ;;  %v1583_v20 = vcombine.low %v1558_v42, %v1566_v48 }
 0x209   : > { %v1240_v4 = vrot.slane %v1233_v63, %v8295_v46  ;;  %v1248_v5 = vrot.slane %v7005_v15, %v8295_v46  ;;  %v1533_v10 = vcombine.low %v1514_v56, %v1530_v1  ;;  %v1962_v13 = vsel %vm1911_vm3, %v1604_v0, 0 }
 0x20a   : > { %v1285_v9 = vpack.c.bf16 %v1213_v16, %v1213_v16  ;;  %v1249_v11 = vcombine.low %v1224_v2, %v1232_v3  ;;  %v1591_v14 = vrot.slane %v1583_v20, %v8298_v53  ;;  %v1182_v21 = vcombine.high %v8341_v61, %v8344_v62 }
 0x20b   : > { %v1265_v12 = vcombine.low %v1240_v4, %v1248_v5  ;;  %v1198_v22 = vcombine.high %v8347_v7, %v8350_v8  ;;  %v1214_v23 = vcombine.high %v1189_v49, %v1205_v55  ;;  %v1568_v25 = vcombine.high %v1542_v38, %v1550_v39 }
 0x20c   : > { %7529 = vmatmul.mubr.msk.bf16.vlgmr.msra.gmra.mxu1 %vm1911_vm3, %v1285_v9  ;;  %v1599_v24 = vcombine.low %v1575_v19, %v1591_v14  ;;  %v1605_v26 = vpack.c.bf16 %v1533_v10, %v1533_v10  ;;  %v1584_v27 = vcombine.high %v1558_v42, %v1566_v48  ;;  %v1257_v29 = vrot.slane %v1249_v11, %v8298_v53 }
 0x20d   : > { %7533 = vmatpush3.bf16.xpose.msra.mxu1 %v1962_v13  ;;  %7534 = vmatprep.mubr.msk.bf16.mxu1 %vm8022_vm2, %v8021_v31  ;;  %v1273_v30 = vrot.slane %v1265_v12, %v8298_v53  ;;  %v1582_v61 = vrot.slane %v1568_v25, %v8298_v53  ;;  %v1286_v32 = vpack.c.bf16 %v1214_v23, %v1214_v23  ;;  %v8443_v12 = vpop.f32.mrf.mxu0 }
 0x20e   : > { %7538 = vmatprep.subr.bf16.mxu1 %v8021_v31  ;;  %v1607_v28 = vpack.c.bf16 %v1599_v24, %v1599_v24  ;;  %v1598_v62 = vrot.slane %v1584_v27, %v8298_v53  ;;  %v1196_v7 = vrot.slane %v1182_v21, %v8298_v53  ;;  %v1212_v8 = vrot.slane %v1198_v22, %v8298_v53 }
 0x20f   : > { %v1250_v34 = vcombine.high %v1224_v2, %v1232_v3  ;;  %v1266_v39 = vcombine.high %v1240_v4, %v1248_v5  ;;  %v2008_v42 = vsel %vm1911_vm3, %v1605_v26, 0  ;;  %v1281_v43 = vcombine.low %v1257_v29, %v1273_v30 }
 0x210   : > { %v2100_v35 = vsel %vm1911_vm3, %v1607_v28, 0  ;;  %v1601_v38 = vcombine.low %v1582_v61, %v1598_v62  ;;  %v1534_v44 = vcombine.high %v1514_v56, %v1530_v1  ;;  %v1215_v45 = vcombine.low %v1196_v7, %v1212_v8 }
 0x211   : > { %7551 = vmatpush3.bf16.xpose.msra.mxu0 %v2100_v35  ;;  %v1289_v48 = vpack.c.bf16 %v1281_v43, %v1281_v43  ;;  %v1264_v50 = vrot.slane %v1250_v34, %v8298_v53  ;;  %v1280_v51 = vrot.slane %v1266_v39, %v8298_v53  ;;  %v1600_v55 = vcombine.high %v1575_v19, %v1591_v14 }
 0x212   : > { %7562 = vmatprep.subr.bf16.mxu0 %v8021_v31  ;;  %v1609_v47 = vpack.c.bf16 %v1601_v38, %v1601_v38  ;;  %v1606_v49 = vpack.c.bf16 %v1534_v44, %v1534_v44  ;;  %v1287_v52 = vpack.c.bf16 %v1215_v45, %v1215_v45  ;;  %v1216_v56 = vcombine.high %v1196_v7, %v1212_v8 }
 0x213   : > { %v1283_v54 = vcombine.low %v1264_v50, %v1280_v51  ;;  %v1608_v58 = vpack.c.bf16 %v1600_v55, %v1600_v55  ;;  %v1602_v63 = vcombine.high %v1582_v61, %v1598_v62  ;;  %v1282_v15 = vcombine.high %v1257_v29, %v1273_v30 }
 0x214   : > { %7535 = vmatmul.mubr.msk.bf16.vlgmr.msra.gmra.mxu1 %vm1911_vm3, %v1286_v32  ;;  %v2192_v40 = vsel %vm1911_vm3, %v1609_v47, 0  ;;  %v2054_v41 = vsel %vm1911_vm3, %v1606_v49, 0  ;;  %v1288_v59 = vpack.c.bf16 %v1216_v56, %v1216_v56  ;;  %v1284_v2 = vcombine.high %v1264_v50, %v1280_v51 }
 0x215   : > { %7539 = vmatpush3.bf16.xpose.msra.mxu1 %v2008_v42  ;;  %7540 = vmatprep.mubr.msk.bf16.mxu1 %vm8022_vm2, %v8021_v31  ;;  %v1291_v57 = vpack.c.bf16 %v1283_v54, %v1283_v54  ;;  %v2146_v60 = vsel %vm1911_vm3, %v1608_v58, 0  ;;  %v1610_v16 = vpack.c.bf16 %v1602_v63, %v1602_v63  ;;  %v1290_v0 = vpack.c.bf16 %v1282_v15, %v1282_v15 }
 0x216   : > { %7544 = vmatprep.subr.bf16.mxu1 %v8021_v31  ;;  %v1292_v3 = vpack.c.bf16 %v1284_v2, %v1284_v2 }
 0x217   : > { %v2238_v1 = vsel %vm1911_vm3, %v1610_v16, 0 }
 0x218   : > { %7553 = vmatmul.mubr.msk.bf16.vlgmr.msra.gmra.mxu0 %vm1911_vm3, %v1289_v48 }
 0x219   : > { %7563 = vmatpush3.bf16.xpose.msra.mxu0 %v2192_v40  ;;  %7564 = vmatprep.mubr.msk.bf16.mxu0 %vm8022_vm2, %v8021_v31 }
 0x21a   : > { %7574 = vmatprep.subr.bf16.mxu0 %v8021_v31 }
 0x21c   : > { %7541 = vmatmul.mubr.msk.bf16.vlgmr.msra.gmra.mxu1 %vm1911_vm3, %v1287_v52 }
 0x21d   : > { %7545 = vmatpush3.bf16.xpose.msra.mxu1 %v2054_v41  ;;  %7546 = vmatprep.mubr.msk.bf16.mxu1 %vm8022_vm2, %v8021_v31 }
 0x21e   : > { %7556 = vmatprep.subr.bf16.mxu1 %v8021_v31 }
 0x220   : > { %7565 = vmatmul.mubr.msk.bf16.vlgmr.msra.gmra.mxu0 %vm1911_vm3, %v1291_v57  ;;  %v1614_v57 = vpop.permute.xlu1 %1613 }
 0x221   : > { %7576 = vmatprep.mubr.msk.bf16.mxu0 %vm8022_vm2, %v8021_v31 }
 0x224   : > { %7547 = vmatmul.mubr.msk.bf16.vlgmr.msra.gmra.mxu1 %vm1911_vm3, %v1288_v59 }
 0x225   : > { %7557 = vmatpush3.bf16.xpose.msra.mxu1 %v2146_v60  ;;  %7558 = vmatprep.mubr.msk.bf16.mxu1 %vm8022_vm2, %v8021_v31 }
 0x226   : > { %7568 = vmatprep.subr.bf16.mxu1 %v8021_v31 }
 0x22c   : > { %7559 = vmatmul.mubr.msk.bf16.vlgmr.msra.gmra.mxu1 %vm1911_vm3, %v1290_v0 }
 0x22d   : > { %7569 = vmatpush3.bf16.xpose.msra.mxu1 %v2238_v1  ;;  %7570 = vmatprep.mubr.msk.bf16.mxu1 %vm8022_vm2, %v8021_v31 }
 0x22e   : > { %7580 = vmatprep.subr.bf16.mxu1 %v8021_v31 }
 0x234   : > { %7571 = vmatmul.mubr.msk.bf16.vlgmr.msra.gmra.mxu1 %vm1911_vm3, %v1292_v3 }
 0x235   : > { %7582 = vmatprep.mubr.msk.bf16.mxu1 %vm8022_vm2, %v8021_v31 }
 0x2cc   : > { %v1952_v4 = vpop.f32.mrf.mxu1 }
 0x2cd   : > { %v2281_v5 = vsel %vm2280_vm4, %v1952_v4, -inf }
 0x2ce   : > { %2282 = vmax.xlane.f32.xlu0 %v2281_v5  ;;  %v7530_v9 = vpop.f32.mrf.mxu1 }
 0x2d0   : > { %v1955_v19 = vpop.f32.mrf.mxu1 }
 0x2d2   : > { %v7531_v20 = vpop.f32.mrf.mxu1 }
 0x2d4   : > { %v8441_v10 = vpop.f32.mrf.mxu1 }
 0x2d5   : > { %v2284_v28 = vsel %vm2280_vm4, %v8441_v10, -inf }
 0x2d6   : > { %v7536_v11 = vpop.f32.mrf.mxu1 }
 0x2d8   : > { %v2001_v13 = vpop.f32.mrf.mxu1  ;;  %v2136_v21 = vpop.f32.mrf.mxu0 }
 0x2d9   : > { %v2293_v22 = vsel %vm2280_vm4, %v2136_v21, -inf }
 0x2da   : > { %v7537_v14 = vpop.f32.mrf.mxu1  ;;  %2294 = vmax.xlane.f32.xlu1 %v2293_v22  ;;  %v7554_v24 = vpop.f32.mrf.mxu0 }
 0x2dc   : > { %v2044_v23 = vpop.f32.mrf.mxu1  ;;  %v2139_v27 = vpop.f32.mrf.mxu0 }
 0x2dd   : > { %v2287_v25 = vsel %vm2280_vm4, %v2044_v23, -inf }
 0x2de   : > { %2288 = vmax.xlane.f32.xlu0 %v2287_v25  ;;  %v7542_v26 = vpop.f32.mrf.mxu1  ;;  %2285 = vmax.xlane.f32.xlu1 %v2284_v28  ;;  %v7555_v30 = vpop.f32.mrf.mxu0 }
 0x2e0   : > { %v2047_v29 = vpop.f32.mrf.mxu1  ;;  %v8449_v62 = vpop.f32.mrf.mxu0 }
 0x2e1   : > { %v2299_v32 = vsel %vm2280_vm4, %v8449_v62, -inf }
 0x2e2   : > { %v7543_v61 = vpop.f32.mrf.mxu1  ;;  %2300 = vmax.xlane.f32.xlu1 %v2299_v32  ;;  %v7566_v7 = vpop.f32.mrf.mxu0 }
 0x2e4   : > { %v2090_v35 = vpop.f32.mrf.mxu1  ;;  %v2231_v38 = vpop.f32.mrf.mxu0 }
 0x2e5   : > { %v2290_v8 = vsel %vm2280_vm4, %v2090_v35, -inf }
 0x2e6   : > { %2291 = vmax.xlane.f32.xlu0 %v2290_v8  ;;  %v7548_v34 = vpop.f32.mrf.mxu1  ;;  %v7567_v42 = vpop.f32.mrf.mxu0 }
 0x2e8   : > { %v2093_v39 = vpop.f32.mrf.mxu1 }
 0x2ea   : > { %v7549_v43 = vpop.f32.mrf.mxu1 }
 0x2ec   : > { %v8454_v44 = vpop.f32.mrf.mxu1 }
 0x2ed   : > { %v2296_v45 = vsel %vm2280_vm4, %v8454_v44, -inf }
 0x2ee   : > { %2297 = vmax.xlane.f32.xlu0 %v2296_v45  ;;  %v7560_v47 = vpop.f32.mrf.mxu1  ;;  %v8499_v45 = vadd.f32 %v8443_v12, %v8279_v36 }
 0x2f0   : > { %v2185_v48 = vpop.f32.mrf.mxu1 }
 0x2f2   : > { %v7561_v49 = vpop.f32.mrf.mxu1 }
 0x2f3   : > { %1625 = vrot.lane.b32.xlu1 %v8290_v37, %s8017_s23 }
 0x2f4   : > { %v8458_v50 = vpop.f32.mrf.mxu1 }
 0x2f5   : > { %v2302_v51 = vsel %vm2280_vm4, %v8458_v50, -inf }
 0x2f6   : > { %2303 = vmax.xlane.f32.xlu0 %v2302_v51  ;;  %v7572_v52 = vpop.f32.mrf.mxu1 }
 0x2f8   : > { %v2277_v40 = vpop.f32.mrf.mxu1 }
 0x2fa   : > { %v7573_v41 = vpop.f32.mrf.mxu1 }
 0x30c   : > { %1619 = vrot.lane.b32.xlu0 %v8290_v37, %s8019_s13 }
 0x357   : > { %v2283_v54 = vpop.xlane.xlu0 %2282 }
 0x358   : > { %v2305_v55 = vsub.f32 %v1952_v4, %v2283_v54 }
 0x35a   : > { %v2313_v56 = vmul.f32 1.442695, %v2305_v55 }
 0x35c   : > { %7832 = vpow2.f32 %v2313_v56 }
 0x363   : > { %v2295_v58 = vpop.xlane.xlu1 %2294 }
 0x364   : > { %v2309_v59 = vsub.f32 %v2136_v21, %v2295_v58 }
 0x366   : > { %v2321_v63 = vmul.f32 1.442695, %v2309_v59 }
 0x367   : > { %v2289_v60 = vpop.xlane.xlu0 %2288  ;;  %v2286_v0 = vpop.xlane.xlu1 %2285 }
 0x368   : > { %v2307_v15 = vsub.f32 %v2044_v23, %v2289_v60  ;;  %7834 = vpow2.f32 %v2321_v63  ;;  %v2306_v2 = vsub.f32 %v8441_v10, %v2286_v0 }
 0x369   : > { %v8466_v16 = vpop.eup %7832 }
 0x36a   : > { %v2317_v1 = vmul.f32 1.442695, %v2307_v15  ;;  %v2329_v3 = vsel %vm2280_vm4, %v8466_v16, 0.0  ;;  %v2315_v4 = vmul.f32 1.442695, %v2306_v2 }
 0x36b   : > { %2330 = vadd.xlane.f32.xlu1 %v2329_v3  ;;  %v8477_v14 = vpop.xlane.xlu1 %2300 }
 0x36c   : > { %7836 = vpow2.f32 %v2317_v1 }
 0x36d   : > { %7838 = vpow2.f32 %v2315_v4 }
 0x36f   : > { %v2292_v5 = vpop.xlane.xlu0 %2291  ;;  %v1626_v24 = vpop.permute.xlu1 %1625 }
 0x370   : > { %v2308_v9 = vsub.f32 %v2090_v35, %v2292_v5  ;;  %v1647_v27 = vcombine.low %v1614_v57, %v1626_v24  ;;  %v1648_v28 = vcombine.high %v1614_v57, %v1626_v24  ;;  %v2311_v24 = vsub.f32 %v8449_v62, %v8477_v14 }
 0x372   : > { %v2319_v19 = vmul.f32 1.442695, %v2308_v9  ;;  %v1655_v35 = vrot.slane %v1647_v27, %v8295_v46  ;;  %v1662_v7 = vrot.slane %v1648_v28, %v8295_v46  ;;  %v2325_v27 = vmul.f32 1.442695, %v2311_v24 }
 0x374   : > { %7840 = vpow2.f32 %v2319_v19 }
 0x375   : > { %v8471_v20 = vpop.eup %7834 }
 0x376   : > { %v2341_v11 = vsel %vm2280_vm4, %v8471_v20, 0.0 }
 0x377   : > { %2342 = vadd.xlane.f32.xlu0 %v2341_v11  ;;  %v2298_v22 = vpop.xlane.xlu0 %2297 }
 0x378   : > { %v2310_v19 = vsub.f32 %v8454_v44, %v2298_v22 }
 0x379   : > { %v8475_v13 = vpop.eup %7836 }
 0x37a   : > { %v2335_v10 = vsel %vm2280_vm4, %v8475_v13, 0.0  ;;  %v8481_v21 = vpop.eup %7838 }
 0x37b   : > { %2336 = vadd.xlane.f32.xlu1 %v2335_v10  ;;  %v2332_v23 = vsel %vm2280_vm4, %v8481_v21, 0.0 }
 0x37c   : > { %2333 = vadd.xlane.f32.xlu0 %v2332_v23  ;;  %v2323_v23 = vmul.f32 1.442695, %v2310_v19 }
 0x37e   : > { %7842 = vpow2.f32 %v2323_v23 }
 0x37f   : > { %v8485_v25 = vpop.xlane.xlu0 %2303  ;;  %7844 = vpow2.f32 %v2325_v27 }
 0x380   : > { %v2312_v62 = vsub.f32 %v8458_v50, %v8485_v25 }
 0x381   : > { %v8487_v26 = vpop.eup %7840 }
 0x382   : > { %v2338_v29 = vsel %vm2280_vm4, %v8487_v26, 0.0  ;;  %v2327_v14 = vmul.f32 1.442695, %v2312_v62 }
 0x383   : > { %2339 = vadd.xlane.f32.xlu0 %v2338_v29  ;;  %v1620_v30 = vpop.permute.xlu0 %1619 }
 0x384   : > { %v1631_v61 = vcombine.low %v8290_v37, %v1620_v30  ;;  %v1632_v32 = vcombine.high %v8290_v37, %v1620_v30  ;;  %7846 = vpow2.f32 %v2327_v14 }
 0x386   : > { %v1639_v8 = vrot.slane %v1631_v61, %v8295_v46  ;;  %v1646_v34 = vrot.slane %v1632_v32, %v8295_v46 }
 0x388   : > { %v1663_v38 = vcombine.low %v1639_v8, %v1655_v35  ;;  %v1664_v39 = vcombine.high %v1639_v8, %v1655_v35  ;;  %v1679_v42 = vcombine.low %v1646_v34, %v1662_v7  ;;  %v1680_v43 = vcombine.high %v1646_v34, %v1662_v7 }
 0x38a   : > { %v1671_v47 = vrot.slane %v1663_v38, %v8298_v53  ;;  %v1678_v37 = vrot.slane %v1664_v39, %v8298_v53  ;;  %v1687_v48 = vrot.slane %v1679_v42, %v8298_v53  ;;  %v1694_v49 = vrot.slane %v1680_v43, %v8298_v53 }
 0x38b   : > { %v8524_v44 = vpop.eup %7842 }
 0x38c   : > { %v1767_v51 = vcombine.low %v1671_v47, %v1678_v37  ;;  %v7010_v52 = vcombine.high %v1671_v47, %v1678_v37  ;;  %v1783_v40 = vcombine.low %v1687_v48, %v1694_v49  ;;  %v7011_v41 = vcombine.high %v1687_v48, %v1694_v49  ;;  %1621 = vrot.lane.b32.xlu1 %v8499_v45, %s8019_s13  ;;  %v8528_v28 = vpop.eup %7844 }
 0x38d   : > { %v2344_v22 = vsel %vm2280_vm4, %v8524_v44, 0.0  ;;  %v2347_v29 = vsel %vm2280_vm4, %v8528_v28, 0.0 }
 0x38e   : > { %v1774_v54 = vrot.slane %v1767_v51, %v8295_v46  ;;  %v1782_v36 = vrot.slane %v7010_v52, %v8295_v46  ;;  %v1790_v12 = vrot.slane %v1783_v40, %v8295_v46  ;;  %v1798_v55 = vrot.slane %v7011_v41, %v8295_v46 }
 0x390   : > { %v1799_v56 = vcombine.low %v1774_v54, %v1782_v36  ;;  %v1815_v57 = vcombine.low %v1790_v12, %v1798_v55  ;;  %v1800_v58 = vcombine.high %v1774_v54, %v1782_v36  ;;  %v1816_v59 = vcombine.high %v1790_v12, %v1798_v55 }
 0x391   : > { %v8536_v30 = vpop.eup %7846 }
 0x392   : > { %v1807_v60 = vrot.slane %v1799_v56, %v8298_v53  ;;  %v1823_v63 = vrot.slane %v1815_v57, %v8298_v53  ;;  %v1814_v15 = vrot.slane %v1800_v58, %v8298_v53  ;;  %v1830_v0 = vrot.slane %v1816_v59, %v8298_v53 }
 0x393   : > { %v2350_v61 = vsel %vm2280_vm4, %v8536_v30, 0.0 }
 0x394   : > { %v1831_v1 = vcombine.low %v1807_v60, %v1823_v63  ;;  %v1832_v2 = vcombine.high %v1807_v60, %v1823_v63  ;;  %v1833_v3 = vcombine.low %v1814_v15, %v1830_v0  ;;  %v1834_v4 = vcombine.high %v1814_v15, %v1830_v0 }
 0x396   : > { %v1903_v5 = vpack.c.bf16 %v1831_v1, %v1831_v1  ;;  %v1904_v9 = vpack.c.bf16 %v1832_v2, %v1832_v2  ;;  %v1905_v34 = vpack.c.bf16 %v1833_v3, %v1833_v3  ;;  %v1906_v49 = vpack.c.bf16 %v1834_v4, %v1834_v4 }
 0x398   : > { %v2382_v11 = vsel %vm2380_vm5, %v1903_v5, 0  ;;  %v2428_v10 = vsel %vm2380_vm5, %v1904_v9, 0  ;;  %v2474_v50 = vsel %vm2380_vm5, %v1905_v34, 0  ;;  %v2520_v52 = vsel %vm2380_vm5, %v1906_v49, 0 }
 0x399   : > { %1615 = vrot.lane.b32.xlu0 %v8499_v45, %s8018_s1  ;;  %7575 = vmatpush3.bf16.msra.mxu0 %v2382_v11  ;;  %s9357_s1 = scalar_lea.vmem %s9312_s6, %s8169_s20 }
 0x39a   : > { %7581 = vmatpush3.bf16.msra.mxu1 %v2428_v10  ;;  %7586 = vmatprep.subr.bf16.mxu0 %v8021_v31 }
 0x39b   : > { %7592 = vmatprep.subr.bf16.mxu1 %v8021_v31 }
 0x3b0   : > { %2345 = vadd.xlane.f32.xlu1 %v2344_v22 }
 0x3b8   : > { %2348 = vadd.xlane.f32.xlu0 %v2347_v29 }
 0x3c1   : > { %1627 = vrot.lane.b32.xlu1 %v8499_v45, %s8017_s23  ;;  %s8030_s23 = smov (!%p7245_p6), 64  }
 0x3e5   : > { %2351 = vadd.xlane.f32.xlu1 %v2350_v61 }
 0x3f4   : > { %v2331_v32 = vpop.xlane.xlu1 %2330 }
 0x3f5   : > { %7848 = vrcp.f32 %v2331_v32 }
 0x400   : > { %v2343_v7 = vpop.xlane.xlu0 %2342 }
 0x402   : > { %v7849_v35 = vpop.eup %7848 }
 0x403   : > { %v2354_v8 = vmul.f32 %v7849_v35, %v8466_v16 }
 0x404   : > { %v2337_v38 = vpop.xlane.xlu1 %2336 }
 0x405   : > { %7850 = vrcp.f32 %v2337_v38  ;;  %v2369_v39 = vpack.c.bf16 %v2354_v8, %v2354_v8  ;;  %v2334_v42 = vpop.xlane.xlu0 %2333 }
 0x406   : > { %7852 = vrcp.f32 %v2334_v42 }
 0x407   : > { %7577 = vmatmul.mubr.msk.bf16.vlgmr.msra.gmra.mxu0 %vm2280_vm4, %v2369_v39 }
 0x408   : > { %7587 = vmatpush3.bf16.msra.mxu0 %v2474_v50  ;;  %7588 = vmatprep.mubr.msk.bf16.mxu0 %vm8022_vm2, %v8021_v31  ;;  %v1622_v41 = vpop.permute.xlu1 %1621 }
 0x409   : > { %7598 = vmatprep.subr.bf16.mxu0 %v8021_v31  ;;  %v1699_v36 = vcombine.low %v8499_v45, %v1622_v41  ;;  %v1700_v12 = vcombine.high %v8499_v45, %v1622_v41 }
 0x40b   : > { %v1714_v59 = vrot.slane %v1700_v12, %v8295_v46 }
 0x40c   : > { %v2340_v25 = vpop.xlane.xlu0 %2339 }
 0x40d   : > { %7854 = vrcp.f32 %v2340_v25 }
 0x40e   : > { %7856 = vrcp.f32 %v2343_v7 }
 0x410   : > { %v1616_v55 = vpop.permute.xlu0 %1615 }
 0x412   : > { %v7851_v43 = vpop.eup %7850 }
 0x413   : > { %v2358_v16 = vmul.f32 %v7851_v43, %v8475_v13  ;;  %v7853_v47 = vpop.eup %7852 }
 0x414   : > { %v2356_v48 = vmul.f32 %v7853_v47, %v8481_v21 }
 0x415   : > { %v2371_v37 = vpack.c.bf16 %v2358_v16, %v2358_v16 }
 0x416   : > { %v2370_v51 = vpack.c.bf16 %v2356_v48, %v2356_v48 }
 0x417   : > { %7589 = vmatmul.mubr.msk.bf16.vlgmr.msra.gmra.mxu0 %vm2280_vm4, %v2371_v37 }
 0x418   : > { %7600 = vmatprep.mubr.msk.bf16.mxu0 %vm8022_vm2, %v8021_v31  ;;  %7583 = vmatmul.mubr.msk.bf16.vlgmr.msra.gmra.mxu1 %vm2280_vm4, %v2370_v51 }
 0x419   : > { %7593 = vmatpush3.bf16.msra.mxu1 %v2520_v52  ;;  %7594 = vmatprep.mubr.msk.bf16.mxu1 %vm8022_vm2, %v8021_v31 }
 0x41a   : > { %v7855_v40 = vpop.eup %7854  ;;  %7604 = vmatprep.subr.bf16.mxu1 %v8021_v31 }
 0x41b   : > { %v2360_v13 = vmul.f32 %v7855_v40, %v8487_v26  ;;  %v1707_v26 = vrot.slane %v1699_v36, %v8295_v46  ;;  %v7857_v35 = vpop.eup %7856 }
 0x41c   : > { %v2362_v37 = vmul.f32 %v7857_v35, %v8471_v20 }
 0x41d   : > { %v2372_v21 = vpack.c.bf16 %v2360_v13, %v2360_v13 }
 0x420   : > { %7595 = vmatmul.mubr.msk.bf16.vlgmr.msra.gmra.mxu1 %vm2280_vm4, %v2372_v21  ;;  %v2373_v21 = vpack.c.bf16 %v2362_v37, %v2362_v37 }
 0x421   : > { %7606 = vmatprep.mubr.msk.bf16.mxu1 %vm8022_vm2, %v8021_v31 }
 0x439   : > { %v2346_v54 = vpop.xlane.xlu1 %2345 }
 0x43a   : > { %7858 = vrcp.f32 %v2346_v54 }
 0x43d   : > { %v1628_v56 = vpop.permute.xlu1 %1627 }
 0x43e   : > { %v1715_v57 = vcombine.low %v1616_v55, %v1628_v56  ;;  %v1716_v58 = vcombine.high %v1616_v55, %v1628_v56 }
 0x440   : > { %v1723_v60 = vrot.slane %v1715_v57, %v8295_v46  ;;  %v1730_v63 = vrot.slane %v1716_v58, %v8295_v46 }
 0x441   : > { %v2349_v9 = vpop.xlane.xlu0 %2348 }
 0x442   : > { %v1731_v15 = vcombine.low %v1707_v26, %v1723_v60  ;;  %v1732_v0 = vcombine.high %v1707_v26, %v1723_v60  ;;  %v1747_v1 = vcombine.low %v1714_v59, %v1730_v63  ;;  %v1748_v2 = vcombine.high %v1714_v59, %v1730_v63 }
 0x443   : > { %7860 = vrcp.f32 %v2349_v9 }
 0x444   : > { %v1739_v45 = vrot.slane %v1731_v15, %v8298_v53  ;;  %v1746_v3 = vrot.slane %v1732_v0, %v8298_v53  ;;  %v1755_v4 = vrot.slane %v1747_v1, %v8298_v53  ;;  %v1762_v5 = vrot.slane %v1748_v2, %v8298_v53  ;;  %v7700_v2 = vld [vmem:[%s8191_s16 + $0x18] sm:$0xff]  }
 0x446   : > { %v1835_v19 = vcombine.low %v1739_v45, %v1746_v3  ;;  %v7012_v11 = vcombine.high %v1739_v45, %v1746_v3  ;;  %v1851_v10 = vcombine.low %v1755_v4, %v1762_v5  ;;  %v7013_v23 = vcombine.high %v1755_v4, %v1762_v5 }
 0x447   : > { %v7859_v39 = vpop.eup %7858 }
 0x448   : > { %v1842_v24 = vrot.slane %v1835_v19, %v8295_v46  ;;  %v1850_v27 = vrot.slane %v7012_v11, %v8295_v46  ;;  %v1858_v22 = vrot.slane %v1851_v10, %v8295_v46  ;;  %v1866_v29 = vrot.slane %v7013_v23, %v8295_v46 }
 0x449   : > { %v2364_v48 = vmul.f32 %v7859_v39, %v8524_v44 }
 0x44a   : > { %v1867_v62 = vcombine.low %v1842_v24, %v1850_v27  ;;  %v1883_v14 = vcombine.low %v1858_v22, %v1866_v29  ;;  %v1868_v61 = vcombine.high %v1842_v24, %v1850_v27  ;;  %v1884_v32 = vcombine.high %v1858_v22, %v1866_v29 }
 0x44b   : > { %v2374_v41 = vpack.c.bf16 %v2364_v48, %v2364_v48 }
 0x44c   : > { %v1875_v7 = vrot.slane %v1867_v62, %v8298_v53  ;;  %v1891_v8 = vrot.slane %v1883_v14, %v8298_v53  ;;  %v1882_v34 = vrot.slane %v1868_v61, %v8298_v53  ;;  %v1898_v38 = vrot.slane %v1884_v32, %v8298_v53 }
 0x44e   : > { %v1899_v42 = vcombine.low %v1875_v7, %v1891_v8  ;;  %v1900_v50 = vcombine.high %v1875_v7, %v1891_v8  ;;  %v1901_v25 = vcombine.low %v1882_v34, %v1898_v38  ;;  %v1902_v43 = vcombine.high %v1882_v34, %v1898_v38 }
 0x450   : > { %v1907_v16 = vpack.c.bf16 %v1899_v42, %v1899_v42  ;;  %v1908_v47 = vpack.c.bf16 %v1900_v50, %v1900_v50  ;;  %v1909_v52 = vpack.c.bf16 %v1901_v25, %v1901_v25  ;;  %v1910_v40 = vpack.c.bf16 %v1902_v43, %v1902_v43  ;;  %v7861_v13 = vpop.eup %7860 }
 0x451   : > { %v2366_v54 = vmul.f32 %v7861_v13, %v8528_v28 }
 0x452   : > { %v2566_v49 = vsel %vm2380_vm5, %v1907_v16, 0  ;;  %v2612_v51 = vsel %vm2380_vm5, %v1908_v47, 0  ;;  %v2658_v20 = vsel %vm2380_vm5, %v1909_v52, 0  ;;  %v2704_v44 = vsel %vm2380_vm5, %v1910_v40, 0 }
 0x453   : > { %7599 = vmatpush3.bf16.msra.mxu0 %v2566_v49  ;;  %7605 = vmatpush3.bf16.msra.mxu1 %v2612_v51  ;;  %v2375_v36 = vpack.c.bf16 %v2366_v54, %v2366_v54 }
 0x454   : > { %7610 = vmatprep.subr.bf16.mxu0 %v8021_v31  ;;  %7616 = vmatprep.subr.bf16.mxu1 %v8021_v31 }
 0x456   : > { %7601 = vmatmul.mubr.msk.bf16.vlgmr.msra.gmra.mxu0 %vm2280_vm4, %v2373_v21  ;;  %7607 = vmatmul.mubr.msk.bf16.vlgmr.msra.gmra.mxu1 %vm2280_vm4, %v2374_v41 }
 0x457   : > { %7611 = vmatpush3.bf16.msra.mxu0 %v2658_v20  ;;  %7617 = vmatpush3.bf16.msra.mxu1 %v2704_v44 }
 0x458   : > { %7612 = vmatprep.mubr.msk.bf16.mxu0 %vm8022_vm2, %v8021_v31  ;;  %7618 = vmatprep.mubr.msk.bf16.mxu1 %vm8022_vm2, %v8021_v31 }
 0x459   : > { %7622 = vmatprep.subr.bf16.mxu0 %v8021_v31 }
 0x45e   : > { %7613 = vmatmul.mubr.msk.bf16.vlgmr.msra.gmra.mxu0 %vm2280_vm4, %v2375_v36 }
 0x45f   : > { %7630 = vmatprep.mubr.msk.bf16.mxu0 %vm8022_vm2, %v8021_v31  ;;  %7623 = vmatpush3.bf16.msra.mxu0 %v7700_v2 }
 0x460   : > { %7624 = vmatprep.subr.bf16.mxu0 %v8021_v31 }
 0x46e   : > { %v2352_v12 = vpop.xlane.xlu1 %2351 }
 0x46f   : > { %7862 = vrcp.f32 %v2352_v12 }
 0x47c   : > { %v7863_v55 = vpop.eup %7862 }
 0x47d   : > { %v2368_v56 = vmul.f32 %v7863_v55, %v8536_v30  ;;  %v7701_v30 = vld [vmem:[%s8191_s16 + $0x10] sm:$0xff]  }
 0x47e   : > { %7625 = vmatpush3.bf16.msra.mxu0 %v7701_v30 }
 0x47f   : > { %v2376_v57 = vpack.c.bf16 %v2368_v56, %v2368_v56  ;;  %7626 = vmatprep.subr.bf16.mxu0 %v8021_v31 }
 0x481   : > { %7619 = vmatmul.mubr.msk.bf16.vlgmr.msra.gmra.mxu1 %vm2280_vm4, %v2376_v57 }
 0x482   : > { %3335 = vmatprep.mubr.bf16.mxu1 %v8016_v6 }
 0x4c7   : > { %v2418_v28 = vpop.f32.mrf.mxu0 }
 0x4c9   : > { %v7578_v58 = vpop.f32.mrf.mxu0 }
 0x4cb   : > { %v2421_v26 = vpop.f32.mrf.mxu0 }
 0x4cd   : > { %v7579_v59 = vpop.f32.mrf.mxu0 }
 0x4d7   : > { %v2510_v60 = vpop.f32.mrf.mxu0 }
 0x4d8   : > { %v2746_v63 = vcombine.low %v2418_v28, %v2510_v60  ;;  %v2747_v15 = vcombine.high %v2418_v28, %v2510_v60  ;;  %v2464_v1 = vpop.f32.mrf.mxu1 }
 0x4d9   : > { %v7590_v0 = vpop.f32.mrf.mxu0 }
 0x4da   : > { %v7584_v3 = vpop.f32.mrf.mxu1  ;;  %v2754_v24 = vrot.slane %v2746_v63, %v8295_v46  ;;  %v2761_v27 = vrot.slane %v2747_v15, %v8295_v46 }
 0x4db   : > { %v2513_v45 = vpop.f32.mrf.mxu0 }
 0x4dc   : > { %v2467_v5 = vpop.f32.mrf.mxu1 }
 0x4dd   : > { %v7591_v4 = vpop.f32.mrf.mxu0 }
 0x4de   : > { %v7585_v9 = vpop.f32.mrf.mxu1 }
 0x4e0   : > { %v2556_v19 = vpop.f32.mrf.mxu1 }
 0x4e1   : > { %v2762_v11 = vcombine.low %v2464_v1, %v2556_v19  ;;  %v2763_v10 = vcombine.high %v2464_v1, %v2556_v19 }
 0x4e2   : > { %v7596_v23 = vpop.f32.mrf.mxu1 }
 0x4e3   : > { %v2770_v22 = vrot.slane %v2762_v11, %v8295_v46  ;;  %v2777_v29 = vrot.slane %v2763_v10, %v8295_v46 }
 0x4e4   : > { %v2559_v62 = vpop.f32.mrf.mxu1 }
 0x4e5   : > { %v2778_v14 = vcombine.low %v2754_v24, %v2770_v22  ;;  %v2779_v61 = vcombine.high %v2754_v24, %v2770_v22  ;;  %v2794_v32 = vcombine.low %v2761_v27, %v2777_v29  ;;  %v2795_v35 = vcombine.high %v2761_v27, %v2777_v29 }
 0x4e6   : > { %v7597_v7 = vpop.f32.mrf.mxu1 }
 0x4e7   : > { %v2786_v8 = vrot.slane %v2778_v14, %v8298_v53  ;;  %v2793_v34 = vrot.slane %v2779_v61, %v8298_v53  ;;  %v2802_v38 = vrot.slane %v2794_v32, %v8298_v53  ;;  %v2809_v39 = vrot.slane %v2795_v35, %v8298_v53 }
 0x4e9   : > { %v2882_v42 = vcombine.low %v2786_v8, %v2793_v34  ;;  %v7030_v50 = vcombine.high %v2786_v8, %v2793_v34  ;;  %v2898_v25 = vcombine.low %v2802_v38, %v2809_v39  ;;  %v7031_v43 = vcombine.high %v2802_v38, %v2809_v39  ;;  %v7702_v39 = vld [vmem:[%s8191_s16 + $0x8] sm:$0xff]  }
 0x4ea   : > { %7627 = vmatpush3.bf16.msra.mxu0 %v7702_v39 }
 0x4eb   : > { %v2889_v16 = vrot.slane %v2882_v42, %v8295_v46  ;;  %v2897_v47 = vrot.slane %v7030_v50, %v8295_v46  ;;  %v2905_v37 = vrot.slane %v2898_v25, %v8295_v46  ;;  %v2913_v48 = vrot.slane %v7031_v43, %v8295_v46  ;;  %7628 = vmatprep.subr.bf16.mxu0 %v8021_v31 }
 0x4ed   : > { %v2915_v49 = vcombine.high %v2889_v16, %v2897_v47  ;;  %v2931_v51 = vcombine.high %v2905_v37, %v2913_v48  ;;  %v2914_v52 = vcombine.low %v2889_v16, %v2897_v47  ;;  %v2930_v40 = vcombine.low %v2905_v37, %v2913_v48 }
 0x4ef   : > { %v8617_v13 = vrot.slane %v2915_v49, %v8298_v53  ;;  %v8620_v21 = vrot.slane %v2931_v51, %v8298_v53  ;;  %v8623_v41 = vrot.slane %v2914_v52, %v8298_v53  ;;  %v8626_v20 = vrot.slane %v2930_v40, %v8298_v53 }
 0x4f1   : > { %v2948_v44 = vcombine.low %v8617_v13, %v8620_v21  ;;  %v2946_v54 = vcombine.low %v8623_v41, %v8626_v20  ;;  %v2947_v36 = vcombine.high %v8623_v41, %v8626_v20  ;;  %v2949_v12 = vcombine.high %v8617_v13, %v8620_v21  ;;  %v7034_v41 = vld [vmem:[%s837_s29] ss:$0 sm:$0xff] }
 0x516   : > { %v2602_v55 = vpop.f32.mrf.mxu0  ;;  %v2648_v56 = vpop.f32.mrf.mxu1 }
 0x518   : > { %v7602_v57 = vpop.f32.mrf.mxu0  ;;  %v7608_v28 = vpop.f32.mrf.mxu1 }
 0x51a   : > { %v2605_v58 = vpop.f32.mrf.mxu0  ;;  %v2651_v26 = vpop.f32.mrf.mxu1 }
 0x51c   : > { %v7603_v59 = vpop.f32.mrf.mxu0  ;;  %v7609_v60 = vpop.f32.mrf.mxu1 }
 0x51e   : > { %v2694_v63 = vpop.f32.mrf.mxu0 }
 0x51f   : > { %v2814_v2 = vcombine.low %v2602_v55, %v2694_v63  ;;  %v2815_v45 = vcombine.high %v2602_v55, %v2694_v63  ;;  %v7703_v55 = vld [vmem:[%s8191_s16] sm:$0xff]  }
 0x520   : > { %v7614_v15 = vpop.f32.mrf.mxu0  ;;  %7629 = vmatpush3.bf16.msra.mxu0 %v7703_v55 }
 0x521   : > { %v2822_v9 = vrot.slane %v2814_v2, %v8295_v46  ;;  %v2829_v19 = vrot.slane %v2815_v45, %v8295_v46 }
 0x522   : > { %v2697_v0 = vpop.f32.mrf.mxu0 }
 0x524   : > { %v7615_v1 = vpop.f32.mrf.mxu0 }
 0x541   : > { %v2740_v3 = vpop.f32.mrf.mxu1 }
 0x542   : > { %v2830_v30 = vcombine.low %v2648_v56, %v2740_v3  ;;  %v2831_v4 = vcombine.high %v2648_v56, %v2740_v3 }
 0x543   : > { %v7620_v5 = vpop.f32.mrf.mxu1 }
 0x544   : > { %v2838_v11 = vrot.slane %v2830_v30, %v8295_v46  ;;  %v2845_v10 = vrot.slane %v2831_v4, %v8295_v46 }
 0x545   : > { %v2743_v23 = vpop.f32.mrf.mxu1 }
 0x546   : > { %v2846_v24 = vcombine.low %v2822_v9, %v2838_v11  ;;  %v2847_v27 = vcombine.high %v2822_v9, %v2838_v11  ;;  %v2862_v22 = vcombine.low %v2829_v19, %v2845_v10  ;;  %v2863_v29 = vcombine.high %v2829_v19, %v2845_v10  ;;  %v7872_v19 = vld [vmem:[#allocation2] sm:$0xff] }
 0x547   : > { %v7621_v62 = vpop.f32.mrf.mxu1 }
 0x548   : > { %v2854_v14 = vrot.slane %v2846_v24, %v8298_v53  ;;  %v2861_v61 = vrot.slane %v2847_v27, %v8298_v53  ;;  %v2870_v32 = vrot.slane %v2862_v22, %v8298_v53  ;;  %v2877_v35 = vrot.slane %v2863_v29, %v8298_v53  ;;  %v7873_v22 = vld [vmem:[#allocation2 + $0x8] sm:$0xff] }
 0x54a   : > { %v2950_v7 = vcombine.low %v2854_v14, %v2861_v61  ;;  %v7032_v8 = vcombine.high %v2854_v14, %v2861_v61  ;;  %v2966_v34 = vcombine.low %v2870_v32, %v2877_v35  ;;  %v7033_v38 = vcombine.high %v2870_v32, %v2877_v35 }
 0x54c   : > { %v2957_v42 = vrot.slane %v2950_v7, %v8295_v46  ;;  %v2965_v50 = vrot.slane %v7032_v8, %v8295_v46  ;;  %v2973_v25 = vrot.slane %v2966_v34, %v8295_v46  ;;  %v2981_v43 = vrot.slane %v7033_v38, %v8295_v46 }
 0x54e   : > { %v2983_v16 = vcombine.high %v2957_v42, %v2965_v50  ;;  %v2999_v47 = vcombine.high %v2973_v25, %v2981_v43  ;;  %v2982_v37 = vcombine.low %v2957_v42, %v2965_v50  ;;  %v2998_v48 = vcombine.low %v2973_v25, %v2981_v43  ;;  %v3194_v50 = vld [vmem:[%s8205_s14 + $0x180] sm:$0xff]  ;;  %v3195_v43 = vld [vmem:[%s8205_s14 + $0x188] sm:$0xff] }
 0x54f   : > { %v3196_v25 = vld [vmem:[%s8205_s14 + $0x1c0] sm:$0xff] }
 0x550   : > { %v2997_v49 = vrot.slane %v2983_v16, %v8298_v53  ;;  %v3013_v51 = vrot.slane %v2999_v47, %v8298_v53  ;;  %v2990_v52 = vrot.slane %v2982_v37, %v8298_v53  ;;  %v3006_v40 = vrot.slane %v2998_v48, %v8298_v53  ;;  %v3197_v47 = vld [vmem:[%s8205_s14 + $0x1c8] sm:$0xff] }
 0x551   : > { %v7055_v16 = vcombine.high %v3194_v50, %v3196_v25  ;;  %v7054_v37 = vcombine.low %v3194_v50, %v3196_v25  ;;  %v7056_v48 = vcombine.low %v3195_v43, %v3197_v47  ;;  %v3476_v50 = vld [vmem:[%s8205_s14 + $0x158] sm:$0xff] }
 0x552   : > { %v3016_v56 = vcombine.low %v2997_v49, %v3013_v51  ;;  %v3015_v57 = vcombine.high %v2990_v52, %v3006_v40  ;;  %v3014_v28 = vcombine.low %v2990_v52, %v3006_v40  ;;  %v3017_v59 = vcombine.high %v2997_v49, %v3013_v51  ;;  %v3190_v51 = vld [vmem:[%s8205_s14 + $0x100] sm:$0xff]  ;;  %v3191_v40 = vld [vmem:[%s8205_s14 + $0x108] sm:$0xff] }
 0x553   : > { %v7057_v49 = vcombine.high %v3195_v43, %v3197_v47  ;;  %3311 = vmatprep.subr.bf16.mxu1 %v7055_v16  ;;  %v3192_v52 = vld [vmem:[%s8205_s14 + $0x140] sm:$0xff] }
 0x554   : > { %v7678_v58 = vpack.i.bf16 %v3016_v56, %v2948_v44  ;;  %v7673_v26 = vpack.i.bf16 %v3015_v57, %v2947_v36  ;;  %v7683_v31 = vpack.i.bf16 %v3017_v59, %v2949_v12  ;;  %3312 = vmatpush1.bf16.msra.mxu1 %v7054_v37  ;;  %v7050_v55 = vcombine.low %v3190_v51, %v3192_v52  ;;  %v3193_v57 = vld [vmem:[%s8205_s14 + $0x148] sm:$0xff]  ;;  %v3469_v37 = vld [vmem:[%s8205_s14 + $0x90] sm:$0xff] }
 0x555   : > { %3354 = vmatprep.subr.bf16.mxu0 %v7057_v49  ;;  %v7051_v56 = vcombine.high %v3190_v51, %v3192_v52  ;;  %v7053_v59 = vcombine.high %v3191_v40, %v3193_v57  ;;  %v3470_v49 = vld [vmem:[%s8205_s14 + $0x98] sm:$0xff] }
 0x556   : > { %7679 = vrot.lane.b32.xlu1 %v7678_v58, %s8025_s30  ;;  %7674 = vrot.lane.b32.xlu0 %v7673_v26, %s8026_s22  ;;  %v3188_v58 = vld [vmem:[%s8205_s14 + $0xc0] sm:$0xff]  ;;  %v7052_v26 = vcombine.low %v3191_v40, %v3193_v57  ;;  %v3472_v51 = vld [vmem:[%s8205_s14 + $0xd8] sm:$0xff]  ;;  %s9358_s30 = sld [smem:[#allocation16_spill]] (!%p7245_p6) }
 0x557   : > { %3313 = vmatprep.subr.bf16.mxu1 %v7051_v56  ;;  %v7067_v56 = vcombine.high %v3470_v49, %v3472_v51  ;;  %v3465_v57 = vld [vmem:[%s8205_s14 + $0x10] sm:$0xff] }
 0x558   : > { %3314 = vmatpush1.bf16.msra.mxu1 %v7050_v55 }
 0x55a   : > { %7684 = vrot.lane.b32.xlu0 %v7683_v31, %s8027_s24 }
 0x5c8   : > { %v7680_v60 = vpop.permute.xlu1 %7679  ;;  %v7675_v63 = vpop.permute.xlu0 %7674 }
 0x5c9   : > { %v7677_v15 = vunpack.i.h.bf16 %v7675_v63  ;;  %v7676_v0 = vunpack.i.l.bf16 %v7675_v63  ;;  %v7682_v1 = vunpack.i.h.bf16 %v7680_v60  ;;  %v7681_v2 = vunpack.i.l.bf16 %v7680_v60  ;;  %v3187_v60 = vld [vmem:[%s8205_s14 + $0x88] sm:$0xff] }
 0x5ca   : > { %v3189_v63 = vld [vmem:[%s8205_s14 + $0xc8] sm:$0xff] }
 0x5cb   : > { %v3042_v44 = vsel %vm1911_vm3, %v2946_v54, %v7676_v0  ;;  %v3043_v36 = vsel %vm1911_vm3, %v3014_v28, %v7677_v15  ;;  %v3186_v28 = vld [vmem:[%s8205_s14 + $0x80] sm:$0xff]  ;;  %v7049_v0 = vcombine.high %v3187_v60, %v3189_v63 }
 0x5cc   : > { %v7685_v13 = vpop.permute.xlu0 %7684  ;;  %v3045_v45 = vsel %vm3044_vm6, %v3042_v44, %v7681_v2  ;;  %v3046_v3 = vsel %vm3044_vm6, %v3043_v36, %v7682_v1  ;;  %v7047_v31 = vcombine.high %v3186_v28, %v3188_v58  ;;  %v3182_v15 = vld [vmem:[%s8205_s14] sm:$0xff]  ;;  %v3183_v2 = vld [vmem:[%s8205_s14 + $0x8] sm:$0xff]  ;;  %v7046_v36 = vcombine.low %v3186_v28, %v3188_v58  ;;  %v3467_v28 = vld [vmem:[%s8205_s14 + $0x50] sm:$0xff] }
 0x5cd   : > { %v7687_v21 = vunpack.i.h.bf16 %v7685_v13  ;;  %v7686_v12 = vunpack.i.l.bf16 %v7685_v13  ;;  %v3184_v1 = vld [vmem:[%s8205_s14 + $0x40] sm:$0xff]  ;;  %v3185_v44 = vld [vmem:[%s8205_s14 + $0x48] sm:$0xff]  ;;  %v3477_v13 = vld [vmem:[%s8205_s14 + $0x190] sm:$0xff] }
 0x5ce   : > { %3315 = vmatprep.subr.bf16.mxu1 %v7047_v31  ;;  %v3466_v58 = vld [vmem:[%s8205_s14 + $0x18] sm:$0xff]  ;;  %v7066_v31 = vcombine.low %v3470_v49, %v3472_v51 }
 0x5cf   : > { %v3048_v30 = vsel %vm3047_vm7, %v3045_v45, %v7686_v12  ;;  %v3049_v4 = vsel %vm3047_vm7, %v3046_v3, %v7687_v21  ;;  %v3479_v21 = vld [vmem:[%s8205_s14 + $0x1d0] sm:$0xff]  ;;  %v3478_v12 = vld [vmem:[%s8205_s14 + $0x198] sm:$0xff]  ;;  %v7048_v45 = vcombine.low %v3187_v60, %v3189_v63  ;;  %v7043_v3 = vcombine.high %v3182_v15, %v3184_v1  ;;  %3316 = vmatpush1.bf16.msra.mxu1 %v7046_v36 }
 0x5d0   : > { %v3050_v5 = vpack.c.bf16 %v3049_v4, %v3048_v30  ;;  %v7072_v30 = vcombine.low %v3477_v13, %v3479_v21  ;;  %v3480_v4 = vld [vmem:[%s8205_s14 + $0x1d8] sm:$0xff]  ;;  %v7061_v60 = vcombine.high %v3465_v57, %v3467_v28 }
 0x5d1   : > { %3317 = vmatprep.subr.bf16.mxu1 %v7043_v3  ;;  %v7707_v36 = vld [vmem:[%s8217_s26 + $0x1b8] sm:$0xff]   ;;  %v7712_v3 = vld [vmem:[%s8217_s26 + $0x168] sm:$0xff]  }
 0x5d2   : > { %7631 = vmatmul.mubr.msk.bf16.vlgmr.msra.gmra.mxu0 %vm944_vm1, %v3050_v5  ;;  %v7045_v5 = vcombine.high %v3183_v2, %v3185_v44 }
 0x5d3   : > { %3378 = vmatprep.mubr.bf16.mxu0 %v8016_v6  ;;  %3355 = vmatpush1.bf16.msra.mxu0 %v7056_v48  ;;  %v3471_v48 = vld [vmem:[%s8205_s14 + $0xd0] sm:$0xff] }
 0x5d4   : > { %3356 = vmatprep.subr.bf16.mxu0 %v7053_v59  ;;  %v7065_v55 = vcombine.high %v3469_v37, %v3471_v48  ;;  %v7064_v59 = vcombine.low %v3469_v37, %v3471_v48 }
 0x5d7   : > { %3357 = vmatpush1.bf16.msra.mxu0 %v7052_v26  ;;  %v3468_v26 = vld [vmem:[%s8205_s14 + $0x58] sm:$0xff] }
 0x5d8   : > { %3358 = vmatprep.subr.bf16.mxu0 %v7049_v0  ;;  %v7063_v63 = vcombine.high %v3466_v58, %v3468_v26  ;;  %v7062_v0 = vcombine.low %v3466_v58, %v3468_v26 }
 0x5db   : > { %3359 = vmatpush1.bf16.msra.mxu0 %v7048_v45  ;;  %v7711_v45 = vld [vmem:[%s8217_s26 + $0x1b0] sm:$0xff]  }
 0x5dc   : > { %3360 = vmatprep.subr.bf16.mxu0 %v7045_v5  ;;  %v7715_v5 = vld [vmem:[%s8217_s26 + $0x1a8] sm:$0xff]  }
 0x692   : > { %v3127_v20 = vpop.f32.mrf.mxu0 }
 0x693   : > { %v3128_v54 = vadd.f32 %v7034_v41, %v3127_v20  ;;  %v7042_v20 = vcombine.low %v3182_v15, %v3184_v1  ;;  %v7060_v15 = vcombine.low %v3465_v57, %v3467_v28  ;;  %v7704_v1 = vld [vmem:[%s8217_s26 + $0x178] sm:$0xff]  }
 0x694   : > { %v7632_v9 = vpop.f32.mrf.mxu0 }
 0x695   : > { %v3134_v11 = vadd.f32 %v7872_v19, %v3128_v54  ;;  %v7044_v54 = vcombine.low %v3183_v2, %v3185_v44  ;;  %v7073_v9 = vcombine.high %v3477_v13, %v3479_v21  ;;  %v7075_v19 = vcombine.high %v3478_v12, %v3480_v4  ;;  %3318 = vmatpush1.bf16.msra.mxu1 %v7042_v20  ;;  %v7705_v2 = vld [vmem:[%s8217_s26 + $0x1f8] sm:$0xff]   ;;  %v7708_v13 = vld [vmem:[%s8217_s26 + $0x170] sm:$0xff]   ;;  %v7717_v20 = vld [vmem:[%s8217_s26 + $0x1e0] sm:$0xff]  }
 0x696   : > { %v3130_v10 = vpop.f32.mrf.mxu0  ;;  %v7706_v44 = vld [vmem:[%s8217_s26 + $0x138] sm:$0xff]   ;;  %v7709_v21 = vld [vmem:[%s8217_s26 + $0x1f0] sm:$0xff]  }
 0x697   : > { %v3131_v23 = vadd.f32 %v7034_v41, %v3130_v10  ;;  %v3138_v24 = vsel %vm944_vm1, %v3134_v11, 0.0  ;;  %v7074_v41 = vcombine.low %v3478_v12, %v3480_v4  ;;  %3361 = vmatpush1.bf16.msra.mxu0 %v7044_v54  ;;  %3591 = vmatprep.subr.bf16.mxu1 %v7073_v9  ;;  %v7710_v12 = vld [vmem:[%s8217_s26 + $0x130] sm:$0xff]   ;;  %v7714_v4 = vld [vmem:[%s8217_s26 + $0x128] sm:$0xff]   ;;  %v7718_v54 = vld [vmem:[%s8217_s26 + $0x120] sm:$0xff]  }
 0x698   : > { %3139 = vadd.xlane.f32.xlu1 %v3138_v24  ;;  %v7633_v27 = vpop.f32.mrf.mxu0  ;;  %3634 = vmatprep.subr.bf16.mxu0 %v7075_v19  ;;  %v7719_v9 = vld [vmem:[%s8217_s26 + $0x1a0] sm:$0xff]   ;;  %v7720_v19 = vld [vmem:[%s8217_s26 + $0x158] sm:$0xff]  }
 0x699   : > { %v3135_v29 = vadd.f32 %v7873_v22, %v3131_v23 }
 0x69b   : > { %v3141_v62 = vsel %vm944_vm1, %v3135_v29, 0.0 }
 0x69c   : > { %3142 = vadd.xlane.f32.xlu0 %v3141_v62 }
 0x721   : > { %v3140_v14 = vpop.xlane.xlu1 %3139 }
 0x722   : > { %v3145_v61 = vmul.f32 0.015625, %v3140_v14  ;;  %v7040_v14 = vld [vmem:[%s840_s0] ss:$0 sm:$0xff] }
 0x724   : > { %v8674_v32 = vsub.f32 %v3134_v11, %v3145_v61 }
 0x725   : > { %v3143_v35 = vpop.xlane.xlu0 %3142 }
 0x726   : > { %v3146_v7 = vmul.f32 0.015625, %v3143_v35  ;;  %v3149_v8 = vmul.f32 %v8674_v32, %v8674_v32 }
 0x728   : > { %v8678_v34 = vsub.f32 %v3135_v29, %v3146_v7  ;;  %v3151_v38 = vsel %vm944_vm1, %v3149_v8, 0.0  ;;  %v7041_v8 = vld [vmem:[%s9357_s1] ss:$0 sm:$0xff] }
 0x729   : > { %3152 = vadd.xlane.f32.xlu0 %v3151_v38 }
 0x72a   : > { %v3150_v39 = vmul.f32 %v8678_v34, %v8678_v34 }
 0x72c   : > { %v3154_v42 = vsel %vm944_vm1, %v3150_v39, 0.0  ;;  %v3475_v39 = vld [vmem:[%s8205_s14 + $0x150] sm:$0xff] }
 0x72d   : > { %3155 = vadd.xlane.f32.xlu1 %v3154_v42  ;;  %v3474_v42 = vld [vmem:[%s8205_s14 + $0x118] sm:$0xff] }
 0x72e   : > { %v7070_v40 = vcombine.low %v3474_v42, %v3476_v50 }
 0x7b2   : > { %v3153_v11 = vpop.xlane.xlu0 %3152 }
 0x7b3   : > { %v3157_v10 = vmul.f32 0.015625, %v3153_v11  ;;  %v7721_v11 = vld [vmem:[%s8217_s26 + $0x1d8] sm:$0xff]  }
 0x7b5   : > { %v3159_v23 = vadd.f32 1e-05, %v3157_v10  ;;  %v7722_v10 = vld [vmem:[%s8217_s26 + $0x118] sm:$0xff]  }
 0x7b6   : > { %v3156_v24 = vpop.xlane.xlu1 %3155 }
 0x7b7   : > { %7864 = vrsqrt.f32 %v3159_v23  ;;  %v3158_v27 = vmul.f32 0.015625, %v3156_v24  ;;  %v7723_v23 = vld [vmem:[%s8217_s26 + $0x198] sm:$0xff]   ;;  %v7724_v24 = vld [vmem:[%s8217_s26 + $0x150] sm:$0xff]  }
 0x7b9   : > { %v3160_v22 = vadd.f32 1e-05, %v3158_v27  ;;  %v7725_v27 = vld [vmem:[%s8217_s26 + $0x1d0] sm:$0xff]  }
 0x7bb   : > { %7866 = vrsqrt.f32 %v3160_v22  ;;  %v7726_v22 = vld [vmem:[%s8217_s26 + $0x110] sm:$0xff]  }
 0x7c4   : > { %v7865_v29 = vpop.eup %7864 }
 0x7c5   : > { %v3163_v62 = vmul.f32 %v7865_v29, %v8674_v32  ;;  %v3473_v32 = vld [vmem:[%s8205_s14 + $0x110] sm:$0xff] }
 0x7c6   : > { %v7069_v47 = vcombine.high %v3473_v32, %v3475_v39  ;;  %v7068_v52 = vcombine.low %v3473_v32, %v3475_v39  ;;  %v7727_v29 = vld [vmem:[%s8217_s26 + $0x190] sm:$0xff]   ;;  %v7735_v32 = vld [vmem:[%s8217_s26 + $0x180] sm:$0xff]   ;;  %v7736_v39 = vld [vmem:[%s8217_s26 + $0x78] sm:$0xff]  }
 0x7c7   : > { %v3171_v35 = vmul.f32 %v7040_v14, %v3163_v62  ;;  %v7728_v62 = vld [vmem:[%s8217_s26 + $0x148] sm:$0xff]  }
 0x7c8   : > { %v7867_v61 = vpop.eup %7866 }
 0x7c9   : > { %v3164_v7 = vmul.f32 %v7867_v61, %v8678_v34  ;;  %v8720_v25 = vadd.f32 %v7041_v8, %v3171_v35  ;;  %v7071_v34 = vcombine.high %v3474_v42, %v3476_v50  ;;  %v7730_v61 = vld [vmem:[%s8217_s26 + $0x108] sm:$0xff]   ;;  %v7737_v42 = vld [vmem:[%s8217_s26 + $0xf8] sm:$0xff]  }
 0x7ca   : > { %v7731_v35 = vld [vmem:[%s8217_s26 + $0x188] sm:$0xff]  }
 0x7cb   : > { %v3172_v38 = vmul.f32 %v7040_v14, %v3164_v7  ;;  %v7729_v14 = vld [vmem:[%s8217_s26 + $0x1c8] sm:$0xff]   ;;  %v7732_v7 = vld [vmem:[%s8217_s26 + $0x140] sm:$0xff]  }
 0x7cd   : > { %v8722_v43 = vadd.f32 %v7041_v8, %v3172_v38  ;;  %v7733_v8 = vld [vmem:[%s8217_s26 + $0x1c0] sm:$0xff]  }
 0x7ce   : > { %v7734_v38 = vld [vmem:[%s8217_s26 + $0x100] sm:$0xff]  }
 0x7cf   : > { %v8726_v16 = vpack.c.bf16 %v8722_v43, %v8720_v25 }
 0x7d1   : > { %7058 = vmatmul.mubr.msk.bf16.vlgmr.msra.gmra.mxu1 %vm944_vm1, %v8726_v16  ;;  %7059 = vmatmul.mubr.msk.bf16.vlgmr.msra.gmra.mxu0 %vm944_vm1, %v8726_v16 }
 0x7d2   : > { %3592 = vmatpush1.bf16.msra.mxu1 %v7072_v30  ;;  %3635 = vmatpush1.bf16.msra.mxu0 %v7074_v41  ;;  %v7713_v30 = vld [vmem:[%s8217_s26 + $0x1e8] sm:$0xff]   ;;  %v7716_v41 = vld [vmem:[%s8217_s26 + $0x160] sm:$0xff]  }
 0x7d3   : > { %3593 = vmatprep.subr.bf16.mxu1 %v7069_v47  ;;  %3636 = vmatprep.subr.bf16.mxu0 %v7071_v34 }
 0x7d4   : > { %3615 = vmatprep.mubr.bf16.mxu1 %v8016_v6  ;;  %3658 = vmatprep.mubr.bf16.mxu0 %v8016_v6 }
 0x7d6   : > { %3594 = vmatpush1.bf16.msra.mxu1 %v7068_v52  ;;  %3637 = vmatpush1.bf16.msra.mxu0 %v7070_v40  ;;  %v8789_v40 = vsub.s32 3, %v8248_v17 }
 0x7d7   : > { %3595 = vmatprep.subr.bf16.mxu1 %v7065_v55  ;;  %3638 = vmatprep.subr.bf16.mxu0 %v7067_v56  ;;  %v3481_v55 = vld [vmem:[%s8211_s18 + $0x4] sm:$0xf]  ;;  %v8793_v56 = vsub.s32 2, %v8248_v17 }
 0x7d8   : > { %v3490_v58 = vrot.slane %v3481_v55, %v8272_v33  ;;  %v3498_v26 = vrot.slane %v3481_v55, %v8789_v40 }
 0x7da   : > { %3596 = vmatpush1.bf16.msra.mxu1 %v7064_v59  ;;  %3639 = vmatpush1.bf16.msra.mxu0 %v7066_v31  ;;  %v3486_v59 = vrot.slane %v3481_v55, %v8251_v18  ;;  %v3494_v31 = vrot.slane %v3481_v55, %v8793_v56  ;;  %v7742_v55 = vld [vmem:[%s8217_s26 + $0x30] sm:$0xff]  }
 0x7db   : > { %3597 = vmatprep.subr.bf16.mxu1 %v7061_v60  ;;  %3640 = vmatprep.subr.bf16.mxu0 %v7063_v63 }
 0x7de   : > { %3598 = vmatpush1.bf16.msra.mxu1 %v7060_v15  ;;  %3641 = vmatpush1.bf16.msra.mxu0 %v7062_v0  ;;  %v8800_v15 = vld [vmem:[%s8211_s18] sm:$0xf] }
 0x7df   : > { %7350 = vmatprep.subr.bf16.mxu1 %v7704_v1  ;;  %7372 = vmatprep.subr.bf16.mxu0 %v7705_v2  ;;  %v3207_v0 = vrot.slane %v8800_v15, %v8272_v33  ;;  %v3215_v17 = vrot.slane %v8800_v15, %v8789_v40 }
 0x7e1   : > { %7076 = vmatmul.mubr.msk.bf16.vlgmr.msra.gmra.mxu1 %vm944_vm1, %v8726_v16  ;;  %7077 = vmatmul.mubr.msk.bf16.vlgmr.msra.gmra.mxu0 %vm944_vm1, %v8726_v16 }
 0x7e2   : > { %7351 = vmatpush3.bf16.msra.mxu1 %v7706_v44  ;;  %7373 = vmatpush3.bf16.msra.mxu0 %v7707_v36 }
 0x7e3   : > { %7352 = vmatprep.subr.bf16.mxu1 %v7708_v13  ;;  %7374 = vmatprep.subr.bf16.mxu0 %v7709_v21 }
 0x7e6   : > { %7353 = vmatpush3.bf16.msra.mxu1 %v7710_v12  ;;  %7375 = vmatpush3.bf16.msra.mxu0 %v7711_v45 }
 0x7e7   : > { %7354 = vmatprep.subr.bf16.mxu1 %v7712_v3  ;;  %7376 = vmatprep.subr.bf16.mxu0 %v7713_v30 }
 0x7ea   : > { %7355 = vmatpush3.bf16.msra.mxu1 %v7714_v4  ;;  %7377 = vmatpush3.bf16.msra.mxu0 %v7715_v5 }
 0x7eb   : > { %7356 = vmatprep.subr.bf16.mxu1 %v7716_v41  ;;  %7378 = vmatprep.subr.bf16.mxu0 %v7717_v20 }
 0x7ee   : > { %7357 = vmatpush3.bf16.msra.mxu1 %v7718_v54  ;;  %7379 = vmatpush3.bf16.msra.mxu0 %v7719_v9 }
 0x7ef   : > { %7358 = vmatprep.subr.bf16.mxu1 %v7720_v19  ;;  %7380 = vmatprep.subr.bf16.mxu0 %v7721_v11 }
 0x7f2   : > { %7359 = vmatpush3.bf16.msra.mxu1 %v7722_v10  ;;  %7381 = vmatpush3.bf16.msra.mxu0 %v7723_v23 }
 0x7f3   : > { %7360 = vmatprep.subr.bf16.mxu1 %v7724_v24  ;;  %7382 = vmatprep.subr.bf16.mxu0 %v7725_v27 }
 0x7f6   : > { %7361 = vmatpush3.bf16.msra.mxu1 %v7726_v22  ;;  %7383 = vmatpush3.bf16.msra.mxu0 %v7727_v29 }
 0x7f7   : > { %7362 = vmatprep.subr.bf16.mxu1 %v7728_v62  ;;  %7384 = vmatprep.subr.bf16.mxu0 %v7729_v14 }
 0x7fa   : > { %7363 = vmatpush3.bf16.msra.mxu1 %v7730_v61  ;;  %7385 = vmatpush3.bf16.msra.mxu0 %v7731_v35 }
 0x7fb   : > { %7364 = vmatprep.subr.bf16.mxu1 %v7732_v7  ;;  %7386 = vmatprep.subr.bf16.mxu0 %v7733_v8  ;;  %v7738_v7 = vld [vmem:[%s8217_s26 + $0x38] sm:$0xff]  }
 0x7fc   : > { %v7739_v8 = vld [vmem:[%s8217_s26 + $0xb8] sm:$0xff]  }
 0x7fe   : > { %7365 = vmatpush3.bf16.msra.mxu1 %v7734_v38  ;;  %7387 = vmatpush3.bf16.msra.mxu0 %v7735_v32 }
 0x7ff   : > { %7394 = vmatprep.subr.bf16.mxu1 %v7736_v39  ;;  %7416 = vmatprep.subr.bf16.mxu0 %v7737_v42 }
 0x891   : > { %v8780_v50 = vpop.f32.mrf.mxu1  ;;  %v8782_v47 = vpop.f32.mrf.mxu0 }
 0x893   : > { %v3339_v34 = vpop.f32.mrf.mxu1  ;;  %v3382_v37 = vpop.f32.mrf.mxu0 }
 0x894   : > { %v3340_v54 = vadd.f32 %v3339_v34, %v3207_v0  ;;  %v3383_v9 = vadd.f32 %v3382_v37, %v3215_v17  ;;  %v7740_v34 = vld [vmem:[%s8217_s26 + $0x70] sm:$0xff]  }
 0x895   : > { %v8784_v48 = vpop.f32.mrf.mxu1  ;;  %v8786_v49 = vpop.f32.mrf.mxu0  ;;  %v7741_v37 = vld [vmem:[%s8217_s26 + $0xf0] sm:$0xff]  }
 0x896   : > { %v3390_v38 = vmax.f32 %v3340_v54, 0.0  ;;  %v3392_v32 = vmax.f32 %v3383_v9, 0.0  ;;  %v7764_v9 = vld [vmem:[%s8217_s26 + $0x40] sm:$0xff]  }
 0x897   : > { %v3343_v51 = vpop.f32.mrf.mxu1  ;;  %v3386_v52 = vpop.f32.mrf.mxu0 }
 0x898   : > { %v3344_v12 = vadd.f32 %v3343_v51, %v3207_v0  ;;  %v3387_v45 = vadd.f32 %v3386_v52, %v3215_v17  ;;  %v7751_v0 = vld [vmem:[%s8217_s26 + $0xa0] sm:$0xff]   ;;  %v7752_v17 = vld [vmem:[%s8217_s26 + $0x58] sm:$0xff]  }
 0x89a   : > { %v3394_v22 = vmax.f32 %v3344_v12, 0.0  ;;  %v3396_v29 = vmax.f32 %v3387_v45, 0.0  ;;  %v7759_v12 = vld [vmem:[%s8217_s26 + $0x90] sm:$0xff]   ;;  %v7760_v45 = vld [vmem:[%s8217_s26 + $0x48] sm:$0xff]  }
 0x89c   : > { %v3462_v51 = vpack.c.bf16 %v3394_v22, %v3390_v38  ;;  %v3464_v52 = vpack.c.bf16 %v3396_v29, %v3392_v32 }
 0x8a1   : > { %v3617_v57 = vpop.f32.mrf.mxu1  ;;  %v3660_v28 = vpop.f32.mrf.mxu0 }
 0x8a2   : > { %v3618_v3 = vadd.f32 %v3617_v57, %v3486_v59  ;;  %v3661_v30 = vadd.f32 %v3660_v28, %v3494_v31  ;;  %v7743_v57 = vld [vmem:[%s8217_s26 + $0xb0] sm:$0xff]   ;;  %v7744_v28 = vld [vmem:[%s8217_s26 + $0x68] sm:$0xff]  }
 0x8a3   : > { %v3619_v60 = vpop.f32.mrf.mxu1  ;;  %v3662_v63 = vpop.f32.mrf.mxu0 }
 0x8a4   : > { %v3620_v44 = vadd.f32 %v3619_v60, %v3490_v58  ;;  %v3663_v36 = vadd.f32 %v3662_v63, %v3498_v26  ;;  %v3669_v62 = vmax.f32 %v3618_v3, 0.0  ;;  %v3671_v14 = vmax.f32 %v3661_v30, 0.0  ;;  %v7749_v60 = vld [vmem:[%s8217_s26 + $0xe0] sm:$0xff]   ;;  %v7761_v3 = vld [vmem:[%s8217_s26 + $0xc8] sm:$0xff]  }
 0x8a5   : > { %v3621_v1 = vpop.f32.mrf.mxu1  ;;  %v3664_v2 = vpop.f32.mrf.mxu0  ;;  %v7750_v63 = vld [vmem:[%s8217_s26 + $0x20] sm:$0xff]   ;;  %v3203_v30 = vrot.slane %v8800_v15, %v8251_v18 }
 0x8a6   : > { %v3622_v13 = vadd.f32 %v3621_v1, %v3486_v59  ;;  %v3665_v21 = vadd.f32 %v3664_v2, %v3494_v31  ;;  %v3670_v10 = vmax.f32 %v3620_v44, 0.0  ;;  %v3672_v23 = vmax.f32 %v3663_v36, 0.0  ;;  %v7747_v59 = vld [vmem:[%s8217_s26 + $0xa8] sm:$0xff]   ;;  %v7748_v31 = vld [vmem:[%s8217_s26 + $0x60] sm:$0xff]   ;;  %v7753_v1 = vld [vmem:[%s8217_s26 + $0xd8] sm:$0xff]  }
 0x8a7   : > { %v3623_v4 = vpop.f32.mrf.mxu1  ;;  %v3666_v5 = vpop.f32.mrf.mxu0  ;;  %v7754_v2 = vld [vmem:[%s8217_s26 + $0x18] sm:$0xff]   ;;  %v7756_v36 = vld [vmem:[%s8217_s26 + $0x50] sm:$0xff]  }
 0x8a8   : > { %v3624_v41 = vadd.f32 %v3623_v4, %v3490_v58  ;;  %v3667_v20 = vadd.f32 %v3666_v5, %v3498_v26  ;;  %v3673_v19 = vmax.f32 %v3622_v13, 0.0  ;;  %v3675_v11 = vmax.f32 %v3665_v21, 0.0  ;;  %v7745_v58 = vld [vmem:[%s8217_s26 + $0xe8] sm:$0xff]   ;;  %v7755_v44 = vld [vmem:[%s8217_s26 + $0x98] sm:$0xff]   ;;  %v7757_v13 = vld [vmem:[%s8217_s26 + $0xd0] sm:$0xff]  }
 0x8a9   : > { %v7746_v26 = vld [vmem:[%s8217_s26 + $0x28] sm:$0xff]   ;;  %v7758_v21 = vld [vmem:[%s8217_s26 + $0x10] sm:$0xff]   ;;  %v3211_v4 = vrot.slane %v8800_v15, %v8793_v56 }
 0x8aa   : > { %v3674_v24 = vmax.f32 %v3624_v41, 0.0  ;;  %v3676_v27 = vmax.f32 %v3667_v20, 0.0  ;;  %v3741_v39 = vpack.c.bf16 %v3673_v19, %v3669_v62  ;;  %v3743_v42 = vpack.c.bf16 %v3675_v11, %v3671_v14  ;;  %v7762_v5 = vld [vmem:[%s8217_s26 + $0x8] sm:$0xff]   ;;  %v7765_v19 = vld [vmem:[%s8217_s26 + $0xc0] sm:$0xff]  }
 0x8ab   : > { %v7763_v41 = vld [vmem:[%s8217_s26 + $0x88] sm:$0xff]   ;;  %v3342_v20 = vadd.f32 %v8784_v48, %v3203_v30  ;;  %v3385_v54 = vadd.f32 %v8786_v49, %v3211_v4  ;;  %v4305_v11 = vld [vmem:[%s8205_s14 + $0x1a0] sm:$0xff] }
 0x8ac   : > { %v3742_v61 = vpack.c.bf16 %v3674_v24, %v3670_v10  ;;  %v3744_v35 = vpack.c.bf16 %v3676_v27, %v3672_v23  ;;  %v4307_v10 = vld [vmem:[%s8205_s14 + $0x1e0] sm:$0xff]  ;;  %v4306_v23 = vld [vmem:[%s8205_s14 + $0x1a8] sm:$0xff]  ;;  %v3338_v24 = vadd.f32 %v8780_v50, %v3203_v30  ;;  %v3381_v27 = vadd.f32 %v8782_v47, %v3211_v4  ;;  %v7772_v30 = vld [vmem:[%s8217_s26 + $0x270] sm:$0xff]  }
 0x8ad   : > { %v4308_v15 = vld [vmem:[%s8205_s14 + $0x1e8] sm:$0xff]  ;;  %v7766_v48 = vld [vmem:[%s8217_s26] sm:$0xff]   ;;  %v3393_v22 = vmax.f32 %v3342_v20, 0.0  ;;  %v3395_v29 = vmax.f32 %v3385_v54, 0.0  ;;  %v7155_v62 = vcombine.high %v4305_v11, %v4307_v10  ;;  %v7154_v38 = vcombine.low %v4305_v11, %v4307_v10  ;;  %v7773_v4 = vld [vmem:[%s8217_s26 + $0x2f0] sm:$0xff]  }
 0x8ae   : > { %3969 = vmatprep.mubr.bf16.mxu1 %v3742_v61  ;;  %4010 = vmatprep.mubr.bf16.mxu0 %v3744_v35  ;;  %v7767_v49 = vld [vmem:[%s8217_s26 + $0x80] sm:$0xff]   ;;  %v7157_v14 = vcombine.high %v4306_v23, %v4308_v15  ;;  %v3389_v50 = vmax.f32 %v3338_v24, 0.0  ;;  %v3391_v47 = vmax.f32 %v3381_v27, 0.0  ;;  %v7156_v32 = vcombine.low %v4306_v23, %v4308_v15  ;;  %v7776_v20 = vld [vmem:[%s8217_s26 + $0x268] sm:$0xff]   ;;  %v7784_v24 = vld [vmem:[%s8217_s26 + $0x258] sm:$0xff]  }
 0x8af   : > { %3970 = vmatmul.mubr.bf16.vlgmr.msra.gmra.mxu1 %v3741_v39  ;;  %4011 = vmatmul.mubr.bf16.vlgmr.msra.gmra.mxu0 %v3743_v42  ;;  %v4301_v61 = vld [vmem:[%s8205_s14 + $0x120] sm:$0xff]  ;;  %v7777_v54 = vld [vmem:[%s8217_s26 + $0x2e8] sm:$0xff]   ;;  %v7785_v27 = vld [vmem:[%s8217_s26 + $0x2d8] sm:$0xff]  }
 0x8b0   : > { %7395 = vmatpush3.bf16.msra.mxu1 %v7738_v7  ;;  %7417 = vmatpush3.bf16.msra.mxu0 %v7739_v8  ;;  %v4303_v35 = vld [vmem:[%s8205_s14 + $0x160] sm:$0xff]  ;;  %v4302_v7 = vld [vmem:[%s8205_s14 + $0x128] sm:$0xff]  ;;  %v3461_v42 = vpack.c.bf16 %v3393_v22, %v3389_v50  ;;  %v7788_v22 = vld [vmem:[%s8217_s26 + $0x250] sm:$0xff]  }
 0x8b1   : > { %4243 = vmatprep.mubr.bf16.mxu1 %v3462_v51  ;;  %4284 = vmatprep.mubr.bf16.mxu0 %v3464_v52  ;;  %v4304_v8 = vld [vmem:[%s8205_s14 + $0x168] sm:$0xff]  ;;  %v7151_v39 = vcombine.high %v4301_v61, %v4303_v35  ;;  %v4297_v51 = vld [vmem:[%s8205_s14 + $0xa0] sm:$0xff] }
 0x8b2   : > { %7396 = vmatprep.subr.bf16.mxu1 %v7740_v34  ;;  %7418 = vmatprep.subr.bf16.mxu0 %v7741_v37  ;;  %v3463_v34 = vpack.c.bf16 %v3395_v29, %v3391_v47  ;;  %v7153_v37 = vcombine.high %v4302_v7, %v4304_v8  ;;  %v4299_v52 = vld [vmem:[%s8205_s14 + $0xe0] sm:$0xff]  ;;  %v7789_v29 = vld [vmem:[%s8217_s26 + $0x2d0] sm:$0xff]  }
 0x8b3   : > { %v7780_v11 = vld [vmem:[%s8217_s26 + $0x260] sm:$0xff]  }
 0x8b4   : > { %7397 = vmatpush3.bf16.msra.mxu1 %v7742_v55  ;;  %7419 = vmatpush3.bf16.msra.mxu0 %v7743_v57  ;;  %v4298_v55 = vld [vmem:[%s8205_s14 + $0xa8] sm:$0xff]  ;;  %v7781_v10 = vld [vmem:[%s8217_s26 + $0x2e0] sm:$0xff]  }
 0x8b5   : > { %7398 = vmatprep.subr.bf16.mxu1 %v7744_v28  ;;  %7420 = vmatprep.subr.bf16.mxu0 %v7745_v58  ;;  %v4300_v57 = vld [vmem:[%s8205_s14 + $0xe8] sm:$0xff]  ;;  %v7150_v28 = vcombine.low %v4301_v61, %v4303_v35  ;;  %v7152_v58 = vcombine.low %v4302_v7, %v4304_v8  ;;  %v7782_v23 = vld [vmem:[%s8217_s26 + $0x220] sm:$0xff]  }
 0x8b6   : > { %v7783_v15 = vld [vmem:[%s8217_s26 + $0x2a0] sm:$0xff]   ;;  %v7792_v61 = vld [vmem:[%s8217_s26 + $0x248] sm:$0xff]  }
 0x8b7   : > { %v7793_v35 = vld [vmem:[%s8217_s26 + $0x2c8] sm:$0xff]   ;;  %v7796_v50 = vld [vmem:[%s8217_s26 + $0x240] sm:$0xff]  }
 0x8b8   : > { %7399 = vmatpush3.bf16.msra.mxu1 %v7746_v26  ;;  %7421 = vmatpush3.bf16.msra.mxu0 %v7747_v59  ;;  %v7147_v26 = vcombine.high %v4297_v51, %v4299_v52  ;;  %v7149_v59 = vcombine.high %v4298_v55, %v4300_v57  ;;  %v7794_v7 = vld [vmem:[%s8217_s26 + $0x208] sm:$0xff]   ;;  %v7797_v47 = vld [vmem:[%s8217_s26 + $0x2c0] sm:$0xff]  }
 0x8b9   : > { %7400 = vmatprep.subr.bf16.mxu1 %v7748_v31  ;;  %7422 = vmatprep.subr.bf16.mxu0 %v7749_v60  ;;  %v4293_v31 = vld [vmem:[%s8205_s14 + $0x20] sm:$0xff]  ;;  %v7795_v8 = vld [vmem:[%s8217_s26 + $0x288] sm:$0xff]  }
 0x8ba   : > { %v4295_v60 = vld [vmem:[%s8205_s14 + $0x60] sm:$0xff] }
 0x8bc   : > { %7401 = vmatpush3.bf16.msra.mxu1 %v7750_v63  ;;  %7423 = vmatpush3.bf16.msra.mxu0 %v7751_v0  ;;  %v4294_v63 = vld [vmem:[%s8205_s14 + $0x28] sm:$0xff] }
 0x8bd   : > { %7402 = vmatprep.subr.bf16.mxu1 %v7752_v17  ;;  %7424 = vmatprep.subr.bf16.mxu0 %v7753_v1  ;;  %v4296_v0 = vld [vmem:[%s8205_s14 + $0x68] sm:$0xff]  ;;  %v7146_v17 = vcombine.low %v4297_v51, %v4299_v52  ;;  %v7148_v1 = vcombine.low %v4298_v55, %v4300_v57  ;;  %v8912_v52 = vld [vmem:[%s8205_s14 + $0x1f8] sm:$0xff] }
 0x8c0   : > { %7403 = vmatpush3.bf16.msra.mxu1 %v7754_v2  ;;  %7425 = vmatpush3.bf16.msra.mxu0 %v7755_v44  ;;  %v7143_v2 = vcombine.high %v4293_v31, %v4295_v60  ;;  %v7145_v44 = vcombine.high %v4294_v63, %v4296_v0 }
 0x8c1   : > { %7404 = vmatprep.subr.bf16.mxu1 %v7756_v36  ;;  %7426 = vmatprep.subr.bf16.mxu0 %v7757_v13  ;;  %v7142_v36 = vcombine.low %v4293_v31, %v4295_v60  ;;  %v7144_v13 = vcombine.low %v4294_v63, %v4296_v0 }
 0x8c4   : > { %7405 = vmatpush3.bf16.msra.mxu1 %v7758_v21  ;;  %7427 = vmatpush3.bf16.msra.mxu0 %v7759_v12  ;;  %v7768_v21 = vld [vmem:[%s8217_s26 + $0x278] sm:$0xff]  }
 0x8c5   : > { %7406 = vmatprep.subr.bf16.mxu1 %v7760_v45  ;;  %7428 = vmatprep.subr.bf16.mxu0 %v7761_v3  ;;  %v7769_v12 = vld [vmem:[%s8217_s26 + $0x2f8] sm:$0xff]  }
 0x8c6   : > { %v7770_v45 = vld [vmem:[%s8217_s26 + $0x238] sm:$0xff]  }
 0x8c7   : > { %v7771_v3 = vld [vmem:[%s8217_s26 + $0x2b8] sm:$0xff]  }
 0x8c8   : > { %7407 = vmatpush3.bf16.msra.mxu1 %v7762_v5  ;;  %7429 = vmatpush3.bf16.msra.mxu0 %v7763_v41  ;;  %v7774_v5 = vld [vmem:[%s8217_s26 + $0x230] sm:$0xff]  }
 0x8c9   : > { %7408 = vmatprep.subr.bf16.mxu1 %v7764_v9  ;;  %7430 = vmatprep.subr.bf16.mxu0 %v7765_v19  ;;  %v7775_v41 = vld [vmem:[%s8217_s26 + $0x2b0] sm:$0xff]   ;;  %v7778_v9 = vld [vmem:[%s8217_s26 + $0x228] sm:$0xff]  }
 0x8ca   : > { %v7779_v19 = vld [vmem:[%s8217_s26 + $0x2a8] sm:$0xff]  }
 0x8cc   : > { %7409 = vmatpush3.bf16.msra.mxu1 %v7766_v48  ;;  %7431 = vmatpush3.bf16.msra.mxu0 %v7767_v49  ;;  %v7786_v48 = vld [vmem:[%s8217_s26 + $0x218] sm:$0xff]  }
 0x8cd   : > { %4419 = vmatprep.subr.bf16.mxu1 %v7155_v62  ;;  %4462 = vmatprep.subr.bf16.mxu0 %v7157_v14  ;;  %v7787_v49 = vld [vmem:[%s8217_s26 + $0x298] sm:$0xff]   ;;  %v7790_v62 = vld [vmem:[%s8217_s26 + $0x210] sm:$0xff]  }
 0x8ce   : > { %v7791_v14 = vld [vmem:[%s8217_s26 + $0x290] sm:$0xff]  }
 0x8cf   : > { %4244 = vmatmul.mubr.bf16.vlgmr.msra.gmra.mxu1 %v3461_v42  ;;  %4285 = vmatmul.mubr.bf16.vlgmr.msra.gmra.mxu0 %v3463_v34  ;;  %v8902_v42 = vld [vmem:[%s8205_s14 + $0x1f0] sm:$0xff]  ;;  %v8905_v34 = vld [vmem:[%s8205_s14 + $0x1b8] sm:$0xff] }
 0x8d0   : > { %4420 = vmatpush1.bf16.msra.mxu1 %v7154_v38  ;;  %4463 = vmatpush1.bf16.msra.mxu0 %v7156_v32  ;;  %v7798_v38 = vld [vmem:[%s8217_s26 + $0x200] sm:$0xff]   ;;  %v7206_v55 = vcombine.low %v8905_v34, %v8912_v52  ;;  %v7207_v57 = vcombine.high %v8905_v34, %v8912_v52 }
 0x8d1   : > { %4421 = vmatprep.subr.bf16.mxu1 %v7151_v39  ;;  %4464 = vmatprep.subr.bf16.mxu0 %v7153_v37  ;;  %v7799_v32 = vld [vmem:[%s8217_s26 + $0x280] sm:$0xff]   ;;  %v8899_v39 = vld [vmem:[%s8205_s14 + $0x1b0] sm:$0xff] }
 0x8d2   : > { %4443 = vmatprep.mubr.bf16.mxu1 %v8016_v6  ;;  %4486 = vmatprep.mubr.bf16.mxu0 %v8016_v6  ;;  %v7204_v37 = vcombine.low %v8899_v39, %v8902_v42  ;;  %v7205_v51 = vcombine.high %v8899_v39, %v8902_v42 }
 0x8d4   : > { %4422 = vmatpush1.bf16.msra.mxu1 %v7150_v28  ;;  %4465 = vmatpush1.bf16.msra.mxu0 %v7152_v58 }
 0x8d5   : > { %4423 = vmatprep.subr.bf16.mxu1 %v7147_v26  ;;  %4466 = vmatprep.subr.bf16.mxu0 %v7149_v59 }
 0x8d8   : > { %4424 = vmatpush1.bf16.msra.mxu1 %v7146_v17  ;;  %4467 = vmatpush1.bf16.msra.mxu0 %v7148_v1 }
 0x8d9   : > { %4425 = vmatprep.subr.bf16.mxu1 %v7143_v2  ;;  %4468 = vmatprep.subr.bf16.mxu0 %v7145_v44 }
 0x8dc   : > { %4426 = vmatpush1.bf16.msra.mxu1 %v7142_v36  ;;  %4469 = vmatpush1.bf16.msra.mxu0 %v7144_v13 }
 0x8dd   : > { %7438 = vmatprep.subr.bf16.mxu1 %v7768_v21  ;;  %7460 = vmatprep.subr.bf16.mxu0 %v7769_v12 }
 0x8df   : > { %7158 = vmatmul.mubr.msk.bf16.vlgmr.msra.gmra.mxu1 %vm944_vm1, %v8726_v16  ;;  %7159 = vmatmul.mubr.msk.bf16.vlgmr.msra.gmra.mxu0 %vm944_vm1, %v8726_v16 }
 0x8e0   : > { %7439 = vmatpush3.bf16.msra.mxu1 %v7770_v45  ;;  %7461 = vmatpush3.bf16.msra.mxu0 %v7771_v3 }
 0x8e1   : > { %7440 = vmatprep.subr.bf16.mxu1 %v7772_v30  ;;  %7462 = vmatprep.subr.bf16.mxu0 %v7773_v4 }
 0x8e4   : > { %7441 = vmatpush3.bf16.msra.mxu1 %v7774_v5  ;;  %7463 = vmatpush3.bf16.msra.mxu0 %v7775_v41 }
 0x8e5   : > { %7442 = vmatprep.subr.bf16.mxu1 %v7776_v20  ;;  %7464 = vmatprep.subr.bf16.mxu0 %v7777_v54 }
 0x8e8   : > { %7443 = vmatpush3.bf16.msra.mxu1 %v7778_v9  ;;  %7465 = vmatpush3.bf16.msra.mxu0 %v7779_v19 }
 0x8e9   : > { %7444 = vmatprep.subr.bf16.mxu1 %v7780_v11  ;;  %7466 = vmatprep.subr.bf16.mxu0 %v7781_v10 }
 0x8ec   : > { %7445 = vmatpush3.bf16.msra.mxu1 %v7782_v23  ;;  %7467 = vmatpush3.bf16.msra.mxu0 %v7783_v15 }
 0x8ed   : > { %7446 = vmatprep.subr.bf16.mxu1 %v7784_v24  ;;  %7468 = vmatprep.subr.bf16.mxu0 %v7785_v27  ;;  %v4309_v24 = vld [vmem:[%s8211_s18 + $0x8] sm:$0xf] }
 0x8f0   : > { %7447 = vmatpush3.bf16.msra.mxu1 %v7786_v48  ;;  %7469 = vmatpush3.bf16.msra.mxu0 %v7787_v49  ;;  %v4318_v49 = vrot.slane %v4309_v24, %v8272_v33 }
 0x8f1   : > { %7448 = vmatprep.subr.bf16.mxu1 %v7788_v22  ;;  %7470 = vmatprep.subr.bf16.mxu0 %v7789_v29  ;;  %v4326_v22 = vrot.slane %v4309_v24, %v8789_v40  ;;  %v4314_v29 = vrot.slane %v4309_v24, %v8251_v18 }
 0x8f4   : > { %7449 = vmatpush3.bf16.msra.mxu1 %v7790_v62  ;;  %7471 = vmatpush3.bf16.msra.mxu0 %v7791_v14  ;;  %v4322_v62 = vrot.slane %v4309_v24, %v8793_v56 }
 0x8f5   : > { %7450 = vmatprep.subr.bf16.mxu1 %v7792_v61  ;;  %7472 = vmatprep.subr.bf16.mxu0 %v7793_v35 }
 0x8f8   : > { %7451 = vmatpush3.bf16.msra.mxu1 %v7794_v7  ;;  %7473 = vmatpush3.bf16.msra.mxu0 %v7795_v8 }
 0x8f9   : > { %7452 = vmatprep.subr.bf16.mxu1 %v7796_v50  ;;  %7474 = vmatprep.subr.bf16.mxu0 %v7797_v47 }
 0x8fc   : > { %7453 = vmatpush3.bf16.msra.mxu1 %v7798_v38  ;;  %7475 = vmatpush3.bf16.msra.mxu0 %v7799_v32 }
 0x8fd   : > { %4975 = vmatprep.subr.bf16.mxu1 %v7205_v51  ;;  %5018 = vmatprep.subr.bf16.mxu0 %v7207_v57 }
 0x96f   : > { %v7366_v28 = vpop.f32.mrf.mxu1  ;;  %v7388_v58 = vpop.f32.mrf.mxu0 }
 0x971   : > { %v7367_v26 = vpop.f32.mrf.mxu1  ;;  %v7389_v59 = vpop.f32.mrf.mxu0 }
 0x972   : > { %v7368_v31 = vadd.f32 %v7367_v26, %v7366_v28  ;;  %v7390_v60 = vadd.f32 %v7389_v59, %v7388_v58 }
 0x973   : > { %v7369_v63 = vpop.f32.mrf.mxu1  ;;  %v7391_v0 = vpop.f32.mrf.mxu0 }
 0x974   : > { %v4013_v17 = vadd.f32 %v7390_v60, %v7368_v31  ;;  %v4857_v60 = vld [vmem:[%s8205_s14 + $0x130] sm:$0xff] }
 0x975   : > { %v7370_v1 = vpop.f32.mrf.mxu1  ;;  %v7392_v2 = vpop.f32.mrf.mxu0 }
 0x976   : > { %v7371_v44 = vadd.f32 %v7370_v1, %v7369_v63  ;;  %v7393_v36 = vadd.f32 %v7392_v2, %v7391_v0  ;;  %v4859_v63 = vld [vmem:[%s8205_s14 + $0x170] sm:$0xff] }
 0x978   : > { %v4016_v13 = vadd.f32 %v7393_v36, %v7371_v44  ;;  %v4858_v44 = vld [vmem:[%s8205_s14 + $0x138] sm:$0xff] }
 0x979   : > { %v4860_v36 = vld [vmem:[%s8205_s14 + $0x178] sm:$0xff] }
 0x98f   : > { %v7410_v21 = vpop.f32.mrf.mxu1  ;;  %v7432_v12 = vpop.f32.mrf.mxu0 }
 0x991   : > { %v7411_v45 = vpop.f32.mrf.mxu1  ;;  %v7433_v3 = vpop.f32.mrf.mxu0 }
 0x992   : > { %v7412_v30 = vadd.f32 %v7411_v45, %v7410_v21  ;;  %v7434_v4 = vadd.f32 %v7433_v3, %v7432_v12 }
 0x993   : > { %v7413_v5 = vpop.f32.mrf.mxu1  ;;  %v7435_v41 = vpop.f32.mrf.mxu0 }
 0x994   : > { %v4246_v20 = vadd.f32 %v7412_v30, %v4013_v17 }
 0x995   : > { %v7414_v54 = vpop.f32.mrf.mxu1  ;;  %v7436_v9 = vpop.f32.mrf.mxu0 }
 0x996   : > { %v8918_v19 = vadd.f32 %v7434_v4, %v4246_v20  ;;  %v7415_v11 = vadd.f32 %v7414_v54, %v7413_v5  ;;  %v7437_v10 = vadd.f32 %v7436_v9, %v7435_v41  ;;  %v7201_v4 = vcombine.high %v4857_v60, %v4859_v63  ;;  %v4853_v41 = vld [vmem:[%s8205_s14 + $0xb0] sm:$0xff]  ;;  %v4854_v54 = vld [vmem:[%s8205_s14 + $0xb8] sm:$0xff] }
 0x997   : > { %v7203_v5 = vcombine.high %v4858_v44, %v4860_v36  ;;  %v4855_v20 = vld [vmem:[%s8205_s14 + $0xf0] sm:$0xff]  ;;  %v4856_v9 = vld [vmem:[%s8205_s14 + $0xf8] sm:$0xff] }
 0x998   : > { %v4249_v23 = vadd.f32 %v7415_v11, %v4016_v13  ;;  %v7200_v11 = vcombine.low %v4857_v60, %v4859_v63  ;;  %v7199_v24 = vcombine.high %v4854_v54, %v4856_v9  ;;  %v7196_v39 = vcombine.low %v4853_v41, %v4855_v20  ;;  %v7820_v60 = vld [vmem:[%s8217_s26 + $0x350] sm:$0xff]  }
 0x999   : > { %v7198_v42 = vcombine.low %v4854_v54, %v4856_v9  ;;  %v7821_v63 = vld [vmem:[%s8217_s26 + $0x3d0] sm:$0xff]  }
 0x99a   : > { %v8920_v15 = vadd.f32 %v7437_v10, %v4249_v23  ;;  %v7202_v10 = vcombine.low %v4858_v44, %v4860_v36  ;;  %v7197_v23 = vcombine.high %v4853_v41, %v4855_v20  ;;  %v7826_v44 = vld [vmem:[%s8217_s26 + $0x308] sm:$0xff]  }
 0x99b   : > { %v7827_v36 = vld [vmem:[%s8217_s26 + $0x388] sm:$0xff]  }
 0x99f   : > { %v4445_v27 = vpop.f32.mrf.mxu1  ;;  %v4488_v48 = vpop.f32.mrf.mxu0 }
 0x9a0   : > { %v4446_v32 = vadd.f32 %v4445_v27, %v4314_v29  ;;  %v4489_v51 = vadd.f32 %v4488_v48, %v4322_v62  ;;  %v4849_v27 = vld [vmem:[%s8205_s14 + $0x30] sm:$0xff] }
 0x9a1   : > { %v4447_v14 = vpop.f32.mrf.mxu1  ;;  %v4490_v61 = vpop.f32.mrf.mxu0  ;;  %v4851_v48 = vld [vmem:[%s8205_s14 + $0x70] sm:$0xff] }
 0x9a2   : > { %v4448_v8 = vadd.f32 %v4447_v14, %v4318_v49  ;;  %v4491_v50 = vadd.f32 %v4490_v61, %v4326_v22  ;;  %v4497_v13 = vmax.f32 %v4446_v32, 0.0  ;;  %v4499_v21 = vmax.f32 %v4489_v51, 0.0  ;;  %v7803_v14 = vld [vmem:[%s8217_s26 + $0x3b8] sm:$0xff]   ;;  %v7804_v61 = vld [vmem:[%s8217_s26 + $0x370] sm:$0xff]   ;;  %v7812_v32 = vld [vmem:[%s8217_s26 + $0x360] sm:$0xff]  }
 0x9a3   : > { %v4449_v35 = vpop.f32.mrf.mxu1  ;;  %v4492_v7 = vpop.f32.mrf.mxu0  ;;  %v7193_v34 = vcombine.high %v4849_v27, %v4851_v48  ;;  %v7192_v52 = vcombine.low %v4849_v27, %v4851_v48  ;;  %v7813_v51 = vld [vmem:[%s8217_s26 + $0x3e0] sm:$0xff]  }
 0x9a4   : > { %v4450_v47 = vadd.f32 %v4449_v35, %v4314_v29  ;;  %v4493_v38 = vadd.f32 %v4492_v7, %v4322_v62  ;;  %v4498_v0 = vmax.f32 %v4448_v8, 0.0  ;;  %v4500_v17 = vmax.f32 %v4491_v50, 0.0  ;;  %v7801_v29 = vld [vmem:[%s8217_s26 + $0x3f8] sm:$0xff]   ;;  %v7805_v35 = vld [vmem:[%s8217_s26 + $0x3f0] sm:$0xff]   ;;  %v7808_v50 = vld [vmem:[%s8217_s26 + $0x368] sm:$0xff]  }
 0x9a5   : > { %v4451_v57 = vpop.f32.mrf.mxu1  ;;  %v4494_v28 = vpop.f32.mrf.mxu0  ;;  %v7802_v62 = vld [vmem:[%s8217_s26 + $0x338] sm:$0xff]   ;;  %v7806_v7 = vld [vmem:[%s8217_s26 + $0x330] sm:$0xff]  }
 0x9a6   : > { %v4452_v58 = vadd.f32 %v4451_v57, %v4318_v49  ;;  %v4495_v26 = vadd.f32 %v4494_v28, %v4326_v22  ;;  %v4501_v59 = vmax.f32 %v4450_v47, 0.0  ;;  %v4503_v31 = vmax.f32 %v4493_v38, 0.0  ;;  %v4850_v49 = vld [vmem:[%s8205_s14 + $0x38] sm:$0xff]  ;;  %v7807_v8 = vld [vmem:[%s8217_s26 + $0x3b0] sm:$0xff]   ;;  %v7809_v47 = vld [vmem:[%s8217_s26 + $0x3e8] sm:$0xff]  }
 0x9a7   : > { %v4852_v22 = vld [vmem:[%s8205_s14 + $0x78] sm:$0xff]  ;;  %v7811_v38 = vld [vmem:[%s8217_s26 + $0x3a8] sm:$0xff]   ;;  %v7814_v57 = vld [vmem:[%s8217_s26 + $0x320] sm:$0xff]   ;;  %s9362_s14 = sld [smem:[#allocation20_spill]] (!%p7245_p6) }
 0x9a8   : > { %v4502_v1 = vmax.f32 %v4452_v58, 0.0  ;;  %v4504_v2 = vmax.f32 %v4495_v26, 0.0  ;;  %v4569_v3 = vpack.c.bf16 %v4501_v59, %v4497_v13  ;;  %v4571_v30 = vpack.c.bf16 %v4503_v31, %v4499_v21  ;;  %v7815_v28 = vld [vmem:[%s8217_s26 + $0x3a0] sm:$0xff]   ;;  %v7816_v58 = vld [vmem:[%s8217_s26 + $0x358] sm:$0xff]  }
 0x9a9   : > { %v7817_v26 = vld [vmem:[%s8217_s26 + $0x3d8] sm:$0xff]   ;;  %v7828_v13 = vld [vmem:[%s8217_s26 + $0x340] sm:$0xff]  }
 0x9aa   : > { %v4570_v12 = vpack.c.bf16 %v4502_v1, %v4498_v0  ;;  %v4572_v45 = vpack.c.bf16 %v4504_v2, %v4500_v17  ;;  %v7818_v59 = vld [vmem:[%s8217_s26 + $0x318] sm:$0xff]   ;;  %v7822_v0 = vld [vmem:[%s8217_s26 + $0x310] sm:$0xff]   ;;  %v7824_v1 = vld [vmem:[%s8217_s26 + $0x348] sm:$0xff]  }
 0x9ab   : > { %v7819_v31 = vld [vmem:[%s8217_s26 + $0x398] sm:$0xff]   ;;  %v7823_v17 = vld [vmem:[%s8217_s26 + $0x390] sm:$0xff]   ;;  %v7825_v2 = vld [vmem:[%s8217_s26 + $0x3c8] sm:$0xff]  }
 0x9ac   : > { %4797 = vmatprep.mubr.bf16.mxu1 %v4570_v12  ;;  %4838 = vmatprep.mubr.bf16.mxu0 %v4572_v45  ;;  %v7829_v21 = vld [vmem:[%s8217_s26 + $0x3c0] sm:$0xff]  }
 0x9ad   : > { %4798 = vmatmul.mubr.bf16.vlgmr.msra.gmra.mxu1 %v4569_v3  ;;  %4839 = vmatmul.mubr.bf16.vlgmr.msra.gmra.mxu0 %v4571_v30  ;;  %v7830_v12 = vld [vmem:[%s8217_s26 + $0x300] sm:$0xff]  }
 0x9ae   : > { %4976 = vmatpush1.bf16.msra.mxu1 %v7204_v37  ;;  %5019 = vmatpush1.bf16.msra.mxu0 %v7206_v55  ;;  %v7195_v37 = vcombine.high %v4850_v49, %v4852_v22  ;;  %v7194_v55 = vcombine.low %v4850_v49, %v4852_v22  ;;  %v7831_v45 = vld [vmem:[%s8217_s26 + $0x380] sm:$0xff]  }
 0x9af   : > { %4977 = vmatprep.subr.bf16.mxu1 %v7201_v4  ;;  %5020 = vmatprep.subr.bf16.mxu0 %v7203_v5 }
 0x9b0   : > { %4999 = vmatprep.mubr.bf16.mxu1 %v8016_v6  ;;  %5042 = vmatprep.mubr.bf16.mxu0 %v8016_v6  ;;  %v7800_v6 = vld [vmem:[%s8217_s26 + $0x378] sm:$0xff]  }
 0x9b2   : > { %4978 = vmatpush1.bf16.msra.mxu1 %v7200_v11  ;;  %5021 = vmatpush1.bf16.msra.mxu0 %v7202_v10 }
 0x9b3   : > { %4979 = vmatprep.subr.bf16.mxu1 %v7197_v23  ;;  %5022 = vmatprep.subr.bf16.mxu0 %v7199_v24 }
 0x9b6   : > { %4980 = vmatpush1.bf16.msra.mxu1 %v7196_v39  ;;  %5023 = vmatpush1.bf16.msra.mxu0 %v7198_v42  ;;  %v4865_v39 = vld [vmem:[%s8211_s18 + $0xc] sm:$0xf]  ;;  %s9359_s18 = sld [smem:[#allocation15_spill]] (!%p7245_p6) }
 0x9b7   : > { %4981 = vmatprep.subr.bf16.mxu1 %v7193_v34  ;;  %5024 = vmatprep.subr.bf16.mxu0 %v7195_v37  ;;  %v4874_v37 = vrot.slane %v4865_v39, %v8272_v33 }
 0x9ba   : > { %4982 = vmatpush1.bf16.msra.mxu1 %v7192_v52  ;;  %5025 = vmatpush1.bf16.msra.mxu0 %v7194_v55  ;;  %v4882_v52 = vrot.slane %v4865_v39, %v8789_v40  ;;  %v4870_v55 = vrot.slane %v4865_v39, %v8251_v18 }
 0x9bb   : > { %7482 = vmatprep.subr.bf16.mxu1 %v7800_v6  ;;  %7504 = vmatprep.subr.bf16.mxu0 %v7801_v29  ;;  %v4878_v6 = vrot.slane %v4865_v39, %v8793_v56 }
 0x9bd   : > { %7208 = vmatmul.mubr.msk.bf16.vlgmr.msra.gmra.mxu1 %vm944_vm1, %v8726_v16  ;;  %7209 = vmatmul.mubr.msk.bf16.vlgmr.msra.gmra.mxu0 %vm944_vm1, %v8726_v16  ;;  %v7810_v16 = vld [vmem:[%s8217_s26 + $0x328] sm:$0xff]   ;;  %s9363_s26 = sld [smem:[#allocation19_spill]] (!%p7245_p6) }
 0x9be   : > { %7483 = vmatpush3.bf16.msra.mxu1 %v7802_v62  ;;  %7505 = vmatpush3.bf16.msra.mxu0 %v7803_v14 }
 0x9bf   : > { %7484 = vmatprep.subr.bf16.mxu1 %v7804_v61  ;;  %7506 = vmatprep.subr.bf16.mxu0 %v7805_v35 }
 0x9c2   : > { %7485 = vmatpush3.bf16.msra.mxu1 %v7806_v7  ;;  %7507 = vmatpush3.bf16.msra.mxu0 %v7807_v8 }
 0x9c3   : > { %7486 = vmatprep.subr.bf16.mxu1 %v7808_v50  ;;  %7508 = vmatprep.subr.bf16.mxu0 %v7809_v47 }
 0x9c6   : > { %7487 = vmatpush3.bf16.msra.mxu1 %v7810_v16  ;;  %7509 = vmatpush3.bf16.msra.mxu0 %v7811_v38 }
 0x9c7   : > { %7488 = vmatprep.subr.bf16.mxu1 %v7812_v32  ;;  %7510 = vmatprep.subr.bf16.mxu0 %v7813_v51 }
 0x9ca   : > { %7489 = vmatpush3.bf16.msra.mxu1 %v7814_v57  ;;  %7511 = vmatpush3.bf16.msra.mxu0 %v7815_v28 }
 0x9cb   : > { %7490 = vmatprep.subr.bf16.mxu1 %v7816_v58  ;;  %7512 = vmatprep.subr.bf16.mxu0 %v7817_v26 }
 0x9ce   : > { %7491 = vmatpush3.bf16.msra.mxu1 %v7818_v59  ;;  %7513 = vmatpush3.bf16.msra.mxu0 %v7819_v31 }
 0x9cf   : > { %7492 = vmatprep.subr.bf16.mxu1 %v7820_v60  ;;  %7514 = vmatprep.subr.bf16.mxu0 %v7821_v63 }
 0x9d2   : > { %7493 = vmatpush3.bf16.msra.mxu1 %v7822_v0  ;;  %7515 = vmatpush3.bf16.msra.mxu0 %v7823_v17 }
 0x9d3   : > { %7494 = vmatprep.subr.bf16.mxu1 %v7824_v1  ;;  %7516 = vmatprep.subr.bf16.mxu0 %v7825_v2 }
 0x9d6   : > { %7495 = vmatpush3.bf16.msra.mxu1 %v7826_v44  ;;  %7517 = vmatpush3.bf16.msra.mxu0 %v7827_v36 }
 0x9d7   : > { %7496 = vmatprep.subr.bf16.mxu1 %v7828_v13  ;;  %7518 = vmatprep.subr.bf16.mxu0 %v7829_v21 }
 0x9da   : > { %7497 = vmatpush3.bf16.msra.mxu1 %v7830_v12  ;;  %7519 = vmatpush3.bf16.msra.mxu0 %v7831_v45 }
 0xa6d   : > { %v7454_v3 = vpop.f32.mrf.mxu1  ;;  %v7476_v30 = vpop.f32.mrf.mxu0 }
 0xa6f   : > { %v7455_v4 = vpop.f32.mrf.mxu1  ;;  %v7477_v5 = vpop.f32.mrf.mxu0 }
 0xa70   : > { %v7456_v41 = vadd.f32 %v7455_v4, %v7454_v3  ;;  %v7478_v20 = vadd.f32 %v7477_v5, %v7476_v30 }
 0xa71   : > { %v7457_v54 = vpop.f32.mrf.mxu1  ;;  %v7479_v9 = vpop.f32.mrf.mxu0 }
 0xa72   : > { %v4841_v11 = vadd.f32 %v7478_v20, %v7456_v41  ;;  %v7242_v41 = vld [vmem:[%s860_s5] ss:$0 sm:$0xff] }
 0xa73   : > { %v7458_v10 = vpop.f32.mrf.mxu1  ;;  %v7480_v23 = vpop.f32.mrf.mxu0 }
 0xa74   : > { %v4847_v24 = vadd.f32 %v4841_v11, %v8918_v19  ;;  %v7459_v27 = vadd.f32 %v7458_v10, %v7457_v54  ;;  %v7481_v48 = vadd.f32 %v7480_v23, %v7479_v9 }
 0xa76   : > { %v4844_v49 = vadd.f32 %v7481_v48, %v7459_v27 }
 0xa78   : > { %v4848_v22 = vadd.f32 %v4844_v49, %v8920_v15 }
 0xa7d   : > { %v5001_v42 = vpop.f32.mrf.mxu1  ;;  %v5044_v34 = vpop.f32.mrf.mxu0 }
 0xa7e   : > { %v5002_v15 = vadd.f32 %v5001_v42, %v4870_v55  ;;  %v5045_v50 = vadd.f32 %v5044_v34, %v4878_v6 }
 0xa7f   : > { %v5003_v29 = vpop.f32.mrf.mxu1  ;;  %v5046_v62 = vpop.f32.mrf.mxu0 }
 0xa80   : > { %v5004_v61 = vadd.f32 %v5003_v29, %v4874_v37  ;;  %v5047_v35 = vadd.f32 %v5046_v62, %v4882_v52  ;;  %v5053_v31 = vmax.f32 %v5002_v15, 0.0  ;;  %v5055_v60 = vmax.f32 %v5045_v50, 0.0  ;;  %v7243_v15 = vld [vmem:[%s863_s4] ss:$0 sm:$0xff]  ;;  %s9364_s4 = sld [smem:[#allocation21_spill]] (!%p7245_p6) }
 0xa81   : > { %v5005_v14 = vpop.f32.mrf.mxu1  ;;  %v5048_v19 = vpop.f32.mrf.mxu0 }
 0xa82   : > { %v5006_v7 = vadd.f32 %v5005_v14, %v4870_v55  ;;  %v5049_v8 = vadd.f32 %v5048_v19, %v4878_v6  ;;  %v5054_v28 = vmax.f32 %v5004_v61, 0.0  ;;  %v5056_v58 = vmax.f32 %v5047_v35, 0.0 }
 0xa83   : > { %v5007_v47 = vpop.f32.mrf.mxu1  ;;  %v5050_v16 = vpop.f32.mrf.mxu0 }
 0xa84   : > { %v5008_v38 = vadd.f32 %v5007_v47, %v4874_v37  ;;  %v5051_v32 = vadd.f32 %v5050_v16, %v4882_v52  ;;  %v5057_v51 = vmax.f32 %v5006_v7, 0.0  ;;  %v5059_v57 = vmax.f32 %v5049_v8, 0.0  ;;  %v7244_v47 = vld [vmem:[%s866_s17] ss:$0 sm:$0xff] }
 0xa86   : > { %v5058_v26 = vmax.f32 %v5008_v38, 0.0  ;;  %v5060_v59 = vmax.f32 %v5051_v32, 0.0  ;;  %v5125_v17 = vpack.c.bf16 %v5057_v51, %v5053_v31  ;;  %v5127_v1 = vpack.c.bf16 %v5059_v57, %v5055_v60 }
 0xa88   : > { %v5126_v63 = vpack.c.bf16 %v5058_v26, %v5054_v28  ;;  %v5128_v0 = vpack.c.bf16 %v5060_v59, %v5056_v58 }
 0xa8a   : > { %5353 = vmatprep.mubr.bf16.mxu1 %v5126_v63  ;;  %5394 = vmatprep.mubr.bf16.mxu0 %v5128_v0 }
 0xa8b   : > { %5354 = vmatmul.mubr.bf16.vlgmr.msra.gmra.mxu1 %v5125_v17  ;;  %5395 = vmatmul.mubr.bf16.vlgmr.msra.gmra.mxu0 %v5127_v1 }
 0xb4b   : > { %v7498_v2 = vpop.f32.mrf.mxu1  ;;  %v7520_v44 = vpop.f32.mrf.mxu0 }
 0xb4d   : > { %v7499_v36 = vpop.f32.mrf.mxu1  ;;  %v7521_v13 = vpop.f32.mrf.mxu0 }
 0xb4e   : > { %v7500_v21 = vadd.f32 %v7499_v36, %v7498_v2  ;;  %v7522_v12 = vadd.f32 %v7521_v13, %v7520_v44 }
 0xb4f   : > { %v7501_v45 = vpop.f32.mrf.mxu1  ;;  %v7523_v3 = vpop.f32.mrf.mxu0 }
 0xb50   : > { %v5397_v30 = vadd.f32 %v7522_v12, %v7500_v21 }
 0xb51   : > { %v7502_v4 = vpop.f32.mrf.mxu1  ;;  %v7524_v5 = vpop.f32.mrf.mxu0 }
 0xb52   : > { %v5403_v20 = vadd.f32 %v5397_v30, %v4847_v24  ;;  %v7503_v54 = vadd.f32 %v7502_v4, %v7501_v45  ;;  %v7525_v9 = vadd.f32 %v7524_v5, %v7523_v3 }
 0xb54   : > { %v5400_v11 = vadd.f32 %v7525_v9, %v7503_v54  ;;  %v5412_v10 = vadd.f32 %v7242_v41, %v5403_v20 }
 0xb56   : > { %v5404_v23 = vadd.f32 %v5400_v11, %v4848_v22  ;;  %v5414_v27 = vadd.f32 %v5412_v10, %v8720_v25 }
 0xb58   : > { %v5418_v48 = vsel %vm944_vm1, %v5414_v27, 0.0  ;;  %v5413_v49 = vadd.f32 %v7242_v41, %v5404_v23 }
 0xb59   : > { %5419 = vadd.xlane.f32.xlu0 %v5418_v48 }
 0xb5a   : > { %v5415_v39 = vadd.f32 %v5413_v49, %v8722_v43 }
 0xb5c   : > { %v5421_v42 = vsel %vm944_vm1, %v5415_v39, 0.0 }
 0xb5d   : > { %5422 = vadd.xlane.f32.xlu1 %v5421_v42 }
 0xbe2   : > { %v5420_v34 = vpop.xlane.xlu0 %5419 }
 0xbe3   : > { %v5424_v37 = vmul.f32 0.015625, %v5420_v34 }
 0xbe5   : > { %v5426_v52 = vsub.f32 %v5414_v27, %v5424_v37 }
 0xbe6   : > { %v5423_v24 = vpop.xlane.xlu1 %5422 }
 0xbe7   : > { %v5425_v55 = vmul.f32 0.015625, %v5423_v24  ;;  %v5428_v6 = vmul.f32 %v5426_v52, %v5426_v52 }
 0xbe9   : > { %v5427_v29 = vsub.f32 %v5415_v39, %v5425_v55  ;;  %v5430_v22 = vsel %vm944_vm1, %v5428_v6, 0.0 }
 0xbea   : > { %5431 = vadd.xlane.f32.xlu0 %v5430_v22 }
 0xbeb   : > { %v5429_v25 = vmul.f32 %v5427_v29, %v5427_v29 }
 0xbed   : > { %v5433_v62 = vsel %vm944_vm1, %v5429_v25, 0.0 }
 0xbee   : > { %5434 = vadd.xlane.f32.xlu1 %v5433_v62 }
 0xc73   : > { %v5432_v43 = vpop.xlane.xlu0 %5431 }
 0xc74   : > { %v5436_v14 = vmul.f32 0.015625, %v5432_v43 }
 0xc76   : > { %v5438_v19 = vadd.f32 1e-05, %v5436_v14 }
 0xc77   : > { %v5435_v61 = vpop.xlane.xlu1 %5434 }
 0xc78   : > { %7868 = vrsqrt.f32 %v5438_v19  ;;  %v5437_v35 = vmul.f32 0.015625, %v5435_v61 }
 0xc7a   : > { %v5439_v7 = vadd.f32 1e-05, %v5437_v35 }
 0xc7c   : > { %7870 = vrsqrt.f32 %v5439_v7 }
 0xc85   : > { %v7869_v8 = vpop.eup %7868 }
 0xc86   : > { %v5442_v50 = vmul.f32 %v7869_v8, %v5426_v52 }
 0xc88   : > { %v5450_v16 = vmul.f32 %v7243_v15, %v5442_v50 }
 0xc89   : > { %v7871_v38 = vpop.eup %7870 }
 0xc8a   : > { %v5458_v32 = vadd.f32 %v7244_v47, %v5450_v16  ;;  %v5443_v51 = vmul.f32 %v7871_v38, %v5427_v29 }
 0xc8c   : > { %5460 = vst.msk [vmem:[#allocation2] sm:$0xff] %vm944_vm1, %v5458_v32  ;;  %v5451_v57 = vmul.f32 %v7243_v15, %v5443_v51  ;;  %5465 = sbr.rel (%p7245_p6) target bundleno = 8069 (0x1f85), region = 112 }
 0xc8e   : > { %v5459_v28 = vadd.f32 %v7244_v47, %v5451_v57 }
 0xc90   : > { %5461 = vst.msk [vmem:[#allocation2 + $0x8] sm:$0xff] %vm944_vm1, %v5459_v28 }
 0xc91   : > { %v7876_v58 = vld [vmem:[%s9358_s30 + $0x64] ss:$16 sps:$4 sm:$0xff]   ;;  %v7878_v26 = vld [vmem:[%s9358_s30 + $0x60] ss:$16 sps:$4 sm:$0xff]   ;;  %v8028_v59 = vmov 0   ;;  %v9047_v44 = vpack.c.bf16 %v5459_v28, %v5458_v32  ;;  %v8029_v23 = vmov 0.0  }
 0xc92   : > { %5620 = vmatprep.mubr.bf16.mxu0 %v8028_v59  ;;  %5663 = vmatprep.mubr.bf16.mxu1 %v8028_v59  ;;  %v7879_v31 = vld [vmem:[%s9358_s30 + $0x44] ss:$16 sps:$4 sm:$0xff]   ;;  %v7881_v60 = vld [vmem:[%s9358_s30 + $0x40] ss:$16 sps:$4 sm:$0xff]   ;;  %vm6682_vm8 = vcmask 7168   ;;  %vm6771_vm9 = vcmask 1041409  }
 0xc93   : > { %5596 = vmatprep.subr.bf16.mxu0 %v7876_v58  ;;  %7875 = vset.pattern.permute.xlu0 %v8028_v59  ;;  %v7882_v63 = vld [vmem:[%s9358_s30 + $0x24] ss:$16 sps:$4 sm:$0xff]   ;;  %v7884_v0 = vld [vmem:[%s9358_s30 + $0x20] ss:$16 sps:$4 sm:$0xff]   ;;  %vm6774_vm10 = vcmask 254976   ;;  %vm6755_vm11 = vcmask 517120  }
 0xc94   : > { %5597 = vmatpush1.bf16.msra.mxu0 %v7878_v26  ;;  %7874 = vset.pattern.permute.xlu1 %v8028_v59  ;;  %v7885_v17 = vld [vmem:[%s9358_s30 + $0x4] ss:$16 sps:$4 sm:$0xff]   ;;  %v7887_v1 = vld [vmem:[%s9358_s30] ss:$16 sps:$4 sm:$0xff]   ;;  %vm6787_vm12 = vcmask 1024  }
 0xc95   : > { %5598 = vmatprep.subr.bf16.mxu0 %v7879_v31  ;;  %v9045_v2 = vld [vmem:[%s9359_s18 + $0x34] ss:$8 sps:$4 sm:$0xff]   ;;  %v9052_v36 = vld [vmem:[%s9359_s18 + $0x30] ss:$8 sps:$4 sm:$0xff]   ;;  %v9058_v13 = vld [vmem:[%s9359_s18 + $0x24] ss:$8 sps:$4 sm:$0xff]  }
 0xc96   : > { %v9066_v21 = vld [vmem:[%s9359_s18 + $0x20] ss:$8 sps:$4 sm:$0xff]   ;;  %v9073_v12 = vld [vmem:[%s9359_s18 + $0x14] ss:$8 sps:$4 sm:$0xff]   ;;  %v9079_v45 = vld [vmem:[%s9359_s18 + $0x10] ss:$8 sps:$4 sm:$0xff]  }
 0xc97   : > { %v9085_v3 = vld [vmem:[%s9359_s18 + $0x4] ss:$8 sps:$4 sm:$0xff]   ;;  %v9091_v30 = vld [vmem:[%s9359_s18] ss:$8 sps:$4 sm:$0xff]  }
 0xc98   : > { %5599 = vmatpush1.bf16.msra.mxu0 %v7881_v60  ;;  %v9109_v4 = vld [vmem:[%s9360_s15] sm:$0xf] }
 0xc99   : > { %5600 = vmatprep.subr.bf16.mxu0 %v7882_v63  ;;  %v5488_v5 = vrot.slane %v9109_v4, %v8251_v18  ;;  %v5492_v20 = vrot.slane %v9109_v4, %v8272_v33 }
 0xc9c   : > { %5601 = vmatpush1.bf16.msra.mxu0 %v7884_v0 }
 0xc9d   : > { %5602 = vmatprep.subr.bf16.mxu0 %v7885_v17 }
 0xca0   : > { %5603 = vmatpush1.bf16.msra.mxu0 %v7887_v1 }
 0xca1   : > { %5964 = vmatprep.subr.bf16.mxu0 %v9045_v2 }
 0xca3   : > { %7262 = vmatmul.mubr.msk.bf16.vlgmr.msra.gmra.mxu0 %vm944_vm1, %v9047_v44 }
 0xca4   : > { %5965 = vmatpush1.bf16.msra.mxu0 %v9052_v36  ;;  %5988 = vmatprep.mubr.bf16.mxu0 %v8028_v59 }
 0xca5   : > { %5966 = vmatprep.subr.bf16.mxu0 %v9058_v13 }
 0xca8   : > { %5967 = vmatpush1.bf16.msra.mxu0 %v9066_v21 }
 0xca9   : > { %5968 = vmatprep.subr.bf16.mxu0 %v9073_v12 }
 0xcac   : > { %5969 = vmatpush1.bf16.msra.mxu0 %v9079_v45 }
 0xcad   : > { %5970 = vmatprep.subr.bf16.mxu0 %v9085_v3 }
 0xcb0   : > { %5971 = vmatpush1.bf16.msra.mxu0 %v9091_v30 }
 0xcb1   : > { %6138 = vmatprep.subr.bf16.mxu0 %v9045_v2 }
 0xcb3   : > { %5989 = vmatmul.mubr.bf16.vlgmr.msra.gmra.mxu0 %v8028_v59 }
 0xcb4   : > { %6139 = vmatpush1.bf16.msra.mxu0 %v9052_v36  ;;  %6162 = vmatprep.mubr.bf16.mxu0 %v8028_v59 }
 0xcb5   : > { %6140 = vmatprep.subr.bf16.mxu0 %v9058_v13 }
 0xcb8   : > { %6141 = vmatpush1.bf16.msra.mxu0 %v9066_v21 }
 0xcb9   : > { %6142 = vmatprep.subr.bf16.mxu0 %v9073_v12 }
 0xcbc   : > { %6143 = vmatpush1.bf16.msra.mxu0 %v9079_v45 }
 0xcbd   : > { %6144 = vmatprep.subr.bf16.mxu0 %v9085_v3 }
 0xcc0   : > { %6145 = vmatpush1.bf16.msra.mxu0 %v9091_v30 }
 0xcc1   : > { %6312 = vmatprep.subr.bf16.mxu0 %v9045_v2 }
 0xd63   : > { %v5622_v41 = vpop.f32.mrf.mxu0 }
 0xd64   : > { %v5623_v54 = vadd.f32 %v5622_v41, %v5488_v5 }
 0xd65   : > { %v5624_v9 = vpop.f32.mrf.mxu0 }
 0xd66   : > { %v5625_v11 = vadd.f32 %v5624_v9, %v5492_v20  ;;  %v5676_v27 = vcombine.high %v5623_v54, %v8029_v23  ;;  %v5683_v39 = vrot.slane %v5623_v54, %v8295_v46 }
 0xd67   : > { %v5626_v10 = vpop.f32.mrf.mxu0 }
 0xd68   : > { %v5627_v48 = vadd.f32 %v5626_v10, %v5488_v5  ;;  %v5742_v52 = vcombine.high %v5625_v11, %v8029_v23  ;;  %v5690_v18 = vrot.slane %v5676_v27, %v8295_v46  ;;  %v5749_v6 = vrot.slane %v5625_v11, %v8295_v46 }
 0xd69   : > { %v5628_v49 = vpop.f32.mrf.mxu0 }
 0xd6a   : > { %v5691_v42 = vcombine.high %v5627_v48, %v8029_v23  ;;  %v5698_v34 = vrot.slane %v5627_v48, %v8295_v46  ;;  %v5629_v37 = vadd.f32 %v5628_v49, %v5492_v20  ;;  %v5756_v43 = vrot.slane %v5742_v52, %v8295_v46  ;;  %v7903_v52 = vld [vmem:[%s9358_s30 + $0x4c] ss:$16 sps:$4 sm:$0xff]  }
 0xd6c   : > { %v5705_v24 = vrot.slane %v5691_v42, %v8295_v46  ;;  %v5706_v33 = vcombine.low %v5683_v39, %v5698_v34  ;;  %v5757_v55 = vcombine.high %v5629_v37, %v8029_v23  ;;  %v5764_v29 = vrot.slane %v5629_v37, %v8295_v46  ;;  %v7902_v37 = vld [vmem:[%s9358_s30 + $0x68] ss:$16 sps:$4 sm:$0xff]  }
 0xd6d   : > { %v5707_v22 = vcombine.high %v5683_v39, %v5698_v34  ;;  %v7900_v34 = vld [vmem:[%s9358_s30 + $0x6c] ss:$16 sps:$4 sm:$0xff]  }
 0xd6e   : > { %v5722_v25 = vcombine.low %v5690_v18, %v5705_v24  ;;  %v5723_v62 = vcombine.high %v5690_v18, %v5705_v24  ;;  %v5771_v14 = vrot.slane %v5757_v55, %v8295_v46  ;;  %v5772_v19 = vcombine.low %v5749_v6, %v5764_v29  ;;  %5639 = vmatprep.subr.bf16.mxu1 %v7900_v34  ;;  %v7905_v18 = vld [vmem:[%s9358_s30 + $0x48] ss:$16 sps:$4 sm:$0xff]   ;;  %v7906_v24 = vld [vmem:[%s9358_s30 + $0x2c] ss:$16 sps:$4 sm:$0xff]  }
 0xd6f   : > { %v5773_v61 = vcombine.high %v5749_v6, %v5764_v29  ;;  %v5714_v35 = vrot.slane %v5706_v33, %v8298_v53  ;;  %v5721_v47 = vrot.slane %v5707_v22, %v8298_v53  ;;  %5640 = vmatpush1.bf16.msra.mxu1 %v7902_v37  ;;  %v7908_v33 = vld [vmem:[%s9358_s30 + $0x28] ss:$16 sps:$4 sm:$0xff]   ;;  %v7909_v55 = vld [vmem:[%s9358_s30 + $0xc] ss:$16 sps:$4 sm:$0xff]  }
 0xd70   : > { %v5780_v7 = vrot.slane %v5772_v19, %v8298_v53  ;;  %v5788_v15 = vcombine.low %v5756_v43, %v5771_v14  ;;  %v5789_v50 = vcombine.high %v5756_v43, %v5771_v14  ;;  %v5730_v16 = vrot.slane %v5722_v25, %v8298_v53  ;;  %5641 = vmatprep.subr.bf16.mxu1 %v7903_v52  ;;  %v7911_v6 = vld [vmem:[%s9358_s30 + $0x8] ss:$16 sps:$4 sm:$0xff]  }
 0xd71   : > { %v5787_v8 = vrot.slane %v5773_v61, %v8298_v53  ;;  %v5737_v38 = vrot.slane %v5723_v62, %v8298_v53  ;;  %v9173_v62 = vrot.slane %v9109_v4, %v8793_v56 }
 0xd72   : > { %v5796_v32 = vrot.slane %v5788_v15, %v8298_v53  ;;  %v5803_v51 = vrot.slane %v5789_v50, %v8298_v53  ;;  %v5824_v57 = vcombine.low %v5714_v35, %v5780_v7  ;;  %v7264_v28 = vcombine.high %v5714_v35, %v5780_v7 }
 0xd73   : > { %v5990_v58 = vpop.f32.mrf.mxu0  ;;  %v5840_v26 = vcombine.low %v5721_v47, %v5787_v8  ;;  %v7265_v31 = vcombine.high %v5721_v47, %v5787_v8  ;;  %5642 = vmatpush1.bf16.msra.mxu1 %v7905_v18  ;;  %v9189_v8 = vld [vmem:[%s9361_s19] ss:$0 sm:$0xff] }
 0xd74   : > { %v5856_v60 = vcombine.low %v5730_v16, %v5796_v32  ;;  %v7266_v63 = vcombine.high %v5730_v16, %v5796_v32  ;;  %v5872_v0 = vcombine.low %v5737_v38, %v5803_v51  ;;  %v7267_v17 = vcombine.high %v5737_v38, %v5803_v51  ;;  %7268 = vst.sshfl [vmem:[#allocation3] sm:$0x33 pattern:$0x76325410] %v5824_v57 }
 0xd75   : > { %7269 = vst.sshfl [vmem:[#allocation3 + $0x4] sm:$0x33 pattern:$0x76325410] %v7264_v28  ;;  %v5992_v1 = vpop.f32.mrf.mxu0  ;;  %5643 = vmatprep.subr.bf16.mxu1 %v7906_v24 }
 0xd76   : > { %7270 = vst.sshfl [vmem:[#allocation3 + $0x8] sm:$0x33 pattern:$0x76325410] %v5840_v26  ;;  %v5999_v5 = vcombine.low %v5990_v58, %v5992_v1 }
 0xd77   : > { %7271 = vst.sshfl [vmem:[#allocation3 + $0xc] sm:$0x33 pattern:$0x76325410] %v7265_v31  ;;  %v5994_v53 = vpop.f32.mrf.mxu0  ;;  %5644 = vmatpush1.bf16.msra.mxu1 %v7908_v33 }
 0xd78   : > { %7272 = vst.sshfl [vmem:[#allocation3 + $0x10] sm:$0x33 pattern:$0x76325410] %v5856_v60  ;;  %v6006_v20 = vrot.slane %v5999_v5, %v8295_v46  ;;  %5645 = vmatprep.subr.bf16.mxu1 %v7909_v55 }
 0xd79   : > { %7273 = vst.sshfl [vmem:[#allocation3 + $0x14] sm:$0x33 pattern:$0x76325410] %v7266_v63  ;;  %v5995_v41 = vpop.f32.mrf.mxu0 }
 0xd7a   : > { %7274 = vst.sshfl [vmem:[#allocation3 + $0x18] sm:$0x33 pattern:$0x76325410] %v5872_v0 }
 0xd7b   : > { %7275 = vst.sshfl [vmem:[#allocation3 + $0x1c] sm:$0x33 pattern:$0x76325410] %v7267_v17  ;;  %v5912_v54 = vld [vmem:[#allocation3] sm:$0xf]  ;;  %5646 = vmatpush1.bf16.msra.mxu1 %v7911_v6 }
 0xd7c   : > { %v6008_v9 = vadd.f32 %v6006_v20, %v5912_v54  ;;  %6051 = vmatprep.subr.bf16.mxu1 %v9045_v2  ;;  %v6038_v58 = vld [vmem:[#allocation3 + $0x4] sm:$0xf] }
 0xd7d   : > { %v6125_v52 = vld [vmem:[#allocation3 + $0x8] sm:$0xf] }
 0xd7e   : > { %6016 = vrot.lane.b32.xlu0 %v6008_v9, %s8030_s23  ;;  %v7284_v11 = vmul.f32 -1.442695, %v6008_v9  ;;  %7263 = vmatmul.mubr.msk.bf16.vlgmr.msra.gmra.mxu1 %vm944_vm1, %v9047_v44 }
 0xd7f   : > { %6052 = vmatpush1.bf16.msra.mxu1 %v9052_v36  ;;  %6075 = vmatprep.mubr.bf16.mxu1 %v8028_v59 }
 0xd80   : > { %7912 = vpow2.f32 %v7284_v11  ;;  %6053 = vmatprep.subr.bf16.mxu1 %v9058_v13 }
 0xd83   : > { %6054 = vmatpush1.bf16.msra.mxu1 %v9066_v21 }
 0xd84   : > { %6055 = vmatprep.subr.bf16.mxu1 %v9073_v12 }
 0xd87   : > { %6056 = vmatpush1.bf16.msra.mxu1 %v9079_v45 }
 0xd88   : > { %6057 = vmatprep.subr.bf16.mxu1 %v9085_v3 }
 0xd8b   : > { %6058 = vmatpush1.bf16.msra.mxu1 %v9091_v30 }
 0xd8c   : > { %6225 = vmatprep.subr.bf16.mxu1 %v9045_v2 }
 0xd8d   : > { %v7913_v10 = vpop.eup %7912 }
 0xd8e   : > { %v6012_v23 = vadd.f32 1.0, %v7913_v10 }
 0xd90   : > { %7914 = vrcp.f32 %v6012_v23 }
 0xd9d   : > { %v7915_v49 = vpop.eup %7914 }
 0xd9e   : > { %v6021_v29 = vmul.f32 0.0, %v7915_v49  ;;  %v6030_v19 = vrot.slane %v7915_v49, 2 }
 0xdf0   : > { %v6017_v27 = vpop.permute.xlu0 %6016 }
 0xdf1   : > { %v6018_v48 = vrot.slane %v6017_v27, 2 }
 0xdf3   : > { %7916 = vtanh.f32 %v6018_v48 }
 0xe00   : > { %v7917_v39 = vpop.eup %7916 }
 0xe01   : > { %v6022_v42 = vmul.f32 %v7917_v39, %v7915_v49 }
 0xe03   : > { %6024 = vrot.lane.b32.xlu0 %v6022_v42, %s8030_s23 }
 0xe3e   : > { %v5665_v43 = vpop.f32.mrf.mxu1 }
 0xe3f   : > { %v5666_v14 = vadd.f32 %v5665_v43, %v9173_v62 }
 0xe40   : > { %v9194_v50 = vpop.f32.mrf.mxu1 }
 0xe41   : > { %v5674_v56 = vmax.f32 %v5666_v14, 0.0 }
 0xe42   : > { %v9196_v47 = vpop.f32.mrf.mxu1 }
 0xe43   : > { %v9192_v15 = vmul.f32 %v9189_v8, %v5674_v56 }
 0xe44   : > { %v9198_v16 = vpop.f32.mrf.mxu1 }
 0xe75   : > { %v6025_v44 = vpop.permute.xlu0 %6024 }
 0xe76   : > { %v6027_v22 = vadd.f32 %v6025_v44, %v6021_v29 }
 0xe78   : > { %7918 = vtanh.f32 %v6027_v22 }
 0xe85   : > { %v7919_v25 = vpop.eup %7918 }
 0xe86   : > { %6033 = vrot.lane.b32.xlu1 %v7919_v25, %s8030_s23 }
 0xef8   : > { %v6034_v61 = vpop.permute.xlu1 %6033 }
 0xef9   : > { %v6036_v35 = vmul.f32 %v6034_v61, %v6030_v19 }
 0xefb   : > { %v6039_v7 = vpack.c.bf16 %v6036_v35, %v6036_v35 }
 0xefd   : > { %7285 = vmatmul.mubr.msk.bf16.vlgmr.msra.gmra.mxu1 %vm944_vm1, %v6039_v7 }
 0xefe   : > { %6226 = vmatpush1.bf16.msra.mxu1 %v9052_v36  ;;  %6249 = vmatprep.mubr.bf16.mxu1 %v8028_v59 }
 0xeff   : > { %6227 = vmatprep.subr.bf16.mxu1 %v9058_v13 }
 0xf02   : > { %6228 = vmatpush1.bf16.msra.mxu1 %v9066_v21 }
 0xf03   : > { %6229 = vmatprep.subr.bf16.mxu1 %v9073_v12 }
 0xf06   : > { %6230 = vmatpush1.bf16.msra.mxu1 %v9079_v45 }
 0xf07   : > { %6231 = vmatprep.subr.bf16.mxu1 %v9085_v3 }
 0xf0a   : > { %6232 = vmatpush1.bf16.msra.mxu1 %v9091_v30 }
 0xf0b   : > { %6399 = vmatprep.subr.bf16.mxu1 %v9045_v2 }
 0xfbd   : > { %v6077_v38 = vpop.f32.mrf.mxu1 }
 0xfbf   : > { %v6079_v32 = vpop.f32.mrf.mxu1 }
 0xfc0   : > { %v6086_v51 = vcombine.low %v6077_v38, %v6079_v32 }
 0xfc1   : > { %v6081_v57 = vpop.f32.mrf.mxu1 }
 0xfc2   : > { %v6093_v28 = vrot.slane %v6086_v51, %v8295_v46 }
 0xfc3   : > { %v6082_v26 = vpop.f32.mrf.mxu1 }
 0xfc4   : > { %v6095_v31 = vadd.f32 %v6093_v28, %v6038_v58 }
 0xfc6   : > { %6103 = vrot.lane.b32.xlu1 %v6095_v31, %s8030_s23  ;;  %v7286_v60 = vmul.f32 -1.442695, %v6095_v31  ;;  %v6212_v31 = vld [vmem:[#allocation3 + $0xc] sm:$0xf] }
 0xfc8   : > { %7920 = vpow2.f32 %v7286_v60 }
 0xfd5   : > { %v7921_v63 = vpop.eup %7920 }
 0xfd6   : > { %v6099_v0 = vadd.f32 1.0, %v7921_v63 }
 0xfd8   : > { %7922 = vrcp.f32 %v6099_v0 }
 0xfe5   : > { %v7923_v5 = vpop.eup %7922 }
 0xfe6   : > { %v6108_v20 = vmul.f32 %v7923_v5, %v6027_v22  ;;  %v6117_v10 = vrot.slane %v7923_v5, 2 }
0x1038   : > { %v6104_v17 = vpop.permute.xlu1 %6103 }
0x1039   : > { %v6105_v1 = vrot.slane %v6104_v17, 2 }
0x103b   : > { %7924 = vtanh.f32 %v6105_v1 }
0x1048   : > { %v7925_v53 = vpop.eup %7924 }
0x1049   : > { %v6109_v41 = vmul.f32 %v7925_v53, %v7923_v5 }
0x104b   : > { %6111 = vrot.lane.b32.xlu0 %v6109_v41, %s8030_s23 }
0x10bd   : > { %v6112_v54 = vpop.permute.xlu0 %6111 }
0x10be   : > { %v6114_v9 = vadd.f32 %v6112_v54, %v6108_v20 }
0x10c0   : > { %7926 = vtanh.f32 %v6114_v9 }
0x10cd   : > { %v7927_v11 = vpop.eup %7926 }
0x10ce   : > { %6120 = vrot.lane.b32.xlu1 %v7927_v11, %s8030_s23 }
0x1140   : > { %v6121_v23 = vpop.permute.xlu1 %6120 }
0x1141   : > { %v6123_v27 = vmul.f32 %v6121_v23, %v6117_v10 }
0x1143   : > { %v6126_v48 = vpack.c.bf16 %v6123_v27, %v6123_v27 }
0x1145   : > { %7287 = vmatmul.mubr.msk.bf16.vlgmr.msra.gmra.mxu0 %vm944_vm1, %v6126_v48 }
0x1146   : > { %6313 = vmatpush1.bf16.msra.mxu0 %v9052_v36  ;;  %6336 = vmatprep.mubr.bf16.mxu0 %v8028_v59 }
0x1147   : > { %6314 = vmatprep.subr.bf16.mxu0 %v9058_v13 }
0x114a   : > { %6315 = vmatpush1.bf16.msra.mxu0 %v9066_v21 }
0x114b   : > { %6316 = vmatprep.subr.bf16.mxu0 %v9073_v12 }
0x114e   : > { %6317 = vmatpush1.bf16.msra.mxu0 %v9079_v45 }
0x114f   : > { %6318 = vmatprep.subr.bf16.mxu0 %v9085_v3 }
0x1152   : > { %6319 = vmatpush1.bf16.msra.mxu0 %v9091_v30 }
0x1153   : > { %6486 = vmatprep.subr.bf16.mxu0 %v9045_v2 }
0x1205   : > { %v6164_v49 = vpop.f32.mrf.mxu0 }
0x1207   : > { %v6166_v39 = vpop.f32.mrf.mxu0 }
0x1208   : > { %v6173_v42 = vcombine.low %v6164_v49, %v6166_v39 }
0x1209   : > { %v6168_v34 = vpop.f32.mrf.mxu0 }
0x120a   : > { %v6180_v37 = vrot.slane %v6173_v42, %v8295_v46 }
0x120b   : > { %v6169_v18 = vpop.f32.mrf.mxu0 }
0x120c   : > { %v6182_v24 = vadd.f32 %v6180_v37, %v6125_v52  ;;  %v6299_v18 = vld [vmem:[#allocation3 + $0x10] sm:$0xf] }
0x120e   : > { %6190 = vrot.lane.b32.xlu0 %v6182_v24, %s8030_s23  ;;  %v7288_v33 = vmul.f32 -1.442695, %v6182_v24 }
0x1210   : > { %7928 = vpow2.f32 %v7288_v33 }
0x121d   : > { %v7929_v55 = vpop.eup %7928 }
0x121e   : > { %v6186_v6 = vadd.f32 1.0, %v7929_v55 }
0x1220   : > { %7930 = vrcp.f32 %v6186_v6 }
0x122d   : > { %v7931_v22 = vpop.eup %7930 }
0x122e   : > { %v6195_v14 = vmul.f32 %v7931_v22, %v6114_v9  ;;  %v6204_v7 = vrot.slane %v7931_v22, 2 }
0x1280   : > { %v6191_v29 = vpop.permute.xlu0 %6190 }
0x1281   : > { %v6192_v44 = vrot.slane %v6191_v29, 2 }
0x1283   : > { %7932 = vtanh.f32 %v6192_v44 }
0x1290   : > { %v7933_v25 = vpop.eup %7932 }
0x1291   : > { %v6196_v43 = vmul.f32 %v7933_v25, %v7931_v22 }
0x1293   : > { %6198 = vrot.lane.b32.xlu1 %v6196_v43, %s8030_s23 }
0x1305   : > { %v6199_v19 = vpop.permute.xlu1 %6198 }
0x1306   : > { %v6201_v61 = vadd.f32 %v6199_v19, %v6195_v14 }
0x1308   : > { %7934 = vtanh.f32 %v6201_v61 }
0x1315   : > { %v7935_v35 = vpop.eup %7934 }
0x1316   : > { %6207 = vrot.lane.b32.xlu0 %v7935_v35, %s8030_s23 }
0x1388   : > { %v6208_v56 = vpop.permute.xlu0 %6207 }
0x1389   : > { %v6210_v38 = vmul.f32 %v6208_v56, %v6204_v7 }
0x138b   : > { %v6213_v32 = vpack.c.bf16 %v6210_v38, %v6210_v38 }
0x138d   : > { %7289 = vmatmul.mubr.msk.bf16.vlgmr.msra.gmra.mxu1 %vm944_vm1, %v6213_v32 }
0x138e   : > { %6400 = vmatpush1.bf16.msra.mxu1 %v9052_v36  ;;  %6423 = vmatprep.mubr.bf16.mxu1 %v8028_v59 }
0x138f   : > { %6401 = vmatprep.subr.bf16.mxu1 %v9058_v13 }
0x1392   : > { %6402 = vmatpush1.bf16.msra.mxu1 %v9066_v21 }
0x1393   : > { %6403 = vmatprep.subr.bf16.mxu1 %v9073_v12 }
0x1396   : > { %6404 = vmatpush1.bf16.msra.mxu1 %v9079_v45 }
0x1397   : > { %6405 = vmatprep.subr.bf16.mxu1 %v9085_v3 }
0x139a   : > { %6406 = vmatpush1.bf16.msra.mxu1 %v9091_v30 }
0x139b   : > { %6573 = vmatprep.subr.bf16.mxu1 %v9045_v2 }
0x144d   : > { %v6251_v51 = vpop.f32.mrf.mxu1 }
0x144f   : > { %v6253_v57 = vpop.f32.mrf.mxu1 }
0x1450   : > { %v6260_v28 = vcombine.low %v6251_v51, %v6253_v57 }
0x1451   : > { %v6255_v58 = vpop.f32.mrf.mxu1 }
0x1452   : > { %v6267_v26 = vrot.slane %v6260_v28, %v8295_v46 }
0x1453   : > { %v6256_v60 = vpop.f32.mrf.mxu1 }
0x1454   : > { %v6269_v63 = vadd.f32 %v6267_v26, %v6212_v31  ;;  %v6386_v31 = vld [vmem:[#allocation3 + $0x14] sm:$0xf] }
0x1456   : > { %6277 = vrot.lane.b32.xlu1 %v6269_v63, %s8030_s23  ;;  %v7290_v0 = vmul.f32 -1.442695, %v6269_v63 }
0x1458   : > { %7936 = vpow2.f32 %v7290_v0 }
0x1465   : > { %v7937_v17 = vpop.eup %7936 }
0x1466   : > { %v6273_v1 = vadd.f32 1.0, %v7937_v17 }
0x1468   : > { %7938 = vrcp.f32 %v6273_v1 }
0x1475   : > { %v7939_v2 = vpop.eup %7938 }
0x1476   : > { %v6282_v54 = vmul.f32 %v7939_v2, %v6201_v61  ;;  %v6291_v23 = vrot.slane %v7939_v2, 2 }
0x14c8   : > { %v6278_v5 = vpop.permute.xlu1 %6277 }
0x14c9   : > { %v6279_v53 = vrot.slane %v6278_v5, 2 }
0x14cb   : > { %7940 = vtanh.f32 %v6279_v53 }
0x14d8   : > { %v7941_v41 = vpop.eup %7940 }
0x14d9   : > { %v6283_v20 = vmul.f32 %v7941_v41, %v7939_v2 }
0x14db   : > { %6285 = vrot.lane.b32.xlu0 %v6283_v20, %s8030_s23 }
0x154d   : > { %v6286_v9 = vpop.permute.xlu0 %6285 }
0x154e   : > { %v6288_v11 = vadd.f32 %v6286_v9, %v6282_v54 }
0x1550   : > { %7942 = vtanh.f32 %v6288_v11 }
0x155d   : > { %v7943_v10 = vpop.eup %7942 }
0x155e   : > { %6294 = vrot.lane.b32.xlu1 %v7943_v10, %s8030_s23 }
0x15d0   : > { %v6295_v27 = vpop.permute.xlu1 %6294 }
0x15d1   : > { %v6297_v48 = vmul.f32 %v6295_v27, %v6291_v23 }
0x15d3   : > { %v6300_v49 = vpack.c.bf16 %v6297_v48, %v6297_v48  ;;  %v6473_v48 = vld [vmem:[#allocation3 + $0x18] sm:$0xf] }
0x15d5   : > { %7291 = vmatmul.mubr.msk.bf16.vlgmr.msra.gmra.mxu0 %vm944_vm1, %v6300_v49 }
0x15d6   : > { %6487 = vmatpush1.bf16.msra.mxu0 %v9052_v36  ;;  %6510 = vmatprep.mubr.bf16.mxu0 %v8028_v59 }
0x15d7   : > { %6488 = vmatprep.subr.bf16.mxu0 %v9058_v13 }
0x15da   : > { %6489 = vmatpush1.bf16.msra.mxu0 %v9066_v21 }
0x15db   : > { %6490 = vmatprep.subr.bf16.mxu0 %v9073_v12 }
0x15de   : > { %6491 = vmatpush1.bf16.msra.mxu0 %v9079_v45 }
0x15df   : > { %6492 = vmatprep.subr.bf16.mxu0 %v9085_v3 }
0x15e2   : > { %6493 = vmatpush1.bf16.msra.mxu0 %v9091_v30 }
0x1695   : > { %v6338_v39 = vpop.f32.mrf.mxu0 }
0x1697   : > { %v6340_v42 = vpop.f32.mrf.mxu0 }
0x1698   : > { %v6347_v34 = vcombine.low %v6338_v39, %v6340_v42 }
0x1699   : > { %v6342_v37 = vpop.f32.mrf.mxu0 }
0x169a   : > { %v6354_v52 = vrot.slane %v6347_v34, %v8295_v46 }
0x169b   : > { %v6343_v24 = vpop.f32.mrf.mxu0 }
0x169c   : > { %v6356_v33 = vadd.f32 %v6354_v52, %v6299_v18 }
0x169e   : > { %6364 = vrot.lane.b32.xlu0 %v6356_v33, %s8030_s23  ;;  %v7292_v55 = vmul.f32 -1.442695, %v6356_v33 }
0x16a0   : > { %7944 = vpow2.f32 %v7292_v55 }
0x16ad   : > { %v7945_v6 = vpop.eup %7944 }
0x16ae   : > { %v6360_v29 = vadd.f32 1.0, %v7945_v6  ;;  %v5670_v6 = vadd.f32 %v9196_v47, %v9173_v62 }
0x16b0   : > { %7946 = vrcp.f32 %v6360_v29  ;;  %v5675_v29 = vmax.f32 %v5670_v6, 0.0 }
0x16bd   : > { %v7947_v25 = vpop.eup %7946 }
0x16be   : > { %v6369_v19 = vmul.f32 %v7947_v25, %v6288_v11  ;;  %v6378_v56 = vrot.slane %v7947_v25, 2 }
0x1710   : > { %v6365_v44 = vpop.permute.xlu0 %6364 }
0x1711   : > { %v6366_v22 = vrot.slane %v6365_v44, 2  ;;  %v6654_v44 = vmul.f32 %v9189_v8, %v5675_v29 }
0x1713   : > { %7948 = vtanh.f32 %v6366_v22  ;;  %v6658_v22 = vsel %vm944_vm1, %v6654_v44, 0.0 }
0x1720   : > { %v7949_v43 = vpop.eup %7948 }
0x1721   : > { %v6370_v14 = vmul.f32 %v7949_v43, %v7947_v25 }
0x1723   : > { %6372 = vrot.lane.b32.xlu1 %v6370_v14, %s8030_s23 }
0x1795   : > { %v6373_v61 = vpop.permute.xlu1 %6372 }
0x1796   : > { %v6375_v35 = vadd.f32 %v6373_v61, %v6369_v19  ;;  %v6655_v61 = vsel %vm944_vm1, %v9192_v15, 0.0 }
0x1798   : > { %7950 = vtanh.f32 %v6375_v35 }
0x17a5   : > { %v7951_v7 = vpop.eup %7950 }
0x17a6   : > { %6381 = vrot.lane.b32.xlu0 %v7951_v7, %s8030_s23 }
0x1818   : > { %v6382_v38 = vpop.permute.xlu0 %6381 }
0x1819   : > { %v6384_v32 = vmul.f32 %v6382_v38, %v6378_v56  ;;  %v7300_v56 = vld [vmem:[#allocation4] ss:$0 sm:$0xff] }
0x181b   : > { %v6387_v51 = vpack.c.bf16 %v6384_v32, %v6384_v32 }
0x181d   : > { %7293 = vmatmul.mubr.msk.bf16.vlgmr.msra.gmra.mxu1 %vm944_vm1, %v6387_v51 }
0x181e   : > { %6574 = vmatpush1.bf16.msra.mxu1 %v9052_v36  ;;  %6597 = vmatprep.mubr.bf16.mxu1 %v8028_v59 }
0x181f   : > { %6575 = vmatprep.subr.bf16.mxu1 %v9058_v13 }
0x1822   : > { %6576 = vmatpush1.bf16.msra.mxu1 %v9066_v21 }
0x1823   : > { %6577 = vmatprep.subr.bf16.mxu1 %v9073_v12 }
0x1826   : > { %6578 = vmatpush1.bf16.msra.mxu1 %v9079_v45 }
0x1827   : > { %6579 = vmatprep.subr.bf16.mxu1 %v9085_v3 }
0x182a   : > { %6580 = vmatpush1.bf16.msra.mxu1 %v9091_v30 }
0x18dd   : > { %v6425_v57 = vpop.f32.mrf.mxu1 }
0x18df   : > { %v6427_v28 = vpop.f32.mrf.mxu1 }
0x18e0   : > { %v6434_v58 = vcombine.low %v6425_v57, %v6427_v28 }
0x18e1   : > { %v6429_v26 = vpop.f32.mrf.mxu1 }
0x18e2   : > { %v6441_v36 = vrot.slane %v6434_v58, %v8295_v46 }
0x18e3   : > { %v6430_v59 = vpop.f32.mrf.mxu1 }
0x18e4   : > { %v6443_v60 = vadd.f32 %v6441_v36, %v6386_v31 }
0x18e6   : > { %6451 = vrot.lane.b32.xlu1 %v6443_v60, %s8030_s23  ;;  %v7294_v13 = vmul.f32 -1.442695, %v6443_v60 }
0x18e8   : > { %7952 = vpow2.f32 %v7294_v13 }
0x18f5   : > { %v7953_v21 = vpop.eup %7952 }
0x18f6   : > { %v6447_v12 = vadd.f32 1.0, %v7953_v21 }
0x18f8   : > { %7954 = vrcp.f32 %v6447_v12 }
0x1905   : > { %v7955_v3 = vpop.eup %7954 }
0x1906   : > { %v6456_v17 = vmul.f32 %v7955_v3, %v6375_v35  ;;  %v6465_v2 = vrot.slane %v7955_v3, 2 }
0x1958   : > { %v6452_v45 = vpop.permute.xlu1 %6451 }
0x1959   : > { %v6453_v63 = vrot.slane %v6452_v45, 2 }
0x195b   : > { %7956 = vtanh.f32 %v6453_v63 }
0x1968   : > { %v7957_v30 = vpop.eup %7956 }
0x1969   : > { %v6457_v0 = vmul.f32 %v7957_v30, %v7955_v3 }
0x196b   : > { %6459 = vrot.lane.b32.xlu0 %v6457_v0, %s8030_s23 }
0x19dd   : > { %v6460_v1 = vpop.permute.xlu0 %6459 }
0x19de   : > { %v6462_v5 = vadd.f32 %v6460_v1, %v6456_v17 }
0x19e0   : > { %7958 = vtanh.f32 %v6462_v5 }
0x19ed   : > { %v7959_v53 = vpop.eup %7958 }
0x19ee   : > { %6468 = vrot.lane.b32.xlu1 %v7959_v53, %s8030_s23 }
0x1a60   : > { %v6469_v41 = vpop.permute.xlu1 %6468 }
0x1a61   : > { %v6471_v20 = vmul.f32 %v6469_v41, %v6465_v2 }
0x1a63   : > { %v6474_v54 = vpack.c.bf16 %v6471_v20, %v6471_v20 }
0x1a65   : > { %7295 = vmatmul.mubr.msk.bf16.vlgmr.msra.gmra.mxu0 %vm944_vm1, %v6474_v54 }
0x1b25   : > { %v6512_v9 = vpop.f32.mrf.mxu0 }
0x1b27   : > { %v6514_v11 = vpop.f32.mrf.mxu0 }
0x1b28   : > { %v6521_v10 = vcombine.low %v6512_v9, %v6514_v11  ;;  %v6560_v11 = vld [vmem:[#allocation3 + $0x1c] sm:$0xf] }
0x1b29   : > { %v6516_v23 = vpop.f32.mrf.mxu0 }
0x1b2a   : > { %v6528_v27 = vrot.slane %v6521_v10, %v8295_v46 }
0x1b2b   : > { %v6517_v49 = vpop.f32.mrf.mxu0 }
0x1b2c   : > { %v6530_v39 = vadd.f32 %v6528_v27, %v6473_v48 }
0x1b2e   : > { %6538 = vrot.lane.b32.xlu0 %v6530_v39, %s8030_s23  ;;  %v7296_v42 = vmul.f32 -1.442695, %v6530_v39 }
0x1b30   : > { %7960 = vpow2.f32 %v7296_v42 }
0x1b3d   : > { %v7961_v34 = vpop.eup %7960 }
0x1b3e   : > { %v6534_v37 = vadd.f32 1.0, %v7961_v34 }
0x1b40   : > { %7962 = vrcp.f32 %v6534_v37 }
0x1b4d   : > { %v7963_v24 = vpop.eup %7962 }
0x1b4e   : > { %v6543_v25 = vmul.f32 %v7963_v24, %v6462_v5  ;;  %v6552_v62 = vrot.slane %v7963_v24, 2 }
0x1ba0   : > { %v6539_v52 = vpop.permute.xlu0 %6538 }
0x1ba1   : > { %v6540_v18 = vrot.slane %v6539_v52, 2 }
0x1ba3   : > { %7964 = vtanh.f32 %v6540_v18 }
0x1bb0   : > { %v7965_v33 = vpop.eup %7964 }
0x1bb1   : > { %v6544_v55 = vmul.f32 %v7965_v33, %v7963_v24 }
0x1bb3   : > { %6546 = vrot.lane.b32.xlu1 %v6544_v55, %s8030_s23 }
0x1bd7   : > { %6659 = vadd.xlane.f32.xlu1 %v6658_v22 }
0x1c25   : > { %v6547_v43 = vpop.permute.xlu1 %6546 }
0x1c26   : > { %v9266_v14 = vadd.f32 %v6547_v43, %v6543_v25 }
0x1c28   : > { %7966 = vtanh.f32 %v9266_v14 }
0x1c35   : > { %v7967_v19 = vpop.eup %7966 }
0x1c36   : > { %6555 = vrot.lane.b32.xlu0 %v7967_v19, %s8030_s23 }
0x1c55   : > { %6656 = vadd.xlane.f32.xlu0 %v6655_v61 }
0x1c60   : > { %v6660_v2 = vpop.xlane.xlu1 %6659 }
0x1c61   : > { %v6669_v9 = vadd.f32 %v7300_v56, %v6660_v2 }
0x1c63   : > { %v7302_v48 = vmul.f32 -1.442695, %v6669_v9 }
0x1ca8   : > { %v6556_v47 = vpop.permute.xlu0 %6555 }
0x1ca9   : > { %v6558_v35 = vmul.f32 %v6556_v47, %v6552_v62 }
0x1cab   : > { %v6561_v8 = vpack.c.bf16 %v6558_v35, %v6558_v35 }
0x1cad   : > { %7297 = vmatmul.mubr.msk.bf16.vlgmr.msra.gmra.mxu1 %vm944_vm1, %v6561_v8 }
0x1cde   : > { %v6657_v7 = vpop.xlane.xlu0 %6656 }
0x1cdf   : > { %v6668_v38 = vadd.f32 %v7300_v56, %v6657_v7 }
0x1ce1   : > { %v7301_v32 = vmul.f32 -1.442695, %v6668_v38 }
0x1ce3   : > { %7968 = vpow2.f32 %v7301_v32 }
0x1cf0   : > { %v7969_v51 = vpop.eup %7968 }
0x1cf1   : > { %v6676_v57 = vadd.f32 1.0, %v7969_v51 }
0x1cf3   : > { %7970 = vrcp.f32 %v6676_v57 }
0x1d00   : > { %v7971_v28 = vpop.eup %7970 }
0x1d01   : > { %v6683_v58 = vsel %vm6682_vm8, %v7971_v28, -inf }
0x1d02   : > { %v6684_v15 = vrot.slane %v6683_v58, 4 }
0x1d04   : > { %v6685_v26 = vmax.f32 %v6683_v58, %v6684_v15  ;;  %v5500_v15 = vrot.slane %v9109_v4, %v8789_v40 }
0x1d06   : > { %v6686_v36 = vrot.slane %v6685_v26, 2 }
0x1d08   : > { %v6687_v31 = vmax.f32 %v6685_v26, %v6686_v36  ;;  %v5668_v36 = vadd.f32 %v9194_v50, %v5500_v15 }
0x1d0a   : > { %v6688_v59 = vrot.slane %v6687_v31, 1 }
0x1d0c   : > { %v6689_v60 = vmax.f32 %v6687_v31, %v6688_v59 }
0x1d0e   : > { %v6697_v13 = vsub.f32 %v7971_v28, %v6689_v60 }
0x1d10   : > { %v6699_v21 = vmul.f32 1.442695, %v6697_v13 }
0x1d12   : > { %7972 = vpow2.f32 %v6699_v21 }
0x1d1f   : > { %v7973_v12 = vpop.eup %7972 }
0x1d20   : > { %v6703_v45 = vsel %vm6682_vm8, %v7973_v12, 0.0 }
0x1d21   : > { %v6704_v63 = vrot.slane %v6703_v45, 4 }
0x1d23   : > { %v6705_v3 = vadd.f32 %v6704_v63, %v6703_v45  ;;  %v5672_v63 = vadd.f32 %v9198_v16, %v5500_v15  ;;  %v7304_v16 = vld [vmem:[%s9362_s14] ss:$0 sm:$0xff] }
0x1d25   : > { %v6706_v30 = vrot.slane %v6705_v3, 2 }
0x1d27   : > { %v6707_v0 = vadd.f32 %v6706_v30, %v6705_v3 }
0x1d29   : > { %v6708_v17 = vrot.slane %v6707_v0, 1 }
0x1d2b   : > { %v6709_v1 = vadd.f32 %v6708_v17, %v6707_v0 }
0x1d2d   : > { %7974 = vrcp.f32 %v6709_v1 }
0x1d2e   : > { %7976 = vpow2.f32 %v7302_v48 }
0x1d3a   : > { %v7975_v27 = vpop.eup %7974 }
0x1d3b   : > { %v6718_v49 = vmul.f32 %v7975_v27, %v7973_v12  ;;  %v7977_v39 = vpop.eup %7976 }
0x1d3c   : > { %v6677_v42 = vadd.f32 1.0, %v7977_v39 }
0x1d3e   : > { %7978 = vrcp.f32 %v6677_v42 }
0x1d4b   : > { %v7979_v34 = vpop.eup %7978 }
0x1d4c   : > { %v6690_v37 = vsel %vm6682_vm8, %v7979_v34, -inf }
0x1d4d   : > { %v6691_v52 = vrot.slane %v6690_v37, 4 }
0x1d4f   : > { %v6692_v18 = vmax.f32 %v6690_v37, %v6691_v52  ;;  %v7305_v52 = vld [vmem:[#allocation5] ss:$0 sm:$0xff] }
0x1d6d   : > { %v6599_v5 = vpop.f32.mrf.mxu1 }
0x1d6f   : > { %v6601_v53 = vpop.f32.mrf.mxu1 }
0x1d70   : > { %v6608_v41 = vcombine.low %v6599_v5, %v6601_v53 }
0x1d71   : > { %v6603_v20 = vpop.f32.mrf.mxu1 }
0x1d72   : > { %v6615_v54 = vrot.slane %v6608_v41, %v8295_v46  ;;  %v6693_v46 = vrot.slane %v6692_v18, 2 }
0x1d73   : > { %v6604_v10 = vpop.f32.mrf.mxu1 }
0x1d74   : > { %v6617_v23 = vadd.f32 %v6615_v54, %v6560_v11  ;;  %v6694_v24 = vmax.f32 %v6692_v18, %v6693_v46 }
0x1d76   : > { %6625 = vrot.lane.b32.xlu0 %v6617_v23, %s8030_s23  ;;  %v6695_v33 = vrot.slane %v6694_v24, 1  ;;  %v7298_v22 = vmul.f32 -1.442695, %v6617_v23 }
0x1d78   : > { %v6696_v55 = vmax.f32 %v6694_v24, %v6695_v33 }
0x1d7a   : > { %6723 = vperm.xlu0 %7875, %v6718_v49   ;;  %v6698_v6 = vsub.f32 %v7979_v34, %v6696_v55  ;;  %v7303_v49 = vld [vmem:[%s9363_s26] ss:$0 sm:$0xff] }
0x1d7c   : > { %v6701_v29 = vmul.f32 1.442695, %v6698_v6 }
0x1d7e   : > { %7980 = vpow2.f32 %v6701_v29 }
0x1d7f   : > { %7982 = vpow2.f32 %v7298_v22 }
0x1d8b   : > { %v7981_v44 = vpop.eup %7980 }
0x1d8c   : > { %v6710_v25 = vsel %vm6682_vm8, %v7981_v44, 0.0  ;;  %v7983_v47 = vpop.eup %7982 }
0x1d8d   : > { %v6711_v43 = vrot.slane %v6710_v25, 4  ;;  %v6621_v8 = vadd.f32 1.0, %v7983_v47 }
0x1d8f   : > { %v6712_v19 = vadd.f32 %v6711_v43, %v6710_v25  ;;  %7984 = vrcp.f32 %v6621_v8 }
0x1d91   : > { %v6713_v61 = vrot.slane %v6712_v19, 2 }
0x1d93   : > { %v6714_v62 = vadd.f32 %v6713_v61, %v6712_v19 }
0x1d95   : > { %v6715_v35 = vrot.slane %v6714_v62, 1 }
0x1d97   : > { %v6716_v38 = vadd.f32 %v6715_v35, %v6714_v62 }
0x1d9c   : > { %v7985_v32 = vpop.eup %7984 }
0x1d9d   : > { %v6630_v31 = vmul.f32 %v7985_v32, %v9266_v14  ;;  %v6639_v27 = vrot.slane %v7985_v32, 2 }
0x1de8   : > { %v6626_v7 = vpop.permute.xlu0 %6625 }
0x1de9   : > { %v6627_v56 = vrot.slane %v6626_v7, 2 }
0x1deb   : > { %7986 = vtanh.f32 %v6627_v56 }
0x1dec   : > { %7988 = vrcp.f32 %v6716_v38 }
0x1df5   : > { %v6724_v26 = vpop.permute.xlu0 %6723 }
0x1df6   : > { %v6731_v59 = vmul.f32 %v6724_v26, %v5668_v36 }
0x1df8   : > { %v7987_v51 = vpop.eup %7986  ;;  %v6733_v21 = vsel %vm3044_vm6, %v6731_v59, 0.0 }
0x1df9   : > { %v6631_v57 = vmul.f32 %v7987_v51, %v7985_v32  ;;  %v7989_v28 = vpop.eup %7988  ;;  %v6734_v12 = vrot.slane %v6733_v21, 4 }
0x1dfa   : > { %v6720_v58 = vmul.f32 %v7989_v28, %v7981_v44 }
0x1dfb   : > { %6633 = vrot.lane.b32.xlu1 %v6631_v57, %s8030_s23  ;;  %v6735_v45 = vadd.f32 %v6734_v12, %v6733_v21 }
0x1dfd   : > { %v6736_v0 = vrot.slane %v6735_v45, 2 }
0x1dff   : > { %6728 = vperm.xlu1 %7874, %v6720_v58   ;;  %v6737_v50 = vadd.f32 %v6736_v0, %v6735_v45 }
0x1e01   : > { %v6738_v5 = vrot.slane %v6737_v50, 1 }
0x1e03   : > { %v6739_v41 = vadd.f32 %v6738_v5, %v6737_v50 }
0x1e05   : > { %v6766_v9 = vmul.f32 %v7304_v16, %v6739_v41 }
0x1e6d   : > { %v6634_v60 = vpop.permute.xlu1 %6633 }
0x1e6e   : > { %v6636_v13 = vadd.f32 %v6634_v60, %v6630_v31 }
0x1e70   : > { %7990 = vtanh.f32 %v6636_v13 }
0x1e7a   : > { %v6729_v3 = vpop.permute.xlu1 %6728 }
0x1e7b   : > { %v6732_v30 = vmul.f32 %v6729_v3, %v5672_v63 }
0x1e7d   : > { %v7991_v17 = vpop.eup %7990  ;;  %v6740_v40 = vsel %vm3044_vm6, %v6732_v30, 0.0 }
0x1e7e   : > { %v6741_v4 = vrot.slane %v6740_v40, 4  ;;  %6642 = vrot.lane.b32.xlu1 %v7991_v17, %s8030_s23 }
0x1e80   : > { %v6742_v14 = vadd.f32 %v6741_v4, %v6740_v40 }
0x1e82   : > { %v6743_v1 = vrot.slane %v6742_v14, 2 }
0x1e84   : > { %v6744_v53 = vadd.f32 %v6743_v1, %v6742_v14 }
0x1e86   : > { %v6745_v2 = vrot.slane %v6744_v53, 1 }
0x1e88   : > { %v6746_v20 = vadd.f32 %v6745_v2, %v6744_v53 }
0x1e8a   : > { %v6767_v54 = vmul.f32 %v7304_v16, %v6746_v20 }
0x1e8c   : > { %v6770_v11 = vrot.slane %v6767_v54, 7 }
0x1e8e   : > { %v6772_v10 = vsel %vm6771_vm9, %v6770_v11, %v6766_v9 }
0x1e8f   : > { %v6775_v23 = vsel %vm6774_vm10, %v6772_v10, 0.0 }
0x1e90   : > { %6776 = vadd.xlane.f32.xlu0 %v6775_v23 }
0x1ef0   : > { %v6643_v48 = vpop.permute.xlu1 %6642 }
0x1ef1   : > { %v6645_v39 = vmul.f32 %v6643_v48, %v6639_v27 }
0x1ef3   : > { %v6754_v42 = vmul.f32 %v7303_v49, %v6645_v39 }
0x1ef5   : > { %v6756_v34 = vsel %vm6755_vm11, %v6754_v42, 0.0 }
0x1ef6   : > { %6757 = vadd.xlane.f32.xlu1 %v6756_v34 }
0x1f19   : > { %v6777_v37 = vpop.xlane.xlu0 %6776 }
0x1f7f   : > { %v6758_v18 = vpop.xlane.xlu1 %6757 }
0x1f80   : > { %v6778_v46 = vadd.f32 %v6777_v37, %v6758_v18 }
0x1f82   : > { %v6786_v24 = vadd.f32 %v7305_v52, %v6778_v46 }
0x1f84   : > { %6788 = vst.msk [vmem:[%s9364_s4] sm:$0x3] %vm6787_vm12, %v6786_v24 }
0x1f85 PF: > { %s9365_s25 = sld [smem:[#allocation7_spill]] }
0x1f86   : > { %s9366_s3 = sld [smem:[#allocation6_spill]] }
0x1f87   : > { %s9367_s28 = sld [smem:[#allocation8_spill]] }
0x1f8b   : > { %s35_s29 = sadd.s32 1, %s9365_s25  }
0x1f8c   : > { %p32_p7 = scmp.ge.s32.totalorder %s35_s29, 4  }
0x1f8e   :  { %34 = sbr.rel (!%p32_p7) target bundleno = 14 (0xe), region = 185 }

</bundles_post_ra>
